<compile_context>
chip_gen: v7x
topology: tpu7x:2x2x1
jax: 0.10.0
libtpu: 0.0.40
codegen_flags: <defaults>
</compile_context>

<pallas_src>
import functools

import jax
import jax.numpy as jnp
from jax.experimental import pallas as pl
from jax.experimental.pallas import tpu as pltpu

# ----------------------------- small config ---------------------------------
N_POINTS   = 64            # dim_in[0] (scaled down from 512)
POINT_DIM  = 3             # dim_in[1]
PATCH_SIZE = 16            # cfg.patch_size (scaled down from 32)
NUM_GROUP  = N_POINTS // PATCH_SIZE   # patch_overlap = 1.0 -> stride == patch_size
ENC_CH     = 128           # cfg.encoder_channel (hidden size)
NUM_QUERY  = 1             # cfg.num_query
NUM_LAYERS = 2             # PointMAEEncoder depth (synthetic)
NUM_HEADS  = 4
MLP_RATIO  = 4
LN_EPS     = 1e-12         # HF-style layer_norm_eps
CTX_KEYS   = ("goal", "robot")
CTX_DIMS   = {"goal": 5, "robot": 3}
CTX_DIM    = sum(CTX_DIMS.values())    # cfg.ctx_dim
QUERY_PAD  = 8             # padded query-token region = one (8,128) sublane tile

# Row indices inside the packed bias / LayerNorm arrays.
EB_PATCH_B1, EB_PATCH_B2, EB_POS_B1, EB_POS_B2, EB_TOK_B, EB_FIN_G, EB_FIN_B = range(7)
LV_LN1G, LV_LN1B, LV_LN2G, LV_LN2B, LV_BO, LV_B2 = range(6)


# ----------------------------- fused Pallas kernel ---------------------------
def _ln(x, g, b, eps):
    mu = jnp.mean(x, axis=-1, keepdims=True)
    var = jnp.mean(jnp.square(x - mu), axis=-1, keepdims=True)
    return (x - mu) * jax.lax.rsqrt(var + eps) * g + b


def _fused_forward_kernel(
        # data (bf16)
        pf_ref, cf_ref, ctx_ref,
        # embed matmul weights (bf16)
        pw1_ref, pw2_ref, qw1_ref, qw2_ref, tw_ref,
        # packed embed biases + final LayerNorm (f32, (8, H))
        eb_ref,
        # stacked per-layer params
        vecs_ref,    # (L, 8, H)  f32: [ln1_g, ln1_b, ln2_g, ln2_b, bo, b2, -, -]
        bqkv_ref,    # (L, 1, 3H) f32
        b1_ref,      # (L, 1, I)  f32
        wqkv_ref,    # (L, H, 3H) bf16
        wo_ref,      # (L, H, H)  bf16
        w1_ref,      # (L, H, I)  bf16
        w2_ref,      # (L, I, H)  bf16
        # output
        o_ref,       # (B*Q, H)   f32
        *, batch, num_heads, num_query, num_group, num_layers, qpad, eps):
    f32, bf16 = jnp.float32, jnp.bfloat16
    B, Q, G = batch, num_query, num_group
    nh = num_heads
    H = o_ref.shape[1]
    hd = H // nh
    BQ, BG = B * Q, B * G
    T = qpad + BG                       # padded token rows (16 at these sizes)
    scale = 1.0 / float(hd) ** 0.5

    eb = eb_ref[...]                    # (8, H) packed embed biases / final LN

    # ---- patch encoder: 2-layer MLP on flattened (patch_size*3) patches ----
    # TODO(synk): standard PointMAE patch encoder is a per-point MLP + max-pool;
    # flatten-MLP variant kept (get_patch_module('mlp') definition is external).
    h = jnp.dot(pf_ref[...], pw1_ref[...], preferred_element_type=f32) \
        + eb[EB_PATCH_B1:EB_PATCH_B1 + 1]
    h = jax.nn.gelu(h, approximate=True)   # TODO(synk): PyTorch nn.GELU defaults to exact erf
    z = jnp.dot(h.astype(bf16), pw2_ref[...], preferred_element_type=f32) \
        + eb[EB_PATCH_B2:EB_PATCH_B2 + 1]

    # ---- positional embedding: 2-layer MLP on patch centers ----
    hp = jnp.dot(cf_ref[...], qw1_ref[...], preferred_element_type=f32) \
        + eb[EB_POS_B1:EB_POS_B1 + 1]
    hp = jax.nn.gelu(hp, approximate=True)
    pe = jnp.dot(hp.astype(bf16), qw2_ref[...], preferred_element_type=f32) \
        + eb[EB_POS_B2:EB_POS_B2 + 1]
    z = z + pe                                          # (BG, H) patch tokens

    # ---- ctx tokens (MultiHeadLinear, unbind=False); ctx rows are pre-padded
    #      to `qpad` so the query region is one full sublane tile ----
    tok = jnp.dot(ctx_ref[...], tw_ref[...], preferred_element_type=f32) \
        + eb[EB_TOK_B:EB_TOK_B + 1]                     # (qpad, H), NUM_QUERY == 1

    # ---- tile-aligned sequence: [queries + pad | patch tokens] ----
    x = jnp.concatenate([tok, z], axis=0)               # (T, H) f32

    # ---- block-diagonal attention bias built in-kernel ----
    ridx = jax.lax.broadcasted_iota(jnp.int32, (T, T), 0)
    cidx = jax.lax.broadcasted_iota(jnp.int32, (T, T), 1)

    def seg(i):
        # batch id + validity per token row (compare/select only, no int div)
        qbid = jnp.zeros(i.shape, jnp.int32)
        pbid = jnp.zeros(i.shape, jnp.int32)
        for b in range(1, B):
            qbid = qbid + (i >= b * Q).astype(jnp.int32)
            pbid = pbid + (i >= qpad + b * G).astype(jnp.int32)
        is_patch = i >= qpad
        bid = jnp.where(is_patch, pbid, qbid)
        valid = (i < BQ) | (is_patch & (i < qpad + BG))
        return bid, valid

    rb, rv = seg(ridx)
    cb, cv = seg(cidx)
    # -1e30 additive mask is safe because the score + bias path stays in f32.
    bias = jnp.where((rb == cb) & rv & cv, 0.0, -1e30).astype(f32)   # (T, T)

    # ---- transformer encoder: pre-LN MHSA + pre-LN GELU-MLP, residuals ----
    for l in range(num_layers):
        vec = vecs_ref[l]                                # (8, H) f32
        ln1g, ln1b = vec[LV_LN1G:LV_LN1G + 1], vec[LV_LN1B:LV_LN1B + 1]
        ln2g, ln2b = vec[LV_LN2G:LV_LN2G + 1], vec[LV_LN2B:LV_LN2B + 1]
        bo, b2 = vec[LV_BO:LV_BO + 1], vec[LV_B2:LV_B2 + 1]

        hsa = _ln(x, ln1g, ln1b, eps)
        # fused QKV projection: one (T,H) x (H,3H) matmul per layer
        qkv = jnp.dot(hsa.astype(bf16), wqkv_ref[l],
                      preferred_element_type=f32) + bqkv_ref[l]       # (T, 3H)
        q16 = (qkv[:, 0:H] * scale).astype(bf16)
        k16 = qkv[:, H:2 * H].astype(bf16)
        v16 = qkv[:, 2 * H:3 * H].astype(bf16)

        # head-batched attention: one einsum pair covering all heads
        q3 = jnp.stack([q16[:, hh * hd:(hh + 1) * hd] for hh in range(nh)], axis=0)
        k3 = jnp.stack([k16[:, hh * hd:(hh + 1) * hd] for hh in range(nh)], axis=0)
        v3 = jnp.stack([v16[:, hh * hd:(hh + 1) * hd] for hh in range(nh)], axis=0)
        sc = jnp.einsum('hqd,hkd->hqk', q3, k3,
                        preferred_element_type=f32) + bias            # (nh, T, T)
        sc = sc - jnp.max(sc, axis=-1, keepdims=True)
        p = jnp.exp(sc)
        p = p * pl.reciprocal(jnp.sum(p, axis=-1, keepdims=True), approx=True)
        oh = jnp.einsum('hqk,hkd->hqd', p.astype(bf16), v3,
                        preferred_element_type=f32)                   # (nh, T, hd)
        oh16 = oh.astype(bf16)

        attn = bo                                                      # (1,H) broadcast
        for hh in range(nh):      # accumulate through matching Wo row blocks
            attn = attn + jnp.dot(oh16[hh], wo_ref[l, hh * hd:(hh + 1) * hd, :],
                                  preferred_element_type=f32)
        x = x + attn

        hm = _ln(x, ln2g, ln2b, eps)
        m = jnp.dot(hm.astype(bf16), w1_ref[l],
                    preferred_element_type=f32) + b1_ref[l]
        m = jax.nn.gelu(m, approximate=True)
        x = x + jnp.dot(m.astype(bf16), w2_ref[l],
                        preferred_element_type=f32) + b2

    # ---- final LayerNorm on the query rows + contiguous output slice ----
    o_ref[...] = _ln(x[0:BQ, :], eb[EB_FIN_G:EB_FIN_G + 1],
                     eb[EB_FIN_B:EB_FIN_B + 1], eps)


def point_patch_forward_fused(params, pf, cf, ctx_pad):
    B = pf.shape[0] // NUM_GROUP
    H = ENC_CH

    def fs(shape):
        nd = len(shape)
        return pl.BlockSpec(shape, lambda i, _nd=nd: (0,) * _nd)

    args = [
        pf, cf, ctx_pad,
        params['patch_w1'], params['patch_w2'],
        params['pos_w1'], params['pos_w2'], params['tok_w'],
        params['embed_bias'],
        params['vecs'], params['bqkv'], params['b1'],
        params['wqkv'], params['wo'], params['w1'], params['w2'],
    ]
    kern = functools.partial(
        _fused_forward_kernel, batch=B, num_heads=NUM_HEADS,
        num_query=NUM_QUERY, num_group=NUM_GROUP, num_layers=NUM_LAYERS,
        qpad=QUERY_PAD, eps=LN_EPS)

    # Whole working set (~1 MB bf16 weights, ~20 KB activations) is
    # VMEM-resident; a single grid step => single launch, no intermediate HBM
    # traffic.
    # TODO(synk): at production sizes (N=512, deeper encoder) stream the
    # stacked (L,...) weights over an 'arbitrary' layer grid axis (needed
    # first on v7x's 64 MiB VMEM) and add a 'parallel' batch axis so the
    # second TensorCore is used.
    return pl.pallas_call(
        kern,
        out_shape=jax.ShapeDtypeStruct((B * NUM_QUERY, H), jnp.float32),
        grid=(1,),
        in_specs=[fs(a.shape) for a in args],
        out_specs=fs((B * NUM_QUERY, H)),
        compiler_params=pltpu.CompilerParams(
            dimension_semantics=("arbitrary",),
            vmem_limit_bytes=32 * 1024 * 1024),
    )(*args)


# ------------------------ grouping (plain-JAX glue) ---------------------------
# FPS + KNN patch grouping is data-dependent argmax/top_k + gather executed
# under torch.no_grad() in the reference; kept in plain JAX (stop_gradient).
# TODO(synk): exact get_group_module('fps') implementation is external; this is
# the standard PointMAE FPS-center + KNN-patch + center-subtract grouping.
def _fps_indices(x, num_group):
    B, N, _ = x.shape
    idxs0 = jnp.zeros((B, num_group), jnp.int32)
    dists0 = jnp.full((B, N), jnp.inf, jnp.float32)

    def body(i, carry):
        idxs, dists = carry
        last = idxs[:, i - 1]
        last_pt = jnp.take_along_axis(
            x, jnp.broadcast_to(last[:, None, None], (B, 1, 3)), axis=1)
        d = jnp.sum(jnp.square(x - last_pt), axis=-1)
        dists = jnp.minimum(dists, d)
        nxt = jnp.argmax(dists, axis=-1).astype(jnp.int32)
        idxs = idxs.at[:, i].set(nxt)
        return idxs, dists

    idxs, _ = jax.lax.fori_loop(1, num_group, body, (idxs0, dists0))
    return idxs


def _group_fps(x, num_group, patch_size):
    x = jax.lax.stop_gradient(x)      # `with th.no_grad()` in the reference
    B, N, _ = x.shape
    ci = _fps_indices(x, num_group)                                        # (B,G)
    c = jnp.take_along_axis(
        x, jnp.broadcast_to(ci[:, :, None], (B, num_group, 3)), axis=1)    # (B,G,3)
    d = jnp.sum(jnp.square(c[:, :, None, :] - x[:, None, :, :]), axis=-1)  # (B,G,N)
    _, knn = jax.lax.top_k(-d, patch_size)                                 # (B,G,K)
    x_exp = jnp.broadcast_to(x[:, None, :, :], (B, num_group, N, 3))
    p = jnp.take_along_axis(
        x_exp,
        jnp.broadcast_to(knn[..., None], (B, num_group, patch_size, 3)),
        axis=2)                                                            # (B,G,K,3)
    p = p - c[:, :, None, :]      # normalize patches w.r.t. their center
    return p, c


# ------------------------------ parameters ------------------------------------
def init_params(key):
    keys = iter(jax.random.split(key, 16))
    H = ENC_CH
    I = MLP_RATIO * ENC_CH
    L = NUM_LAYERS

    def w(shape, scale=0.02):   # matmul weights in bf16 (MXU operands)
        return (scale * jax.random.normal(next(keys), shape,
                                          jnp.float32)).astype(jnp.bfloat16)

    # packed embed biases + final LayerNorm: one (8, H) f32 tile
    eb = jnp.zeros((8, H), jnp.float32).at[EB_FIN_G].set(1.0)
    # packed per-layer LN params + small biases: (L, 8, H) f32
    vecs = jnp.zeros((L, 8, H), jnp.float32)
    vecs = vecs.at[:, LV_LN1G].set(1.0).at[:, LV_LN2G].set(1.0)

    params = {
        'patch_w1': w((PATCH_SIZE * POINT_DIM, H)),
        'patch_w2': w((H, H)),
        'pos_w1': w((POINT_DIM, H)),
        'pos_w2': w((H, H)),
        'tok_w': w((CTX_DIM, NUM_QUERY * H)),
        'embed_bias': eb,
        'vecs': vecs,
        'bqkv': jnp.zeros((L, 1, 3 * H), jnp.float32),
        'b1': jnp.zeros((L, 1, I), jnp.float32),
        'wqkv': w((L, H, 3 * H)),
        'wo': w((L, H, H)),
        'w1': w((L, H, I)),
        'w2': w((L, I, H)),
    }
    return params


# ------------------------------ forward ---------------------------------------
def forward(params, x, ctx):
    s = x.shape                                   # (..., N, 3)
    B = 1
    for d in s[:-2]:
        B *= d
    assert B * NUM_QUERY <= QUERY_PAD, "query padding too small for this batch"
    xf = x.reshape(B, s[-2], s[-1])

    # _group: FPS centers + KNN patches (no_grad, data-dependent -> plain JAX)
    p, c = _group_fps(xf, NUM_GROUP, PATCH_SIZE)  # (B,G,K,3), (B,G,3)
    pf = p.reshape(B * NUM_GROUP, PATCH_SIZE * POINT_DIM).astype(jnp.bfloat16)
    cf = c.reshape(B * NUM_GROUP, POINT_DIM).astype(jnp.bfloat16)

    # ctx concat; pad rows to QUERY_PAD so the query region is one (8,128) tile
    # TODO(synk): NUM_QUERY > 1 requires per-query row packing of the ctx tokens.
    ctx_cat = jnp.concatenate([ctx[k] for k in CTX_KEYS], axis=-1).reshape(B, -1)
    ctx_pad = jnp.zeros((QUERY_PAD, CTX_DIM), jnp.bfloat16)
    ctx_pad = ctx_pad.at[:B].set(ctx_cat.astype(jnp.bfloat16))

    # single fused Pallas kernel: embed + tokenize + encoder + final LN
    emb = point_patch_forward_fused(params, pf, cf, ctx_pad)   # (B*Q, H)
    return emb.reshape(*s[:-2], NUM_QUERY * ENC_CH)


if __name__ == "__main__":
    key = jax.random.PRNGKey(0)
    kx, kg, kr, kp = jax.random.split(key, 4)
    params = init_params(kp)
    x = jax.random.normal(kx, (2, N_POINTS, POINT_DIM), jnp.float32)
    ctx = {
        "goal": jax.random.normal(kg, (2, CTX_DIMS["goal"]), jnp.float32),
        "robot": jax.random.normal(kr, (2, CTX_DIMS["robot"]), jnp.float32),
    }
    out = jax.jit(forward)(params, x, ctx)
    out = jax.block_until_ready(out)
    assert out.shape == (2, NUM_QUERY * ENC_CH), out.shape
    assert bool(jnp.all(jnp.isfinite(out)))
    print("KERNEL_OK")
</pallas_src>

<mosaic_0001>
module attributes {stable_mosaic.version = 11 : i64} {
  func.func @_fused_forward_kernel(%arg0: i32, %arg1: memref<8x48xbf16, #tpu.memory_space<vmem>>, %arg2: memref<8x3xbf16, #tpu.memory_space<vmem>>, %arg3: memref<8x8xbf16, #tpu.memory_space<vmem>>, %arg4: memref<48x128xbf16, #tpu.memory_space<vmem>>, %arg5: memref<128x128xbf16, #tpu.memory_space<vmem>>, %arg6: memref<3x128xbf16, #tpu.memory_space<vmem>>, %arg7: memref<128x128xbf16, #tpu.memory_space<vmem>>, %arg8: memref<8x128xbf16, #tpu.memory_space<vmem>>, %arg9: memref<8x128xf32, #tpu.memory_space<vmem>>, %arg10: memref<2x8x128xf32, #tpu.memory_space<vmem>>, %arg11: memref<2x1x384xf32, #tpu.memory_space<vmem>>, %arg12: memref<2x1x512xf32, #tpu.memory_space<vmem>>, %arg13: memref<2x128x384xbf16, #tpu.memory_space<vmem>>, %arg14: memref<2x128x128xbf16, #tpu.memory_space<vmem>>, %arg15: memref<2x128x512xbf16, #tpu.memory_space<vmem>>, %arg16: memref<2x512x128xbf16, #tpu.memory_space<vmem>>, %arg17: memref<2x128xf32, #tpu.memory_space<vmem>>) attributes {dimension_semantics = [#tpu.dimension_semantics<arbitrary>], iteration_bounds = array<i64: 1>, scalar_prefetch = 0 : i64, scratch_operands = 0 : i64, tpu.core_type = #tpu.core_type<tc>, window_params = [{pipeline_mode = #tpu.pipeline_mode<synchronous>, transform_indices = @transform_0, window_bounds = array<i64: 8, 48>}, {pipeline_mode = #tpu.pipeline_mode<synchronous>, transform_indices = @transform_1, window_bounds = array<i64: 8, 3>}, {pipeline_mode = #tpu.pipeline_mode<synchronous>, transform_indices = @transform_2, window_bounds = array<i64: 8, 8>}, {pipeline_mode = #tpu.pipeline_mode<synchronous>, transform_indices = @transform_3, window_bounds = array<i64: 48, 128>}, {pipeline_mode = #tpu.pipeline_mode<synchronous>, transform_indices = @transform_4, window_bounds = array<i64: 128, 128>}, {pipeline_mode = #tpu.pipeline_mode<synchronous>, transform_indices = @transform_5, window_bounds = array<i64: 3, 128>}, {pipeline_mode = #tpu.pipeline_mode<synchronous>, transform_indices = @transform_6, window_bounds = array<i64: 128, 128>}, {pipeline_mode = #tpu.pipeline_mode<synchronous>, transform_indices = @transform_7, window_bounds = array<i64: 8, 128>}, {pipeline_mode = #tpu.pipeline_mode<synchronous>, transform_indices = @transform_8, window_bounds = array<i64: 8, 128>}, {pipeline_mode = #tpu.pipeline_mode<synchronous>, transform_indices = @transform_9, window_bounds = array<i64: 2, 8, 128>}, {pipeline_mode = #tpu.pipeline_mode<synchronous>, transform_indices = @transform_10, window_bounds = array<i64: 2, 1, 384>}, {pipeline_mode = #tpu.pipeline_mode<synchronous>, transform_indices = @transform_11, window_bounds = array<i64: 2, 1, 512>}, {pipeline_mode = #tpu.pipeline_mode<synchronous>, transform_indices = @transform_12, window_bounds = array<i64: 2, 128, 384>}, {pipeline_mode = #tpu.pipeline_mode<synchronous>, transform_indices = @transform_13, window_bounds = array<i64: 2, 128, 128>}, {pipeline_mode = #tpu.pipeline_mode<synchronous>, transform_indices = @transform_14, window_bounds = array<i64: 2, 128, 512>}, {pipeline_mode = #tpu.pipeline_mode<synchronous>, transform_indices = @transform_15, window_bounds = array<i64: 2, 512, 128>}, {pipeline_mode = #tpu.pipeline_mode<synchronous>, transform_indices = @transform_16, window_bounds = array<i64: 2, 128>}]} {
    %c0 = arith.constant 0 : index
    %c0_0 = arith.constant 0 : index
    %0 = vector.load %arg9[%c0, %c0_0] : memref<8x128xf32, #tpu.memory_space<vmem>>, vector<8x128xf32>
    %c0_1 = arith.constant 0 : index
    %c0_2 = arith.constant 0 : index
    %1 = vector.load %arg1[%c0_1, %c0_2] : memref<8x48xbf16, #tpu.memory_space<vmem>>, vector<8x48xbf16>
    %c0_3 = arith.constant 0 : index
    %c0_4 = arith.constant 0 : index
    %2 = vector.load %arg4[%c0_3, %c0_4] : memref<48x128xbf16, #tpu.memory_space<vmem>>, vector<48x128xbf16>
    %cst = arith.constant dense<0.000000e+00> : vector<8x128xf32>
    %3 = tpu.matmul %1, %2, %cst {dimension_numbers = #tpu.dot_dimension_numbers<[1], [0], [0], [1], [0, 0, 1, 1], [], []>} : vector<8x48xbf16>, vector<48x128xbf16>, vector<8x128xf32> -> vector<8x128xf32>
    %4 = vector.extract_strided_slice %0 {offsets = [0, 0], sizes = [1, 128], strides = [1, 1]} : vector<8x128xf32> to vector<1x128xf32>
    %5 = vector.broadcast %4 : vector<1x128xf32> to vector<8x128xf32>
    %6 = arith.addf %3, %5 : vector<8x128xf32>
    %7 = arith.mulf %6, %6 : vector<8x128xf32>
    %8 = arith.mulf %6, %7 : vector<8x128xf32>
    %cst_5 = arith.constant 4.471500e-02 : f32
    %9 = vector.broadcast %cst_5 : f32 to vector<8x128xf32>
    %10 = arith.mulf %9, %8 : vector<8x128xf32>
    %11 = arith.addf %6, %10 : vector<8x128xf32>
    %cst_6 = arith.constant 0.797884583 : f32
    %12 = vector.broadcast %cst_6 : f32 to vector<8x128xf32>
    %13 = arith.mulf %12, %11 : vector<8x128xf32>
    %14 = math.tanh %13 : vector<8x128xf32>
    %cst_7 = arith.constant 1.000000e+00 : f32
    %15 = vector.broadcast %cst_7 : f32 to vector<8x128xf32>
    %16 = arith.addf %15, %14 : vector<8x128xf32>
    %cst_8 = arith.constant 5.000000e-01 : f32
    %17 = vector.broadcast %cst_8 : f32 to vector<8x128xf32>
    %18 = arith.mulf %17, %16 : vector<8x128xf32>
    %19 = arith.mulf %6, %18 : vector<8x128xf32>
    %20 = arith.truncf %19 : vector<8x128xf32> to vector<8x128xbf16>
    %c0_9 = arith.constant 0 : index
    %c0_10 = arith.constant 0 : index
    %21 = vector.load %arg5[%c0_9, %c0_10] : memref<128x128xbf16, #tpu.memory_space<vmem>>, vector<128x128xbf16>
    %cst_11 = arith.constant dense<0.000000e+00> : vector<8x128xf32>
    %22 = tpu.matmul %20, %21, %cst_11 {dimension_numbers = #tpu.dot_dimension_numbers<[1], [0], [0], [1], [0, 0, 1, 1], [], []>} : vector<8x128xbf16>, vector<128x128xbf16>, vector<8x128xf32> -> vector<8x128xf32>
    %23 = vector.extract_strided_slice %0 {offsets = [1, 0], sizes = [1, 128], strides = [1, 1]} : vector<8x128xf32> to vector<1x128xf32>
    %24 = vector.broadcast %23 : vector<1x128xf32> to vector<8x128xf32>
    %25 = arith.addf %22, %24 : vector<8x128xf32>
    %c0_12 = arith.constant 0 : index
    %c0_13 = arith.constant 0 : index
    %26 = vector.load %arg2[%c0_12, %c0_13] : memref<8x3xbf16, #tpu.memory_space<vmem>>, vector<8x3xbf16>
    %c0_14 = arith.constant 0 : index
    %c0_15 = arith.constant 0 : index
    %27 = vector.load %arg6[%c0_14, %c0_15] : memref<3x128xbf16, #tpu.memory_space<vmem>>, vector<3x128xbf16>
    %cst_16 = arith.constant dense<0.000000e+00> : vector<8x128xf32>
    %28 = tpu.matmul %26, %27, %cst_16 {dimension_numbers = #tpu.dot_dimension_numbers<[1], [0], [0], [1], [0, 0, 1, 1], [], []>} : vector<8x3xbf16>, vector<3x128xbf16>, vector<8x128xf32> -> vector<8x128xf32>
    %29 = vector.extract_strided_slice %0 {offsets = [2, 0], sizes = [1, 128], strides = [1, 1]} : vector<8x128xf32> to vector<1x128xf32>
    %30 = vector.broadcast %29 : vector<1x128xf32> to vector<8x128xf32>
    %31 = arith.addf %28, %30 : vector<8x128xf32>
    %32 = arith.mulf %31, %31 : vector<8x128xf32>
    %33 = arith.mulf %31, %32 : vector<8x128xf32>
    %cst_17 = arith.constant 4.471500e-02 : f32
    %34 = vector.broadcast %cst_17 : f32 to vector<8x128xf32>
    %35 = arith.mulf %34, %33 : vector<8x128xf32>
    %36 = arith.addf %31, %35 : vector<8x128xf32>
    %cst_18 = arith.constant 0.797884583 : f32
    %37 = vector.broadcast %cst_18 : f32 to vector<8x128xf32>
    %38 = arith.mulf %37, %36 : vector<8x128xf32>
    %39 = math.tanh %38 : vector<8x128xf32>
    %cst_19 = arith.constant 1.000000e+00 : f32
    %40 = vector.broadcast %cst_19 : f32 to vector<8x128xf32>
    %41 = arith.addf %40, %39 : vector<8x128xf32>
    %cst_20 = arith.constant 5.000000e-01 : f32
    %42 = vector.broadcast %cst_20 : f32 to vector<8x128xf32>
    %43 = arith.mulf %42, %41 : vector<8x128xf32>
    %44 = arith.mulf %31, %43 : vector<8x128xf32>
    %45 = arith.truncf %44 : vector<8x128xf32> to vector<8x128xbf16>
    %c0_21 = arith.constant 0 : index
    %c0_22 = arith.constant 0 : index
    %46 = vector.load %arg7[%c0_21, %c0_22] : memref<128x128xbf16, #tpu.memory_space<vmem>>, vector<128x128xbf16>
    %cst_23 = arith.constant dense<0.000000e+00> : vector<8x128xf32>
    %47 = tpu.matmul %45, %46, %cst_23 {dimension_numbers = #tpu.dot_dimension_numbers<[1], [0], [0], [1], [0, 0, 1, 1], [], []>} : vector<8x128xbf16>, vector<128x128xbf16>, vector<8x128xf32> -> vector<8x128xf32>
    %48 = vector.extract_strided_slice %0 {offsets = [3, 0], sizes = [1, 128], strides = [1, 1]} : vector<8x128xf32> to vector<1x128xf32>
    %49 = vector.broadcast %48 : vector<1x128xf32> to vector<8x128xf32>
    %50 = arith.addf %47, %49 : vector<8x128xf32>
    %51 = arith.addf %25, %50 : vector<8x128xf32>
    %c0_24 = arith.constant 0 : index
    %c0_25 = arith.constant 0 : index
    %52 = vector.load %arg3[%c0_24, %c0_25] : memref<8x8xbf16, #tpu.memory_space<vmem>>, vector<8x8xbf16>
    %c0_26 = arith.constant 0 : index
    %c0_27 = arith.constant 0 : index
    %53 = vector.load %arg8[%c0_26, %c0_27] : memref<8x128xbf16, #tpu.memory_space<vmem>>, vector<8x128xbf16>
    %cst_28 = arith.constant dense<0.000000e+00> : vector<8x128xf32>
    %54 = tpu.matmul %52, %53, %cst_28 {dimension_numbers = #tpu.dot_dimension_numbers<[1], [0], [0], [1], [0, 0, 1, 1], [], []>} : vector<8x8xbf16>, vector<8x128xbf16>, vector<8x128xf32> -> vector<8x128xf32>
    %55 = vector.extract_strided_slice %0 {offsets = [4, 0], sizes = [1, 128], strides = [1, 1]} : vector<8x128xf32> to vector<1x128xf32>
    %56 = vector.broadcast %55 : vector<1x128xf32> to vector<8x128xf32>
    %57 = arith.addf %54, %56 : vector<8x128xf32>
    %58 = tpu.concatenate %57, %51 in 0 : vector<8x128xf32>, vector<8x128xf32> -> vector<16x128xf32>
    %59 = tpu.iota {dimensions = array<i32: 0>} : vector<16x16xi32>
    %60 = tpu.iota {dimensions = array<i32: 1>} : vector<16x16xi32>
    %c0_i32 = arith.constant 0 : i32
    %61 = vector.broadcast %c0_i32 : i32 to vector<16x16xi32>
    %c0_i32_29 = arith.constant 0 : i32
    %62 = vector.broadcast %c0_i32_29 : i32 to vector<16x16xi32>
    %c1_i32 = arith.constant 1 : i32
    %63 = vector.broadcast %c1_i32 : i32 to vector<16x16xi32>
    %64 = arith.cmpi sge, %59, %63 : vector<16x16xi32>
    %65 = arith.extui %64 : vector<16x16xi1> to vector<16x16xi32>
    %66 = arith.addi %61, %65 : vector<16x16xi32>
    %c12_i32 = arith.constant 12 : i32
    %67 = vector.broadcast %c12_i32 : i32 to vector<16x16xi32>
    %68 = arith.cmpi sge, %59, %67 : vector<16x16xi32>
    %69 = arith.extui %68 : vector<16x16xi1> to vector<16x16xi32>
    %70 = arith.addi %62, %69 : vector<16x16xi32>
    %c8_i32 = arith.constant 8 : i32
    %71 = vector.broadcast %c8_i32 : i32 to vector<16x16xi32>
    %72 = arith.cmpi sge, %59, %71 : vector<16x16xi32>
    %73 = arith.select %72, %70, %66 : vector<16x16xi1>, vector<16x16xi32>
    %c2_i32 = arith.constant 2 : i32
    %74 = vector.broadcast %c2_i32 : i32 to vector<16x16xi32>
    %75 = arith.cmpi slt, %59, %74 : vector<16x16xi32>
    %c16_i32 = arith.constant 16 : i32
    %76 = vector.broadcast %c16_i32 : i32 to vector<16x16xi32>
    %77 = arith.cmpi slt, %59, %76 : vector<16x16xi32>
    %78 = arith.andi %72, %77 : vector<16x16xi1>
    %79 = arith.ori %75, %78 : vector<16x16xi1>
    %c0_i32_30 = arith.constant 0 : i32
    %80 = vector.broadcast %c0_i32_30 : i32 to vector<16x16xi32>
    %c0_i32_31 = arith.constant 0 : i32
    %81 = vector.broadcast %c0_i32_31 : i32 to vector<16x16xi32>
    %c1_i32_32 = arith.constant 1 : i32
    %82 = vector.broadcast %c1_i32_32 : i32 to vector<16x16xi32>
    %83 = arith.cmpi sge, %60, %82 : vector<16x16xi32>
    %84 = arith.extui %83 : vector<16x16xi1> to vector<16x16xi32>
    %85 = arith.addi %80, %84 : vector<16x16xi32>
    %c12_i32_33 = arith.constant 12 : i32
    %86 = vector.broadcast %c12_i32_33 : i32 to vector<16x16xi32>
    %87 = arith.cmpi sge, %60, %86 : vector<16x16xi32>
    %88 = arith.extui %87 : vector<16x16xi1> to vector<16x16xi32>
    %89 = arith.addi %81, %88 : vector<16x16xi32>
    %c8_i32_34 = arith.constant 8 : i32
    %90 = vector.broadcast %c8_i32_34 : i32 to vector<16x16xi32>
    %91 = arith.cmpi sge, %60, %90 : vector<16x16xi32>
    %92 = arith.select %91, %89, %85 : vector<16x16xi1>, vector<16x16xi32>
    %c2_i32_35 = arith.constant 2 : i32
    %93 = vector.broadcast %c2_i32_35 : i32 to vector<16x16xi32>
    %94 = arith.cmpi slt, %60, %93 : vector<16x16xi32>
    %c16_i32_36 = arith.constant 16 : i32
    %95 = vector.broadcast %c16_i32_36 : i32 to vector<16x16xi32>
    %96 = arith.cmpi slt, %60, %95 : vector<16x16xi32>
    %97 = arith.andi %91, %96 : vector<16x16xi1>
    %98 = arith.ori %94, %97 : vector<16x16xi1>
    %99 = arith.cmpi eq, %73, %92 : vector<16x16xi32>
    %100 = arith.andi %99, %79 : vector<16x16xi1>
    %101 = arith.andi %100, %98 : vector<16x16xi1>
    %cst_37 = arith.constant 0.000000e+00 : f32
    %cst_38 = arith.constant -1.000000e+30 : f32
    %102 = vector.broadcast %cst_37 : f32 to vector<16x16xf32>
    %103 = vector.broadcast %cst_38 : f32 to vector<16x16xf32>
    %104 = arith.select %101, %102, %103 : vector<16x16xi1>, vector<16x16xf32>
    %c0_39 = arith.constant 0 : index
    %c0_40 = arith.constant 0 : index
    %c0_41 = arith.constant 0 : index
    %105 = vector.load %arg10[%c0_39, %c0_40, %c0_41] : memref<2x8x128xf32, #tpu.memory_space<vmem>>, vector<1x8x128xf32>
    %106 = vector.shape_cast %105 : vector<1x8x128xf32> to vector<8x128xf32>
    %107 = vector.extract_strided_slice %106 {offsets = [0, 0], sizes = [1, 128], strides = [1, 1]} : vector<8x128xf32> to vector<1x128xf32>
    %108 = vector.extract_strided_slice %106 {offsets = [1, 0], sizes = [1, 128], strides = [1, 1]} : vector<8x128xf32> to vector<1x128xf32>
    %109 = vector.extract_strided_slice %106 {offsets = [2, 0], sizes = [1, 128], strides = [1, 1]} : vector<8x128xf32> to vector<1x128xf32>
    %110 = vector.extract_strided_slice %106 {offsets = [3, 0], sizes = [1, 128], strides = [1, 1]} : vector<8x128xf32> to vector<1x128xf32>
    %111 = vector.extract_strided_slice %106 {offsets = [4, 0], sizes = [1, 128], strides = [1, 1]} : vector<8x128xf32> to vector<1x128xf32>
    %112 = vector.extract_strided_slice %106 {offsets = [5, 0], sizes = [1, 128], strides = [1, 1]} : vector<8x128xf32> to vector<1x128xf32>
    %cst_42 = arith.constant dense<0.000000e+00> : vector<16xf32>
    %113 = vector.multi_reduction <add>, %58, %cst_42 [1] : vector<16x128xf32> to vector<16xf32>
    %114 = vector.shape_cast %113 : vector<16xf32> to vector<16x1xf32>
    %cst_43 = arith.constant 1.280000e+02 : f32
    %115 = vector.broadcast %cst_43 : f32 to vector<16x1xf32>
    %116 = arith.divf %114, %115 : vector<16x1xf32>
    %117 = vector.broadcast %116 : vector<16x1xf32> to vector<16x128xf32>
    %118 = arith.subf %58, %117 : vector<16x128xf32>
    %119 = arith.mulf %118, %118 : vector<16x128xf32>
    %cst_44 = arith.constant dense<0.000000e+00> : vector<16xf32>
    %120 = vector.multi_reduction <add>, %119, %cst_44 [1] : vector<16x128xf32> to vector<16xf32>
    %121 = vector.shape_cast %120 : vector<16xf32> to vector<16x1xf32>
    %cst_45 = arith.constant 1.280000e+02 : f32
    %122 = vector.broadcast %cst_45 : f32 to vector<16x1xf32>
    %123 = arith.divf %121, %122 : vector<16x1xf32>
    %124 = vector.broadcast %116 : vector<16x1xf32> to vector<16x128xf32>
    %125 = arith.subf %58, %124 : vector<16x128xf32>
    %cst_46 = arith.constant 9.99999996E-13 : f32
    %126 = vector.broadcast %cst_46 : f32 to vector<16x1xf32>
    %127 = arith.addf %123, %126 : vector<16x1xf32>
    %128 = math.rsqrt %127 : vector<16x1xf32>
    %129 = vector.broadcast %128 : vector<16x1xf32> to vector<16x128xf32>
    %130 = arith.mulf %125, %129 : vector<16x128xf32>
    %131 = vector.broadcast %107 : vector<1x128xf32> to vector<16x128xf32>
    %132 = arith.mulf %130, %131 : vector<16x128xf32>
    %133 = vector.broadcast %108 : vector<1x128xf32> to vector<16x128xf32>
    %134 = arith.addf %132, %133 : vector<16x128xf32>
    %135 = arith.truncf %134 : vector<16x128xf32> to vector<16x128xbf16>
    %c0_47 = arith.constant 0 : index
    %c0_48 = arith.constant 0 : index
    %c0_49 = arith.constant 0 : index
    %136 = vector.load %arg13[%c0_47, %c0_48, %c0_49] : memref<2x128x384xbf16, #tpu.memory_space<vmem>>, vector<1x128x384xbf16>
    %137 = vector.shape_cast %136 : vector<1x128x384xbf16> to vector<128x384xbf16>
    %cst_50 = arith.constant dense<0.000000e+00> : vector<16x384xf32>
    %138 = tpu.matmul %135, %137, %cst_50 {dimension_numbers = #tpu.dot_dimension_numbers<[1], [0], [0], [1], [0, 0, 1, 1], [], []>} : vector<16x128xbf16>, vector<128x384xbf16>, vector<16x384xf32> -> vector<16x384xf32>
    %c0_51 = arith.constant 0 : index
    %c0_52 = arith.constant 0 : index
    %c0_53 = arith.constant 0 : index
    %139 = vector.load %arg11[%c0_51, %c0_52, %c0_53] : memref<2x1x384xf32, #tpu.memory_space<vmem>>, vector<1x1x384xf32>
    %140 = vector.shape_cast %139 : vector<1x1x384xf32> to vector<1x384xf32>
    %141 = vector.broadcast %140 : vector<1x384xf32> to vector<16x384xf32>
    %142 = arith.addf %138, %141 : vector<16x384xf32>
    %143 = vector.extract_strided_slice %142 {offsets = [0, 0], sizes = [16, 128], strides = [1, 1]} : vector<16x384xf32> to vector<16x128xf32>
    %cst_54 = arith.constant 0.176776692 : f32
    %144 = vector.broadcast %cst_54 : f32 to vector<16x128xf32>
    %145 = arith.mulf %143, %144 : vector<16x128xf32>
    %146 = arith.truncf %145 : vector<16x128xf32> to vector<16x128xbf16>
    %147 = vector.extract_strided_slice %142 {offsets = [0, 128], sizes = [16, 128], strides = [1, 1]} : vector<16x384xf32> to vector<16x128xf32>
    %148 = arith.truncf %147 : vector<16x128xf32> to vector<16x128xbf16>
    %149 = vector.extract_strided_slice %142 {offsets = [0, 256], sizes = [16, 128], strides = [1, 1]} : vector<16x384xf32> to vector<16x128xf32>
    %150 = arith.truncf %149 : vector<16x128xf32> to vector<16x128xbf16>
    %151 = vector.extract_strided_slice %146 {offsets = [0, 0], sizes = [16, 32], strides = [1, 1]} : vector<16x128xbf16> to vector<16x32xbf16>
    %152 = vector.extract_strided_slice %146 {offsets = [0, 32], sizes = [16, 32], strides = [1, 1]} : vector<16x128xbf16> to vector<16x32xbf16>
    %153 = vector.extract_strided_slice %146 {offsets = [0, 64], sizes = [16, 32], strides = [1, 1]} : vector<16x128xbf16> to vector<16x32xbf16>
    %154 = vector.extract_strided_slice %146 {offsets = [0, 96], sizes = [16, 32], strides = [1, 1]} : vector<16x128xbf16> to vector<16x32xbf16>
    %155 = vector.shape_cast %151 : vector<16x32xbf16> to vector<1x16x32xbf16>
    %156 = vector.shape_cast %152 : vector<16x32xbf16> to vector<1x16x32xbf16>
    %157 = vector.shape_cast %153 : vector<16x32xbf16> to vector<1x16x32xbf16>
    %158 = vector.shape_cast %154 : vector<16x32xbf16> to vector<1x16x32xbf16>
    %159 = tpu.concatenate %155, %156, %157, %158 in 0 : vector<1x16x32xbf16>, vector<1x16x32xbf16>, vector<1x16x32xbf16>, vector<1x16x32xbf16> -> vector<4x16x32xbf16>
    %160 = vector.extract_strided_slice %148 {offsets = [0, 0], sizes = [16, 32], strides = [1, 1]} : vector<16x128xbf16> to vector<16x32xbf16>
    %161 = vector.extract_strided_slice %148 {offsets = [0, 32], sizes = [16, 32], strides = [1, 1]} : vector<16x128xbf16> to vector<16x32xbf16>
    %162 = vector.extract_strided_slice %148 {offsets = [0, 64], sizes = [16, 32], strides = [1, 1]} : vector<16x128xbf16> to vector<16x32xbf16>
    %163 = vector.extract_strided_slice %148 {offsets = [0, 96], sizes = [16, 32], strides = [1, 1]} : vector<16x128xbf16> to vector<16x32xbf16>
    %164 = vector.shape_cast %160 : vector<16x32xbf16> to vector<1x16x32xbf16>
    %165 = vector.shape_cast %161 : vector<16x32xbf16> to vector<1x16x32xbf16>
    %166 = vector.shape_cast %162 : vector<16x32xbf16> to vector<1x16x32xbf16>
    %167 = vector.shape_cast %163 : vector<16x32xbf16> to vector<1x16x32xbf16>
    %168 = tpu.concatenate %164, %165, %166, %167 in 0 : vector<1x16x32xbf16>, vector<1x16x32xbf16>, vector<1x16x32xbf16>, vector<1x16x32xbf16> -> vector<4x16x32xbf16>
    %169 = vector.extract_strided_slice %150 {offsets = [0, 0], sizes = [16, 32], strides = [1, 1]} : vector<16x128xbf16> to vector<16x32xbf16>
    %170 = vector.extract_strided_slice %150 {offsets = [0, 32], sizes = [16, 32], strides = [1, 1]} : vector<16x128xbf16> to vector<16x32xbf16>
    %171 = vector.extract_strided_slice %150 {offsets = [0, 64], sizes = [16, 32], strides = [1, 1]} : vector<16x128xbf16> to vector<16x32xbf16>
    %172 = vector.extract_strided_slice %150 {offsets = [0, 96], sizes = [16, 32], strides = [1, 1]} : vector<16x128xbf16> to vector<16x32xbf16>
    %173 = vector.shape_cast %169 : vector<16x32xbf16> to vector<1x16x32xbf16>
    %174 = vector.shape_cast %170 : vector<16x32xbf16> to vector<1x16x32xbf16>
    %175 = vector.shape_cast %171 : vector<16x32xbf16> to vector<1x16x32xbf16>
    %176 = vector.shape_cast %172 : vector<16x32xbf16> to vector<1x16x32xbf16>
    %177 = tpu.concatenate %173, %174, %175, %176 in 0 : vector<1x16x32xbf16>, vector<1x16x32xbf16>, vector<1x16x32xbf16>, vector<1x16x32xbf16> -> vector<4x16x32xbf16>
    "tpu.trace_start"() <{level = 10 : i32, message = "hqd,hkd->hqk"}> : () -> ()
    %cst_55 = arith.constant dense<0.000000e+00> : vector<4x16x16xf32>
    %178 = tpu.matmul %159, %168, %cst_55 {dimension_numbers = #tpu.dot_dimension_numbers<[2], [2], [1], [1], [0, 0, 0, 1, 1, 1], [0], [0]>} : vector<4x16x32xbf16>, vector<4x16x32xbf16>, vector<4x16x16xf32> -> vector<4x16x16xf32>
    "tpu.trace_stop"() : () -> ()
    %179 = vector.shape_cast %104 : vector<16x16xf32> to vector<1x16x16xf32>
    %180 = vector.broadcast %179 : vector<1x16x16xf32> to vector<4x16x16xf32>
    %181 = arith.addf %178, %180 : vector<4x16x16xf32>
    %cst_56 = arith.constant dense<0xFF800000> : vector<4x16xf32>
    %182 = vector.multi_reduction <maximumf>, %181, %cst_56 [2] : vector<4x16x16xf32> to vector<4x16xf32>
    %183 = vector.shape_cast %182 : vector<4x16xf32> to vector<4x16x1xf32>
    %184 = vector.broadcast %183 : vector<4x16x1xf32> to vector<4x16x16xf32>
    %185 = arith.subf %181, %184 : vector<4x16x16xf32>
    %186 = math.exp %185 : vector<4x16x16xf32>
    %cst_57 = arith.constant dense<0.000000e+00> : vector<4x16xf32>
    %187 = vector.multi_reduction <add>, %186, %cst_57 [2] : vector<4x16x16xf32> to vector<4x16xf32>
    %188 = vector.shape_cast %187 : vector<4x16xf32> to vector<4x16x1xf32>
    %189 = tpu.reciprocal %188 {approx = true} : vector<4x16x1xf32> -> vector<4x16x1xf32>
    %190 = vector.broadcast %189 : vector<4x16x1xf32> to vector<4x16x16xf32>
    %191 = arith.mulf %186, %190 : vector<4x16x16xf32>
    %192 = arith.truncf %191 : vector<4x16x16xf32> to vector<4x16x16xbf16>
    "tpu.trace_start"() <{level = 10 : i32, message = "hqk,hkd->hqd"}> : () -> ()
    %cst_58 = arith.constant dense<0.000000e+00> : vector<4x16x32xf32>
    %193 = tpu.matmul %192, %177, %cst_58 {dimension_numbers = #tpu.dot_dimension_numbers<[2], [1], [1], [2], [0, 0, 0, 1, 1, 2], [0], [0]>} : vector<4x16x16xbf16>, vector<4x16x32xbf16>, vector<4x16x32xf32> -> vector<4x16x32xf32>
    "tpu.trace_stop"() : () -> ()
    %194 = arith.truncf %193 : vector<4x16x32xf32> to vector<4x16x32xbf16>
    %195 = vector.extract_strided_slice %194 {offsets = [0, 0, 0], sizes = [1, 16, 32], strides = [1, 1, 1]} : vector<4x16x32xbf16> to vector<1x16x32xbf16>
    %196 = vector.shape_cast %195 : vector<1x16x32xbf16> to vector<16x32xbf16>
    %c0_59 = arith.constant 0 : index
    %c0_60 = arith.constant 0 : index
    %c0_61 = arith.constant 0 : index
    %197 = vector.load %arg14[%c0_59, %c0_60, %c0_61] : memref<2x128x128xbf16, #tpu.memory_space<vmem>>, vector<1x32x128xbf16>
    %198 = vector.shape_cast %197 : vector<1x32x128xbf16> to vector<32x128xbf16>
    %cst_62 = arith.constant dense<0.000000e+00> : vector<16x128xf32>
    %199 = tpu.matmul %196, %198, %cst_62 {dimension_numbers = #tpu.dot_dimension_numbers<[1], [0], [0], [1], [0, 0, 1, 1], [], []>} : vector<16x32xbf16>, vector<32x128xbf16>, vector<16x128xf32> -> vector<16x128xf32>
    %200 = vector.broadcast %111 : vector<1x128xf32> to vector<16x128xf32>
    %201 = arith.addf %200, %199 : vector<16x128xf32>
    %202 = vector.extract_strided_slice %194 {offsets = [1, 0, 0], sizes = [1, 16, 32], strides = [1, 1, 1]} : vector<4x16x32xbf16> to vector<1x16x32xbf16>
    %203 = vector.shape_cast %202 : vector<1x16x32xbf16> to vector<16x32xbf16>
    %c0_63 = arith.constant 0 : index
    %c32 = arith.constant 32 : index
    %c0_64 = arith.constant 0 : index
    %204 = vector.load %arg14[%c0_63, %c32, %c0_64] : memref<2x128x128xbf16, #tpu.memory_space<vmem>>, vector<1x32x128xbf16>
    %205 = vector.shape_cast %204 : vector<1x32x128xbf16> to vector<32x128xbf16>
    %cst_65 = arith.constant dense<0.000000e+00> : vector<16x128xf32>
    %206 = tpu.matmul %203, %205, %cst_65 {dimension_numbers = #tpu.dot_dimension_numbers<[1], [0], [0], [1], [0, 0, 1, 1], [], []>} : vector<16x32xbf16>, vector<32x128xbf16>, vector<16x128xf32> -> vector<16x128xf32>
    %207 = arith.addf %201, %206 : vector<16x128xf32>
    %208 = vector.extract_strided_slice %194 {offsets = [2, 0, 0], sizes = [1, 16, 32], strides = [1, 1, 1]} : vector<4x16x32xbf16> to vector<1x16x32xbf16>
    %209 = vector.shape_cast %208 : vector<1x16x32xbf16> to vector<16x32xbf16>
    %c0_66 = arith.constant 0 : index
    %c64 = arith.constant 64 : index
    %c0_67 = arith.constant 0 : index
    %210 = vector.load %arg14[%c0_66, %c64, %c0_67] : memref<2x128x128xbf16, #tpu.memory_space<vmem>>, vector<1x32x128xbf16>
    %211 = vector.shape_cast %210 : vector<1x32x128xbf16> to vector<32x128xbf16>
    %cst_68 = arith.constant dense<0.000000e+00> : vector<16x128xf32>
    %212 = tpu.matmul %209, %211, %cst_68 {dimension_numbers = #tpu.dot_dimension_numbers<[1], [0], [0], [1], [0, 0, 1, 1], [], []>} : vector<16x32xbf16>, vector<32x128xbf16>, vector<16x128xf32> -> vector<16x128xf32>
    %213 = arith.addf %207, %212 : vector<16x128xf32>
    %214 = vector.extract_strided_slice %194 {offsets = [3, 0, 0], sizes = [1, 16, 32], strides = [1, 1, 1]} : vector<4x16x32xbf16> to vector<1x16x32xbf16>
    %215 = vector.shape_cast %214 : vector<1x16x32xbf16> to vector<16x32xbf16>
    %c0_69 = arith.constant 0 : index
    %c96 = arith.constant 96 : index
    %c0_70 = arith.constant 0 : index
    %216 = vector.load %arg14[%c0_69, %c96, %c0_70] : memref<2x128x128xbf16, #tpu.memory_space<vmem>>, vector<1x32x128xbf16>
    %217 = vector.shape_cast %216 : vector<1x32x128xbf16> to vector<32x128xbf16>
    %cst_71 = arith.constant dense<0.000000e+00> : vector<16x128xf32>
    %218 = tpu.matmul %215, %217, %cst_71 {dimension_numbers = #tpu.dot_dimension_numbers<[1], [0], [0], [1], [0, 0, 1, 1], [], []>} : vector<16x32xbf16>, vector<32x128xbf16>, vector<16x128xf32> -> vector<16x128xf32>
    %219 = arith.addf %213, %218 : vector<16x128xf32>
    %220 = arith.addf %58, %219 : vector<16x128xf32>
    %cst_72 = arith.constant dense<0.000000e+00> : vector<16xf32>
    %221 = vector.multi_reduction <add>, %220, %cst_72 [1] : vector<16x128xf32> to vector<16xf32>
    %222 = vector.shape_cast %221 : vector<16xf32> to vector<16x1xf32>
    %cst_73 = arith.constant 1.280000e+02 : f32
    %223 = vector.broadcast %cst_73 : f32 to vector<16x1xf32>
    %224 = arith.divf %222, %223 : vector<16x1xf32>
    %225 = vector.broadcast %224 : vector<16x1xf32> to vector<16x128xf32>
    %226 = arith.subf %220, %225 : vector<16x128xf32>
    %227 = arith.mulf %226, %226 : vector<16x128xf32>
    %cst_74 = arith.constant dense<0.000000e+00> : vector<16xf32>
    %228 = vector.multi_reduction <add>, %227, %cst_74 [1] : vector<16x128xf32> to vector<16xf32>
    %229 = vector.shape_cast %228 : vector<16xf32> to vector<16x1xf32>
    %cst_75 = arith.constant 1.280000e+02 : f32
    %230 = vector.broadcast %cst_75 : f32 to vector<16x1xf32>
    %231 = arith.divf %229, %230 : vector<16x1xf32>
    %232 = vector.broadcast %224 : vector<16x1xf32> to vector<16x128xf32>
    %233 = arith.subf %220, %232 : vector<16x128xf32>
    %cst_76 = arith.constant 9.99999996E-13 : f32
    %234 = vector.broadcast %cst_76 : f32 to vector<16x1xf32>
    %235 = arith.addf %231, %234 : vector<16x1xf32>
    %236 = math.rsqrt %235 : vector<16x1xf32>
    %237 = vector.broadcast %236 : vector<16x1xf32> to vector<16x128xf32>
    %238 = arith.mulf %233, %237 : vector<16x128xf32>
    %239 = vector.broadcast %109 : vector<1x128xf32> to vector<16x128xf32>
    %240 = arith.mulf %238, %239 : vector<16x128xf32>
    %241 = vector.broadcast %110 : vector<1x128xf32> to vector<16x128xf32>
    %242 = arith.addf %240, %241 : vector<16x128xf32>
    %243 = arith.truncf %242 : vector<16x128xf32> to vector<16x128xbf16>
    %c0_77 = arith.constant 0 : index
    %c0_78 = arith.constant 0 : index
    %c0_79 = arith.constant 0 : index
    %244 = vector.load %arg15[%c0_77, %c0_78, %c0_79] : memref<2x128x512xbf16, #tpu.memory_space<vmem>>, vector<1x128x512xbf16>
    %245 = vector.shape_cast %244 : vector<1x128x512xbf16> to vector<128x512xbf16>
    %cst_80 = arith.constant dense<0.000000e+00> : vector<16x512xf32>
    %246 = tpu.matmul %243, %245, %cst_80 {dimension_numbers = #tpu.dot_dimension_numbers<[1], [0], [0], [1], [0, 0, 1, 1], [], []>} : vector<16x128xbf16>, vector<128x512xbf16>, vector<16x512xf32> -> vector<16x512xf32>
    %c0_81 = arith.constant 0 : index
    %c0_82 = arith.constant 0 : index
    %c0_83 = arith.constant 0 : index
    %247 = vector.load %arg12[%c0_81, %c0_82, %c0_83] : memref<2x1x512xf32, #tpu.memory_space<vmem>>, vector<1x1x512xf32>
    %248 = vector.shape_cast %247 : vector<1x1x512xf32> to vector<1x512xf32>
    %249 = vector.broadcast %248 : vector<1x512xf32> to vector<16x512xf32>
    %250 = arith.addf %246, %249 : vector<16x512xf32>
    %251 = arith.mulf %250, %250 : vector<16x512xf32>
    %252 = arith.mulf %250, %251 : vector<16x512xf32>
    %cst_84 = arith.constant 4.471500e-02 : f32
    %253 = vector.broadcast %cst_84 : f32 to vector<16x512xf32>
    %254 = arith.mulf %253, %252 : vector<16x512xf32>
    %255 = arith.addf %250, %254 : vector<16x512xf32>
    %cst_85 = arith.constant 0.797884583 : f32
    %256 = vector.broadcast %cst_85 : f32 to vector<16x512xf32>
    %257 = arith.mulf %256, %255 : vector<16x512xf32>
    %258 = math.tanh %257 : vector<16x512xf32>
    %cst_86 = arith.constant 1.000000e+00 : f32
    %259 = vector.broadcast %cst_86 : f32 to vector<16x512xf32>
    %260 = arith.addf %259, %258 : vector<16x512xf32>
    %cst_87 = arith.constant 5.000000e-01 : f32
    %261 = vector.broadcast %cst_87 : f32 to vector<16x512xf32>
    %262 = arith.mulf %261, %260 : vector<16x512xf32>
    %263 = arith.mulf %250, %262 : vector<16x512xf32>
    %264 = arith.truncf %263 : vector<16x512xf32> to vector<16x512xbf16>
    %c0_88 = arith.constant 0 : index
    %c0_89 = arith.constant 0 : index
    %c0_90 = arith.constant 0 : index
    %265 = vector.load %arg16[%c0_88, %c0_89, %c0_90] : memref<2x512x128xbf16, #tpu.memory_space<vmem>>, vector<1x512x128xbf16>
    %266 = vector.shape_cast %265 : vector<1x512x128xbf16> to vector<512x128xbf16>
    %cst_91 = arith.constant dense<0.000000e+00> : vector<16x128xf32>
    %267 = tpu.matmul %264, %266, %cst_91 {dimension_numbers = #tpu.dot_dimension_numbers<[1], [0], [0], [1], [0, 0, 1, 1], [], []>} : vector<16x512xbf16>, vector<512x128xbf16>, vector<16x128xf32> -> vector<16x128xf32>
    %268 = arith.addf %220, %267 : vector<16x128xf32>
    %269 = vector.broadcast %112 : vector<1x128xf32> to vector<16x128xf32>
    %270 = arith.addf %268, %269 : vector<16x128xf32>
    %c1 = arith.constant 1 : index
    %c0_92 = arith.constant 0 : index
    %c0_93 = arith.constant 0 : index
    %271 = vector.load %arg10[%c1, %c0_92, %c0_93] : memref<2x8x128xf32, #tpu.memory_space<vmem>>, vector<1x8x128xf32>
    %272 = vector.shape_cast %271 : vector<1x8x128xf32> to vector<8x128xf32>
    %273 = vector.extract_strided_slice %272 {offsets = [0, 0], sizes = [1, 128], strides = [1, 1]} : vector<8x128xf32> to vector<1x128xf32>
    %274 = vector.extract_strided_slice %272 {offsets = [1, 0], sizes = [1, 128], strides = [1, 1]} : vector<8x128xf32> to vector<1x128xf32>
    %275 = vector.extract_strided_slice %272 {offsets = [2, 0], sizes = [1, 128], strides = [1, 1]} : vector<8x128xf32> to vector<1x128xf32>
    %276 = vector.extract_strided_slice %272 {offsets = [3, 0], sizes = [1, 128], strides = [1, 1]} : vector<8x128xf32> to vector<1x128xf32>
    %277 = vector.extract_strided_slice %272 {offsets = [4, 0], sizes = [1, 128], strides = [1, 1]} : vector<8x128xf32> to vector<1x128xf32>
    %278 = vector.extract_strided_slice %272 {offsets = [5, 0], sizes = [1, 128], strides = [1, 1]} : vector<8x128xf32> to vector<1x128xf32>
    %cst_94 = arith.constant dense<0.000000e+00> : vector<16xf32>
    %279 = vector.multi_reduction <add>, %270, %cst_94 [1] : vector<16x128xf32> to vector<16xf32>
    %280 = vector.shape_cast %279 : vector<16xf32> to vector<16x1xf32>
    %cst_95 = arith.constant 1.280000e+02 : f32
    %281 = vector.broadcast %cst_95 : f32 to vector<16x1xf32>
    %282 = arith.divf %280, %281 : vector<16x1xf32>
    %283 = vector.broadcast %282 : vector<16x1xf32> to vector<16x128xf32>
    %284 = arith.subf %270, %283 : vector<16x128xf32>
    %285 = arith.mulf %284, %284 : vector<16x128xf32>
    %cst_96 = arith.constant dense<0.000000e+00> : vector<16xf32>
    %286 = vector.multi_reduction <add>, %285, %cst_96 [1] : vector<16x128xf32> to vector<16xf32>
    %287 = vector.shape_cast %286 : vector<16xf32> to vector<16x1xf32>
    %cst_97 = arith.constant 1.280000e+02 : f32
    %288 = vector.broadcast %cst_97 : f32 to vector<16x1xf32>
    %289 = arith.divf %287, %288 : vector<16x1xf32>
    %290 = vector.broadcast %282 : vector<16x1xf32> to vector<16x128xf32>
    %291 = arith.subf %270, %290 : vector<16x128xf32>
    %cst_98 = arith.constant 9.99999996E-13 : f32
    %292 = vector.broadcast %cst_98 : f32 to vector<16x1xf32>
    %293 = arith.addf %289, %292 : vector<16x1xf32>
    %294 = math.rsqrt %293 : vector<16x1xf32>
    %295 = vector.broadcast %294 : vector<16x1xf32> to vector<16x128xf32>
    %296 = arith.mulf %291, %295 : vector<16x128xf32>
    %297 = vector.broadcast %273 : vector<1x128xf32> to vector<16x128xf32>
    %298 = arith.mulf %296, %297 : vector<16x128xf32>
    %299 = vector.broadcast %274 : vector<1x128xf32> to vector<16x128xf32>
    %300 = arith.addf %298, %299 : vector<16x128xf32>
    %301 = arith.truncf %300 : vector<16x128xf32> to vector<16x128xbf16>
    %c1_99 = arith.constant 1 : index
    %c0_100 = arith.constant 0 : index
    %c0_101 = arith.constant 0 : index
    %302 = vector.load %arg13[%c1_99, %c0_100, %c0_101] : memref<2x128x384xbf16, #tpu.memory_space<vmem>>, vector<1x128x384xbf16>
    %303 = vector.shape_cast %302 : vector<1x128x384xbf16> to vector<128x384xbf16>
    %cst_102 = arith.constant dense<0.000000e+00> : vector<16x384xf32>
    %304 = tpu.matmul %301, %303, %cst_102 {dimension_numbers = #tpu.dot_dimension_numbers<[1], [0], [0], [1], [0, 0, 1, 1], [], []>} : vector<16x128xbf16>, vector<128x384xbf16>, vector<16x384xf32> -> vector<16x384xf32>
    %c1_103 = arith.constant 1 : index
    %c0_104 = arith.constant 0 : index
    %c0_105 = arith.constant 0 : index
    %305 = vector.load %arg11[%c1_103, %c0_104, %c0_105] : memref<2x1x384xf32, #tpu.memory_space<vmem>>, vector<1x1x384xf32>
    %306 = vector.shape_cast %305 : vector<1x1x384xf32> to vector<1x384xf32>
    %307 = vector.broadcast %306 : vector<1x384xf32> to vector<16x384xf32>
    %308 = arith.addf %304, %307 : vector<16x384xf32>
    %309 = vector.extract_strided_slice %308 {offsets = [0, 0], sizes = [16, 128], strides = [1, 1]} : vector<16x384xf32> to vector<16x128xf32>
    %cst_106 = arith.constant 0.176776692 : f32
    %310 = vector.broadcast %cst_106 : f32 to vector<16x128xf32>
    %311 = arith.mulf %309, %310 : vector<16x128xf32>
    %312 = arith.truncf %311 : vector<16x128xf32> to vector<16x128xbf16>
    %313 = vector.extract_strided_slice %308 {offsets = [0, 128], sizes = [16, 128], strides = [1, 1]} : vector<16x384xf32> to vector<16x128xf32>
    %314 = arith.truncf %313 : vector<16x128xf32> to vector<16x128xbf16>
    %315 = vector.extract_strided_slice %308 {offsets = [0, 256], sizes = [16, 128], strides = [1, 1]} : vector<16x384xf32> to vector<16x128xf32>
    %316 = arith.truncf %315 : vector<16x128xf32> to vector<16x128xbf16>
    %317 = vector.extract_strided_slice %312 {offsets = [0, 0], sizes = [16, 32], strides = [1, 1]} : vector<16x128xbf16> to vector<16x32xbf16>
    %318 = vector.extract_strided_slice %312 {offsets = [0, 32], sizes = [16, 32], strides = [1, 1]} : vector<16x128xbf16> to vector<16x32xbf16>
    %319 = vector.extract_strided_slice %312 {offsets = [0, 64], sizes = [16, 32], strides = [1, 1]} : vector<16x128xbf16> to vector<16x32xbf16>
    %320 = vector.extract_strided_slice %312 {offsets = [0, 96], sizes = [16, 32], strides = [1, 1]} : vector<16x128xbf16> to vector<16x32xbf16>
    %321 = vector.shape_cast %317 : vector<16x32xbf16> to vector<1x16x32xbf16>
    %322 = vector.shape_cast %318 : vector<16x32xbf16> to vector<1x16x32xbf16>
    %323 = vector.shape_cast %319 : vector<16x32xbf16> to vector<1x16x32xbf16>
    %324 = vector.shape_cast %320 : vector<16x32xbf16> to vector<1x16x32xbf16>
    %325 = tpu.concatenate %321, %322, %323, %324 in 0 : vector<1x16x32xbf16>, vector<1x16x32xbf16>, vector<1x16x32xbf16>, vector<1x16x32xbf16> -> vector<4x16x32xbf16>
    %326 = vector.extract_strided_slice %314 {offsets = [0, 0], sizes = [16, 32], strides = [1, 1]} : vector<16x128xbf16> to vector<16x32xbf16>
    %327 = vector.extract_strided_slice %314 {offsets = [0, 32], sizes = [16, 32], strides = [1, 1]} : vector<16x128xbf16> to vector<16x32xbf16>
    %328 = vector.extract_strided_slice %314 {offsets = [0, 64], sizes = [16, 32], strides = [1, 1]} : vector<16x128xbf16> to vector<16x32xbf16>
    %329 = vector.extract_strided_slice %314 {offsets = [0, 96], sizes = [16, 32], strides = [1, 1]} : vector<16x128xbf16> to vector<16x32xbf16>
    %330 = vector.shape_cast %326 : vector<16x32xbf16> to vector<1x16x32xbf16>
    %331 = vector.shape_cast %327 : vector<16x32xbf16> to vector<1x16x32xbf16>
    %332 = vector.shape_cast %328 : vector<16x32xbf16> to vector<1x16x32xbf16>
    %333 = vector.shape_cast %329 : vector<16x32xbf16> to vector<1x16x32xbf16>
    %334 = tpu.concatenate %330, %331, %332, %333 in 0 : vector<1x16x32xbf16>, vector<1x16x32xbf16>, vector<1x16x32xbf16>, vector<1x16x32xbf16> -> vector<4x16x32xbf16>
    %335 = vector.extract_strided_slice %316 {offsets = [0, 0], sizes = [16, 32], strides = [1, 1]} : vector<16x128xbf16> to vector<16x32xbf16>
    %336 = vector.extract_strided_slice %316 {offsets = [0, 32], sizes = [16, 32], strides = [1, 1]} : vector<16x128xbf16> to vector<16x32xbf16>
    %337 = vector.extract_strided_slice %316 {offsets = [0, 64], sizes = [16, 32], strides = [1, 1]} : vector<16x128xbf16> to vector<16x32xbf16>
    %338 = vector.extract_strided_slice %316 {offsets = [0, 96], sizes = [16, 32], strides = [1, 1]} : vector<16x128xbf16> to vector<16x32xbf16>
    %339 = vector.shape_cast %335 : vector<16x32xbf16> to vector<1x16x32xbf16>
    %340 = vector.shape_cast %336 : vector<16x32xbf16> to vector<1x16x32xbf16>
    %341 = vector.shape_cast %337 : vector<16x32xbf16> to vector<1x16x32xbf16>
    %342 = vector.shape_cast %338 : vector<16x32xbf16> to vector<1x16x32xbf16>
    %343 = tpu.concatenate %339, %340, %341, %342 in 0 : vector<1x16x32xbf16>, vector<1x16x32xbf16>, vector<1x16x32xbf16>, vector<1x16x32xbf16> -> vector<4x16x32xbf16>
    "tpu.trace_start"() <{level = 10 : i32, message = "hqd,hkd->hqk"}> : () -> ()
    %cst_107 = arith.constant dense<0.000000e+00> : vector<4x16x16xf32>
    %344 = tpu.matmul %325, %334, %cst_107 {dimension_numbers = #tpu.dot_dimension_numbers<[2], [2], [1], [1], [0, 0, 0, 1, 1, 1], [0], [0]>} : vector<4x16x32xbf16>, vector<4x16x32xbf16>, vector<4x16x16xf32> -> vector<4x16x16xf32>
    "tpu.trace_stop"() : () -> ()
    %345 = vector.shape_cast %104 : vector<16x16xf32> to vector<1x16x16xf32>
    %346 = vector.broadcast %345 : vector<1x16x16xf32> to vector<4x16x16xf32>
    %347 = arith.addf %344, %346 : vector<4x16x16xf32>
    %cst_108 = arith.constant dense<0xFF800000> : vector<4x16xf32>
    %348 = vector.multi_reduction <maximumf>, %347, %cst_108 [2] : vector<4x16x16xf32> to vector<4x16xf32>
    %349 = vector.shape_cast %348 : vector<4x16xf32> to vector<4x16x1xf32>
    %350 = vector.broadcast %349 : vector<4x16x1xf32> to vector<4x16x16xf32>
    %351 = arith.subf %347, %350 : vector<4x16x16xf32>
    %352 = math.exp %351 : vector<4x16x16xf32>
    %cst_109 = arith.constant dense<0.000000e+00> : vector<4x16xf32>
    %353 = vector.multi_reduction <add>, %352, %cst_109 [2] : vector<4x16x16xf32> to vector<4x16xf32>
    %354 = vector.shape_cast %353 : vector<4x16xf32> to vector<4x16x1xf32>
    %355 = tpu.reciprocal %354 {approx = true} : vector<4x16x1xf32> -> vector<4x16x1xf32>
    %356 = vector.broadcast %355 : vector<4x16x1xf32> to vector<4x16x16xf32>
    %357 = arith.mulf %352, %356 : vector<4x16x16xf32>
    %358 = arith.truncf %357 : vector<4x16x16xf32> to vector<4x16x16xbf16>
    "tpu.trace_start"() <{level = 10 : i32, message = "hqk,hkd->hqd"}> : () -> ()
    %cst_110 = arith.constant dense<0.000000e+00> : vector<4x16x32xf32>
    %359 = tpu.matmul %358, %343, %cst_110 {dimension_numbers = #tpu.dot_dimension_numbers<[2], [1], [1], [2], [0, 0, 0, 1, 1, 2], [0], [0]>} : vector<4x16x16xbf16>, vector<4x16x32xbf16>, vector<4x16x32xf32> -> vector<4x16x32xf32>
    "tpu.trace_stop"() : () -> ()
    %360 = arith.truncf %359 : vector<4x16x32xf32> to vector<4x16x32xbf16>
    %361 = vector.extract_strided_slice %360 {offsets = [0, 0, 0], sizes = [1, 16, 32], strides = [1, 1, 1]} : vector<4x16x32xbf16> to vector<1x16x32xbf16>
    %362 = vector.shape_cast %361 : vector<1x16x32xbf16> to vector<16x32xbf16>
    %c1_111 = arith.constant 1 : index
    %c0_112 = arith.constant 0 : index
    %c0_113 = arith.constant 0 : index
    %363 = vector.load %arg14[%c1_111, %c0_112, %c0_113] : memref<2x128x128xbf16, #tpu.memory_space<vmem>>, vector<1x32x128xbf16>
    %364 = vector.shape_cast %363 : vector<1x32x128xbf16> to vector<32x128xbf16>
    %cst_114 = arith.constant dense<0.000000e+00> : vector<16x128xf32>
    %365 = tpu.matmul %362, %364, %cst_114 {dimension_numbers = #tpu.dot_dimension_numbers<[1], [0], [0], [1], [0, 0, 1, 1], [], []>} : vector<16x32xbf16>, vector<32x128xbf16>, vector<16x128xf32> -> vector<16x128xf32>
    %366 = vector.broadcast %277 : vector<1x128xf32> to vector<16x128xf32>
    %367 = arith.addf %366, %365 : vector<16x128xf32>
    %368 = vector.extract_strided_slice %360 {offsets = [1, 0, 0], sizes = [1, 16, 32], strides = [1, 1, 1]} : vector<4x16x32xbf16> to vector<1x16x32xbf16>
    %369 = vector.shape_cast %368 : vector<1x16x32xbf16> to vector<16x32xbf16>
    %c1_115 = arith.constant 1 : index
    %c32_116 = arith.constant 32 : index
    %c0_117 = arith.constant 0 : index
    %370 = vector.load %arg14[%c1_115, %c32_116, %c0_117] : memref<2x128x128xbf16, #tpu.memory_space<vmem>>, vector<1x32x128xbf16>
    %371 = vector.shape_cast %370 : vector<1x32x128xbf16> to vector<32x128xbf16>
    %cst_118 = arith.constant dense<0.000000e+00> : vector<16x128xf32>
    %372 = tpu.matmul %369, %371, %cst_118 {dimension_numbers = #tpu.dot_dimension_numbers<[1], [0], [0], [1], [0, 0, 1, 1], [], []>} : vector<16x32xbf16>, vector<32x128xbf16>, vector<16x128xf32> -> vector<16x128xf32>
    %373 = arith.addf %367, %372 : vector<16x128xf32>
    %374 = vector.extract_strided_slice %360 {offsets = [2, 0, 0], sizes = [1, 16, 32], strides = [1, 1, 1]} : vector<4x16x32xbf16> to vector<1x16x32xbf16>
    %375 = vector.shape_cast %374 : vector<1x16x32xbf16> to vector<16x32xbf16>
    %c1_119 = arith.constant 1 : index
    %c64_120 = arith.constant 64 : index
    %c0_121 = arith.constant 0 : index
    %376 = vector.load %arg14[%c1_119, %c64_120, %c0_121] : memref<2x128x128xbf16, #tpu.memory_space<vmem>>, vector<1x32x128xbf16>
    %377 = vector.shape_cast %376 : vector<1x32x128xbf16> to vector<32x128xbf16>
    %cst_122 = arith.constant dense<0.000000e+00> : vector<16x128xf32>
    %378 = tpu.matmul %375, %377, %cst_122 {dimension_numbers = #tpu.dot_dimension_numbers<[1], [0], [0], [1], [0, 0, 1, 1], [], []>} : vector<16x32xbf16>, vector<32x128xbf16>, vector<16x128xf32> -> vector<16x128xf32>
    %379 = arith.addf %373, %378 : vector<16x128xf32>
    %380 = vector.extract_strided_slice %360 {offsets = [3, 0, 0], sizes = [1, 16, 32], strides = [1, 1, 1]} : vector<4x16x32xbf16> to vector<1x16x32xbf16>
    %381 = vector.shape_cast %380 : vector<1x16x32xbf16> to vector<16x32xbf16>
    %c1_123 = arith.constant 1 : index
    %c96_124 = arith.constant 96 : index
    %c0_125 = arith.constant 0 : index
    %382 = vector.load %arg14[%c1_123, %c96_124, %c0_125] : memref<2x128x128xbf16, #tpu.memory_space<vmem>>, vector<1x32x128xbf16>
    %383 = vector.shape_cast %382 : vector<1x32x128xbf16> to vector<32x128xbf16>
    %cst_126 = arith.constant dense<0.000000e+00> : vector<16x128xf32>
    %384 = tpu.matmul %381, %383, %cst_126 {dimension_numbers = #tpu.dot_dimension_numbers<[1], [0], [0], [1], [0, 0, 1, 1], [], []>} : vector<16x32xbf16>, vector<32x128xbf16>, vector<16x128xf32> -> vector<16x128xf32>
    %385 = arith.addf %379, %384 : vector<16x128xf32>
    %386 = arith.addf %270, %385 : vector<16x128xf32>
    %cst_127 = arith.constant dense<0.000000e+00> : vector<16xf32>
    %387 = vector.multi_reduction <add>, %386, %cst_127 [1] : vector<16x128xf32> to vector<16xf32>
    %388 = vector.shape_cast %387 : vector<16xf32> to vector<16x1xf32>
    %cst_128 = arith.constant 1.280000e+02 : f32
    %389 = vector.broadcast %cst_128 : f32 to vector<16x1xf32>
    %390 = arith.divf %388, %389 : vector<16x1xf32>
    %391 = vector.broadcast %390 : vector<16x1xf32> to vector<16x128xf32>
    %392 = arith.subf %386, %391 : vector<16x128xf32>
    %393 = arith.mulf %392, %392 : vector<16x128xf32>
    %cst_129 = arith.constant dense<0.000000e+00> : vector<16xf32>
    %394 = vector.multi_reduction <add>, %393, %cst_129 [1] : vector<16x128xf32> to vector<16xf32>
    %395 = vector.shape_cast %394 : vector<16xf32> to vector<16x1xf32>
    %cst_130 = arith.constant 1.280000e+02 : f32
    %396 = vector.broadcast %cst_130 : f32 to vector<16x1xf32>
    %397 = arith.divf %395, %396 : vector<16x1xf32>
    %398 = vector.broadcast %390 : vector<16x1xf32> to vector<16x128xf32>
    %399 = arith.subf %386, %398 : vector<16x128xf32>
    %cst_131 = arith.constant 9.99999996E-13 : f32
    %400 = vector.broadcast %cst_131 : f32 to vector<16x1xf32>
    %401 = arith.addf %397, %400 : vector<16x1xf32>
    %402 = math.rsqrt %401 : vector<16x1xf32>
    %403 = vector.broadcast %402 : vector<16x1xf32> to vector<16x128xf32>
    %404 = arith.mulf %399, %403 : vector<16x128xf32>
    %405 = vector.broadcast %275 : vector<1x128xf32> to vector<16x128xf32>
    %406 = arith.mulf %404, %405 : vector<16x128xf32>
    %407 = vector.broadcast %276 : vector<1x128xf32> to vector<16x128xf32>
    %408 = arith.addf %406, %407 : vector<16x128xf32>
    %409 = arith.truncf %408 : vector<16x128xf32> to vector<16x128xbf16>
    %c1_132 = arith.constant 1 : index
    %c0_133 = arith.constant 0 : index
    %c0_134 = arith.constant 0 : index
    %410 = vector.load %arg15[%c1_132, %c0_133, %c0_134] : memref<2x128x512xbf16, #tpu.memory_space<vmem>>, vector<1x128x512xbf16>
    %411 = vector.shape_cast %410 : vector<1x128x512xbf16> to vector<128x512xbf16>
    %cst_135 = arith.constant dense<0.000000e+00> : vector<16x512xf32>
    %412 = tpu.matmul %409, %411, %cst_135 {dimension_numbers = #tpu.dot_dimension_numbers<[1], [0], [0], [1], [0, 0, 1, 1], [], []>} : vector<16x128xbf16>, vector<128x512xbf16>, vector<16x512xf32> -> vector<16x512xf32>
    %c1_136 = arith.constant 1 : index
    %c0_137 = arith.constant 0 : index
    %c0_138 = arith.constant 0 : index
    %413 = vector.load %arg12[%c1_136, %c0_137, %c0_138] : memref<2x1x512xf32, #tpu.memory_space<vmem>>, vector<1x1x512xf32>
    %414 = vector.shape_cast %413 : vector<1x1x512xf32> to vector<1x512xf32>
    %415 = vector.broadcast %414 : vector<1x512xf32> to vector<16x512xf32>
    %416 = arith.addf %412, %415 : vector<16x512xf32>
    %417 = arith.mulf %416, %416 : vector<16x512xf32>
    %418 = arith.mulf %416, %417 : vector<16x512xf32>
    %cst_139 = arith.constant 4.471500e-02 : f32
    %419 = vector.broadcast %cst_139 : f32 to vector<16x512xf32>
    %420 = arith.mulf %419, %418 : vector<16x512xf32>
    %421 = arith.addf %416, %420 : vector<16x512xf32>
    %cst_140 = arith.constant 0.797884583 : f32
    %422 = vector.broadcast %cst_140 : f32 to vector<16x512xf32>
    %423 = arith.mulf %422, %421 : vector<16x512xf32>
    %424 = math.tanh %423 : vector<16x512xf32>
    %cst_141 = arith.constant 1.000000e+00 : f32
    %425 = vector.broadcast %cst_141 : f32 to vector<16x512xf32>
    %426 = arith.addf %425, %424 : vector<16x512xf32>
    %cst_142 = arith.constant 5.000000e-01 : f32
    %427 = vector.broadcast %cst_142 : f32 to vector<16x512xf32>
    %428 = arith.mulf %427, %426 : vector<16x512xf32>
    %429 = arith.mulf %416, %428 : vector<16x512xf32>
    %430 = arith.truncf %429 : vector<16x512xf32> to vector<16x512xbf16>
    %c1_143 = arith.constant 1 : index
    %c0_144 = arith.constant 0 : index
    %c0_145 = arith.constant 0 : index
    %431 = vector.load %arg16[%c1_143, %c0_144, %c0_145] : memref<2x512x128xbf16, #tpu.memory_space<vmem>>, vector<1x512x128xbf16>
    %432 = vector.shape_cast %431 : vector<1x512x128xbf16> to vector<512x128xbf16>
    %cst_146 = arith.constant dense<0.000000e+00> : vector<16x128xf32>
    %433 = tpu.matmul %430, %432, %cst_146 {dimension_numbers = #tpu.dot_dimension_numbers<[1], [0], [0], [1], [0, 0, 1, 1], [], []>} : vector<16x512xbf16>, vector<512x128xbf16>, vector<16x128xf32> -> vector<16x128xf32>
    %434 = arith.addf %386, %433 : vector<16x128xf32>
    %435 = vector.broadcast %278 : vector<1x128xf32> to vector<16x128xf32>
    %436 = arith.addf %434, %435 : vector<16x128xf32>
    %437 = vector.extract_strided_slice %436 {offsets = [0, 0], sizes = [2, 128], strides = [1, 1]} : vector<16x128xf32> to vector<2x128xf32>
    %438 = vector.extract_strided_slice %0 {offsets = [5, 0], sizes = [1, 128], strides = [1, 1]} : vector<8x128xf32> to vector<1x128xf32>
    %439 = vector.extract_strided_slice %0 {offsets = [6, 0], sizes = [1, 128], strides = [1, 1]} : vector<8x128xf32> to vector<1x128xf32>
    %cst_147 = arith.constant dense<0.000000e+00> : vector<2xf32>
    %440 = vector.multi_reduction <add>, %437, %cst_147 [1] : vector<2x128xf32> to vector<2xf32>
    %441 = vector.shape_cast %440 : vector<2xf32> to vector<2x1xf32>
    %cst_148 = arith.constant 1.280000e+02 : f32
    %442 = vector.broadcast %cst_148 : f32 to vector<2x1xf32>
    %443 = arith.divf %441, %442 : vector<2x1xf32>
    %444 = vector.broadcast %443 : vector<2x1xf32> to vector<2x128xf32>
    %445 = arith.subf %437, %444 : vector<2x128xf32>
    %446 = arith.mulf %445, %445 : vector<2x128xf32>
    %cst_149 = arith.constant dense<0.000000e+00> : vector<2xf32>
    %447 = vector.multi_reduction <add>, %446, %cst_149 [1] : vector<2x128xf32> to vector<2xf32>
    %448 = vector.shape_cast %447 : vector<2xf32> to vector<2x1xf32>
    %cst_150 = arith.constant 1.280000e+02 : f32
    %449 = vector.broadcast %cst_150 : f32 to vector<2x1xf32>
    %450 = arith.divf %448, %449 : vector<2x1xf32>
    %451 = vector.broadcast %443 : vector<2x1xf32> to vector<2x128xf32>
    %452 = arith.subf %437, %451 : vector<2x128xf32>
    %cst_151 = arith.constant 9.99999996E-13 : f32
    %453 = vector.broadcast %cst_151 : f32 to vector<2x1xf32>
    %454 = arith.addf %450, %453 : vector<2x1xf32>
    %455 = math.rsqrt %454 : vector<2x1xf32>
    %456 = vector.broadcast %455 : vector<2x1xf32> to vector<2x128xf32>
    %457 = arith.mulf %452, %456 : vector<2x128xf32>
    %458 = vector.broadcast %438 : vector<1x128xf32> to vector<2x128xf32>
    %459 = arith.mulf %457, %458 : vector<2x128xf32>
    %460 = vector.broadcast %439 : vector<1x128xf32> to vector<2x128xf32>
    %461 = arith.addf %459, %460 : vector<2x128xf32>
    %c0_152 = arith.constant 0 : index
    %c0_153 = arith.constant 0 : index
    %462 = vector.load %arg17[%c0_152, %c0_153] : memref<2x128xf32, #tpu.memory_space<vmem>>, vector<2x128xf32>
    tpu.vector_store %arg17[%c0_152, %c0_153], %461 {strides = array<i32>} : memref<2x128xf32, #tpu.memory_space<vmem>>, vector<2x128xf32>,
    return
  }
  func.func @transform_0(%arg0: i32) -> (i32, i32) {
    %c0_i32 = arith.constant 0 : i32
    %c0_i32_0 = arith.constant 0 : i32
    %c0_i32_1 = arith.constant 0 : i32
    return %c0_i32, %c0_i32_0 : i32, i32
  }
  func.func @transform_1(%arg0: i32) -> (i32, i32) {
    %c0_i32 = arith.constant 0 : i32
    %c0_i32_0 = arith.constant 0 : i32
    %c0_i32_1 = arith.constant 0 : i32
    return %c0_i32, %c0_i32_0 : i32, i32
  }
  func.func @transform_2(%arg0: i32) -> (i32, i32) {
    %c0_i32 = arith.constant 0 : i32
    %c0_i32_0 = arith.constant 0 : i32
    %c0_i32_1 = arith.constant 0 : i32
    return %c0_i32, %c0_i32_0 : i32, i32
  }
  func.func @transform_3(%arg0: i32) -> (i32, i32) {
    %c0_i32 = arith.constant 0 : i32
    %c0_i32_0 = arith.constant 0 : i32
    %c0_i32_1 = arith.constant 0 : i32
    return %c0_i32, %c0_i32_0 : i32, i32
  }
  func.func @transform_4(%arg0: i32) -> (i32, i32) {
    %c0_i32 = arith.constant 0 : i32
    %c0_i32_0 = arith.constant 0 : i32
    %c0_i32_1 = arith.constant 0 : i32
    return %c0_i32, %c0_i32_0 : i32, i32
  }
  func.func @transform_5(%arg0: i32) -> (i32, i32) {
    %c0_i32 = arith.constant 0 : i32
    %c0_i32_0 = arith.constant 0 : i32
    %c0_i32_1 = arith.constant 0 : i32
    return %c0_i32, %c0_i32_0 : i32, i32
  }
  func.func @transform_6(%arg0: i32) -> (i32, i32) {
    %c0_i32 = arith.constant 0 : i32
    %c0_i32_0 = arith.constant 0 : i32
    %c0_i32_1 = arith.constant 0 : i32
    return %c0_i32, %c0_i32_0 : i32, i32
  }
  func.func @transform_7(%arg0: i32) -> (i32, i32) {
    %c0_i32 = arith.constant 0 : i32
    %c0_i32_0 = arith.constant 0 : i32
    %c0_i32_1 = arith.constant 0 : i32
    return %c0_i32, %c0_i32_0 : i32, i32
  }
  func.func @transform_8(%arg0: i32) -> (i32, i32) {
    %c0_i32 = arith.constant 0 : i32
    %c0_i32_0 = arith.constant 0 : i32
    %c0_i32_1 = arith.constant 0 : i32
    return %c0_i32, %c0_i32_0 : i32, i32
  }
  func.func @transform_9(%arg0: i32) -> (i32, i32, i32) {
    %c0_i32 = arith.constant 0 : i32
    %c0_i32_0 = arith.constant 0 : i32
    %c0_i32_1 = arith.constant 0 : i32
    %c0_i32_2 = arith.constant 0 : i32
    return %c0_i32, %c0_i32_0, %c0_i32_1 : i32, i32, i32
  }
  func.func @transform_10(%arg0: i32) -> (i32, i32, i32) {
    %c0_i32 = arith.constant 0 : i32
    %c0_i32_0 = arith.constant 0 : i32
    %c0_i32_1 = arith.constant 0 : i32
    %c0_i32_2 = arith.constant 0 : i32
    return %c0_i32, %c0_i32_0, %c0_i32_1 : i32, i32, i32
  }
  func.func @transform_11(%arg0: i32) -> (i32, i32, i32) {
    %c0_i32 = arith.constant 0 : i32
    %c0_i32_0 = arith.constant 0 : i32
    %c0_i32_1 = arith.constant 0 : i32
    %c0_i32_2 = arith.constant 0 : i32
    return %c0_i32, %c0_i32_0, %c0_i32_1 : i32, i32, i32
  }
  func.func @transform_12(%arg0: i32) -> (i32, i32, i32) {
    %c0_i32 = arith.constant 0 : i32
    %c0_i32_0 = arith.constant 0 : i32
    %c0_i32_1 = arith.constant 0 : i32
    %c0_i32_2 = arith.constant 0 : i32
    return %c0_i32, %c0_i32_0, %c0_i32_1 : i32, i32, i32
  }
  func.func @transform_13(%arg0: i32) -> (i32, i32, i32) {
    %c0_i32 = arith.constant 0 : i32
    %c0_i32_0 = arith.constant 0 : i32
    %c0_i32_1 = arith.constant 0 : i32
    %c0_i32_2 = arith.constant 0 : i32
    return %c0_i32, %c0_i32_0, %c0_i32_1 : i32, i32, i32
  }
  func.func @transform_14(%arg0: i32) -> (i32, i32, i32) {
    %c0_i32 = arith.constant 0 : i32
    %c0_i32_0 = arith.constant 0 : i32
    %c0_i32_1 = arith.constant 0 : i32
    %c0_i32_2 = arith.constant 0 : i32
    return %c0_i32, %c0_i32_0, %c0_i32_1 : i32, i32, i32
  }
  func.func @transform_15(%arg0: i32) -> (i32, i32, i32) {
    %c0_i32 = arith.constant 0 : i32
    %c0_i32_0 = arith.constant 0 : i32
    %c0_i32_1 = arith.constant 0 : i32
    %c0_i32_2 = arith.constant 0 : i32
    return %c0_i32, %c0_i32_0, %c0_i32_1 : i32, i32, i32
  }
  func.func @transform_16(%arg0: i32) -> (i32, i32) {
    %c0_i32 = arith.constant 0 : i32
    %c0_i32_0 = arith.constant 0 : i32
    %c0_i32_1 = arith.constant 0 : i32
    return %c0_i32, %c0_i32_0 : i32, i32
  }
}

</mosaic_0001>

<bundles_post_ra>
// kernel: custom-call.6
= control target key start
LH: loop header
LB: loop body
LE: loop exit
PB: predicated region body
PF: predicated region fallthrough
CT: control target
= control target key end

     0   :  { %s6_s0 = inlined_call_operand.vmem [shape: f32[2,64], index: 0, kind: output, shape index: {}]  }

// kernel: neg.1
= control target key start
LH: loop header
LB: loop body
LE: loop exit
PB: predicated region body
PF: predicated region fallthrough
CT: control target
= control target key end

     0   :  { %s40_s0 = inlined_call_operand.vmem [shape: f32[2,4,64], index: 0, kind: input, shape index: {}]   ;;  %s41_s1 = inlined_call_operand.vmem [shape: f32[2,4,64], index: 1, kind: output, shape index: {}]  }
   0x1   :  { %v2_v0 = vld [vmem:[%s40_s0] sm:$0xf]  ;;  %v16_v1 = vld [vmem:[%s40_s0 + $0x4] sm:$0xf] }
   0x2   :  { %v5_v2 = vxor.u32 2147483648, %v2_v0  ;;  %v12_v3 = vxor.u32 2147483648, %v16_v1 }
   0x4   :  { %7 = vst [vmem:[%s41_s1] sm:$0xf] %v5_v2  ;;  %17 = vst [vmem:[%s41_s1 + $0x4] sm:$0xf] %v12_v3 }

// kernel: sub.26
= control target key start
LH: loop header
LB: loop body
LE: loop exit
PB: predicated region body
PF: predicated region fallthrough
CT: control target
= control target key end

     0   :  { %s490_s0 = inlined_call_operand.vmem [shape: f32[2,64,3], index: 0, kind: input, shape index: {}]   ;;  %s491_s1 = inlined_call_operand.vmem [shape: f32[2,4,64,3], index: 1, kind: output, shape index: {}]  }
   0x1   :  { %v4_v0 = vld [vmem:[%s490_s0] sm:$0xff]  ;;  %v170_v2 = vld [vmem:[%s490_s0 + $0x8] sm:$0xff]  ;;  %v180_v4 = vld [vmem:[%s490_s0 + $0x10] sm:$0xff] }
   0x2   :  { %v162_v1 = vld [vmem:[%s490_s0 + $0x40] sm:$0xff]  ;;  %5 = vst [vmem:[%s491_s1] sm:$0xff] %v4_v0  ;;  %164 = vst [vmem:[%s491_s1 + $0x40] sm:$0xff] %v4_v0  ;;  %v172_v3 = vld [vmem:[%s490_s0 + $0x48] sm:$0xff] }
   0x3   :  { %163 = vst [vmem:[%s491_s1 + $0x100] sm:$0xff] %v162_v1  ;;  %165 = vst [vmem:[%s491_s1 + $0x140] sm:$0xff] %v162_v1  ;;  %v182_v5 = vld [vmem:[%s490_s0 + $0x50] sm:$0xff]  ;;  %v190_v6 = vld [vmem:[%s490_s0 + $0x18] sm:$0xff] }
   0x4   :  { %166 = vst [vmem:[%s491_s1 + $0x80] sm:$0xff] %v4_v0  ;;  %167 = vst [vmem:[%s491_s1 + $0x180] sm:$0xff] %v162_v1  ;;  %v192_v7 = vld [vmem:[%s490_s0 + $0x58] sm:$0xff]  ;;  %v200_v8 = vld [vmem:[%s490_s0 + $0x20] sm:$0xff] }
   0x5   :  { %168 = vst [vmem:[%s491_s1 + $0xc0] sm:$0xff] %v4_v0  ;;  %169 = vst [vmem:[%s491_s1 + $0x1c0] sm:$0xff] %v162_v1  ;;  %v202_v9 = vld [vmem:[%s490_s0 + $0x60] sm:$0xff]  ;;  %v210_v10 = vld [vmem:[%s490_s0 + $0x28] sm:$0xff] }
   0x6   :  { %171 = vst [vmem:[%s491_s1 + $0x8] sm:$0xff] %v170_v2  ;;  %174 = vst [vmem:[%s491_s1 + $0x48] sm:$0xff] %v170_v2  ;;  %v212_v11 = vld [vmem:[%s490_s0 + $0x68] sm:$0xff]  ;;  %v220_v12 = vld [vmem:[%s490_s0 + $0x30] sm:$0xff] }
   0x7   :  { %176 = vst [vmem:[%s491_s1 + $0x88] sm:$0xff] %v170_v2  ;;  %178 = vst [vmem:[%s491_s1 + $0xc8] sm:$0xff] %v170_v2  ;;  %v222_v13 = vld [vmem:[%s490_s0 + $0x70] sm:$0xff]  ;;  %v230_v14 = vld [vmem:[%s490_s0 + $0x38] sm:$0xff] }
   0x8   :  { %173 = vst [vmem:[%s491_s1 + $0x108] sm:$0xff] %v172_v3  ;;  %175 = vst [vmem:[%s491_s1 + $0x148] sm:$0xff] %v172_v3  ;;  %v232_v15 = vld [vmem:[%s490_s0 + $0x78] sm:$0xff] }
   0x9   :  { %177 = vst [vmem:[%s491_s1 + $0x188] sm:$0xff] %v172_v3  ;;  %179 = vst [vmem:[%s491_s1 + $0x1c8] sm:$0xff] %v172_v3 }
   0xa   :  { %181 = vst [vmem:[%s491_s1 + $0x10] sm:$0xff] %v180_v4  ;;  %183 = vst [vmem:[%s491_s1 + $0x110] sm:$0xff] %v182_v5 }
   0xb   :  { %184 = vst [vmem:[%s491_s1 + $0x50] sm:$0xff] %v180_v4  ;;  %185 = vst [vmem:[%s491_s1 + $0x150] sm:$0xff] %v182_v5 }
   0xc   :  { %186 = vst [vmem:[%s491_s1 + $0x90] sm:$0xff] %v180_v4  ;;  %187 = vst [vmem:[%s491_s1 + $0x190] sm:$0xff] %v182_v5 }
   0xd   :  { %188 = vst [vmem:[%s491_s1 + $0xd0] sm:$0xff] %v180_v4  ;;  %189 = vst [vmem:[%s491_s1 + $0x1d0] sm:$0xff] %v182_v5 }
   0xe   :  { %191 = vst [vmem:[%s491_s1 + $0x18] sm:$0xff] %v190_v6  ;;  %193 = vst [vmem:[%s491_s1 + $0x118] sm:$0xff] %v192_v7 }
   0xf   :  { %194 = vst [vmem:[%s491_s1 + $0x58] sm:$0xff] %v190_v6  ;;  %195 = vst [vmem:[%s491_s1 + $0x158] sm:$0xff] %v192_v7 }
  0x10   :  { %196 = vst [vmem:[%s491_s1 + $0x98] sm:$0xff] %v190_v6  ;;  %197 = vst [vmem:[%s491_s1 + $0x198] sm:$0xff] %v192_v7 }
  0x11   :  { %198 = vst [vmem:[%s491_s1 + $0xd8] sm:$0xff] %v190_v6  ;;  %199 = vst [vmem:[%s491_s1 + $0x1d8] sm:$0xff] %v192_v7 }
  0x12   :  { %201 = vst [vmem:[%s491_s1 + $0x20] sm:$0xff] %v200_v8  ;;  %204 = vst [vmem:[%s491_s1 + $0x60] sm:$0xff] %v200_v8 }
  0x13   :  { %206 = vst [vmem:[%s491_s1 + $0xa0] sm:$0xff] %v200_v8  ;;  %208 = vst [vmem:[%s491_s1 + $0xe0] sm:$0xff] %v200_v8 }
  0x14   :  { %203 = vst [vmem:[%s491_s1 + $0x120] sm:$0xff] %v202_v9  ;;  %205 = vst [vmem:[%s491_s1 + $0x160] sm:$0xff] %v202_v9 }
  0x15   :  { %207 = vst [vmem:[%s491_s1 + $0x1a0] sm:$0xff] %v202_v9  ;;  %209 = vst [vmem:[%s491_s1 + $0x1e0] sm:$0xff] %v202_v9 }
  0x16   :  { %211 = vst [vmem:[%s491_s1 + $0x28] sm:$0xff] %v210_v10  ;;  %213 = vst [vmem:[%s491_s1 + $0x128] sm:$0xff] %v212_v11 }
  0x17   :  { %214 = vst [vmem:[%s491_s1 + $0x68] sm:$0xff] %v210_v10  ;;  %215 = vst [vmem:[%s491_s1 + $0x168] sm:$0xff] %v212_v11 }
  0x18   :  { %216 = vst [vmem:[%s491_s1 + $0xa8] sm:$0xff] %v210_v10  ;;  %217 = vst [vmem:[%s491_s1 + $0x1a8] sm:$0xff] %v212_v11 }
  0x19   :  { %218 = vst [vmem:[%s491_s1 + $0xe8] sm:$0xff] %v210_v10  ;;  %219 = vst [vmem:[%s491_s1 + $0x1e8] sm:$0xff] %v212_v11 }
  0x1a   :  { %221 = vst [vmem:[%s491_s1 + $0x30] sm:$0xff] %v220_v12  ;;  %223 = vst [vmem:[%s491_s1 + $0x130] sm:$0xff] %v222_v13 }
  0x1b   :  { %224 = vst [vmem:[%s491_s1 + $0x70] sm:$0xff] %v220_v12  ;;  %225 = vst [vmem:[%s491_s1 + $0x170] sm:$0xff] %v222_v13 }
  0x1c   :  { %226 = vst [vmem:[%s491_s1 + $0xb0] sm:$0xff] %v220_v12  ;;  %227 = vst [vmem:[%s491_s1 + $0x1b0] sm:$0xff] %v222_v13 }
  0x1d   :  { %228 = vst [vmem:[%s491_s1 + $0xf0] sm:$0xff] %v220_v12  ;;  %229 = vst [vmem:[%s491_s1 + $0x1f0] sm:$0xff] %v222_v13 }
  0x1e   :  { %231 = vst [vmem:[%s491_s1 + $0x38] sm:$0xff] %v230_v14  ;;  %234 = vst [vmem:[%s491_s1 + $0x78] sm:$0xff] %v230_v14 }
  0x1f   :  { %236 = vst [vmem:[%s491_s1 + $0xb8] sm:$0xff] %v230_v14  ;;  %238 = vst [vmem:[%s491_s1 + $0xf8] sm:$0xff] %v230_v14 }
  0x20   :  { %233 = vst [vmem:[%s491_s1 + $0x138] sm:$0xff] %v232_v15  ;;  %235 = vst [vmem:[%s491_s1 + $0x178] sm:$0xff] %v232_v15 }
  0x21   :  { %237 = vst [vmem:[%s491_s1 + $0x1b8] sm:$0xff] %v232_v15  ;;  %239 = vst [vmem:[%s491_s1 + $0x1f8] sm:$0xff] %v232_v15 }

// kernel: forward.1
= control target key start
LH: loop header
LB: loop body
LE: loop exit
PB: predicated region body
PF: predicated region fallthrough
CT: control target
= control target key end

     0   :  { %s6713_s0 = inlined_call_operand.vmem [shape: bf16[8,48], index: 0, kind: input, shape index: {}]   ;;  %s6714_s1 = inlined_call_operand.vmem [shape: bf16[8,3], index: 1, kind: input, shape index: {}]   ;;  %s6715_s2 = inlined_call_operand.vmem [shape: bf16[8,8], index: 2, kind: input, shape index: {}]   ;;  %s6716_s3 = inlined_call_operand.vmem [shape: bf16[48,128], index: 3, kind: input, shape index: {}]   ;;  %s6717_s4 = inlined_call_operand.vmem [shape: bf16[128,128], index: 4, kind: input, shape index: {}]   ;;  %s6718_s5 = inlined_call_operand.vmem [shape: bf16[3,128], index: 5, kind: input, shape index: {}]   ;;  %s6719_s6 = inlined_call_operand.vmem [shape: bf16[128,128], index: 6, kind: input, shape index: {}]   ;;  %s6720_s7 = inlined_call_operand.vmem [shape: bf16[8,128], index: 7, kind: input, shape index: {}]   ;;  %s6721_s8 = inlined_call_operand.vmem [shape: f32[8,128], index: 8, kind: input, shape index: {}]   ;;  %s6722_s9 = inlined_call_operand.vmem [shape: f32[2,8,128], index: 9, kind: input, shape index: {}]   ;;  %s6723_s10 = inlined_call_operand.vmem [shape: f32[2,1,384], index: 10, kind: input, shape index: {}]   ;;  %s6724_s11 = inlined_call_operand.vmem [shape: f32[2,1,512], index: 11, kind: input, shape index: {}]   ;;  %s6725_s12 = inlined_call_operand.vmem [shape: bf16[2,128,384], index: 12, kind: input, shape index: {}]   ;;  %s6726_s13 = inlined_call_operand.vmem [shape: bf16[2,128,128], index: 13, kind: input, shape index: {}]   ;;  %s6727_s14 = inlined_call_operand.vmem [shape: bf16[2,128,512], index: 14, kind: input, shape index: {}]   ;;  %s6728_s15 = inlined_call_operand.vmem [shape: bf16[2,512,128], index: 15, kind: input, shape index: {}]   ;;  %s6729_s16 = inlined_call_operand.hbm [shape: f32[2,128], index: 16, kind: output, shape index: {}]  }
   0x1   :  { %6730 = sst [smem:[#allocation5_spill]] %s6713_s0 }
   0x2   :  { %v5008_v0 = vld [vmem:[%s6716_s3] sm:$0xff]   ;;  %v5412_v1 = vmov 0.0   ;;  %v5009_v2 = vld [vmem:[%s6716_s3 + $0x8] sm:$0xff]   ;;  %vm5413_vm0 = vmmov 0   ;;  %vm257_vm1 = vcmask 1040384   ;;  %vm258_vm2 = vcmask 1041408  }
   0x3   :  { %4731 = vmatprep.subr.bf16.mxu0 %v5412_v1  ;;  %4741 = vmatprep.subr.bf16.mxu1 %v5412_v1  ;;  %v5010_v3 = vld [vmem:[%s6716_s3 + $0x10] sm:$0xff]   ;;  %vm85_vm3 = vcmask 392192   ;;  %v5414_v4 = vmov 65535   ;;  %v248_v6 = vld [vmem:[%s6718_s5] sm:$0x3]  ;;  %s6731_s0 = sld [smem:[#allocation5_spill]] }
   0x4   :  { %4732 = vmatpush3.bf16.msra.mxu0 %v5008_v0  ;;  %4737 = vmatprep.mubr.msk.bf16.mxu0 %vm5413_vm0, %v5412_v1  ;;  %v259_v5 = vsel %vm257_vm1, 4294967295, %v5414_v4  ;;  %vm433_vm4 = vcmask 1043456   ;;  %v424_v10 = vld [vmem:[%s6720_s7] sm:$0xf]  ;;  %vm253_vm5 = vcmask 23552   ;;  %vm429_vm6 = vcmask 64512  }
   0x5   :  { %4733 = vmatprep.subr.bf16.mxu0 %v5412_v1  ;;  %4757 = vmatprep.mubr.msk.bf16.mxu1 %vm5413_vm0, %v5412_v1  ;;  %v260_v7 = vsel %vm258_vm2, %v259_v5, 0  ;;  %v247_v11 = vld [vmem:[%s6714_s1] sm:$0xf]  ;;  %v435_v12 = vsel %vm433_vm4, %v424_v10, 0  ;;  %v5012_v15 = vld [vmem:[%s6717_s4 + $0x8] sm:$0xff]   ;;  %v5013_v16 = vld [vmem:[%s6717_s4 + $0x10] sm:$0xff]  }
   0x6   :  { %v262_v9 = vand.u32 %v260_v7, %v248_v6  ;;  %v423_v13 = vld [vmem:[%s6715_s2] sm:$0xf]  ;;  %v5014_v17 = vld [vmem:[%s6717_s4 + $0x18] sm:$0xff]   ;;  %v5016_v19 = vld [vmem:[%s6717_s4 + $0x28] sm:$0xff]  }
   0x7   :  { %v5011_v14 = vld [vmem:[%s6717_s4] sm:$0xff]  }
   0x8   :  { %4734 = vmatpush3.bf16.msra.mxu0 %v5009_v2  ;;  %4742 = vmatpush3.bf16.msra.mxu1 %v5011_v14  ;;  %v5015_v18 = vld [vmem:[%s6717_s4 + $0x20] sm:$0xff]  }
   0x9   :  { %4735 = vmatprep.subr.bf16.mxu0 %v5412_v1  ;;  %v56_v8 = vld [vmem:[%s6731_s0] sm:$0xf]  ;;  %4743 = vmatprep.subr.bf16.mxu1 %v5412_v1 }
   0xc   :  { %4736 = vmatpush3.bf16.msra.mxu0 %v5010_v3  ;;  %4744 = vmatpush3.bf16.msra.mxu1 %v5012_v15 }
   0xd   :  { %4761 = vmatprep.subr.bf16.mxu0 %v5412_v1  ;;  %4745 = vmatprep.subr.bf16.mxu1 %v5412_v1 }
   0xf   :  { %4738 = vmatmul.mubr.msk.bf16.vlgmr.msra.gmra.mrb[0].mxu0 %vm85_vm3, %v56_v8 }
  0x10   :  { %4762 = vmatpush3.bf16.msra.mxu0 %v262_v9  ;;  %4763 = vmatprep.mubr.msk.bf16.mxu0 %vm5413_vm0, %v5412_v1 }
  0x11   :  { %4787 = vmatprep.subr.bf16.mxu0 %v5412_v1  ;;  %4746 = vmatpush3.bf16.msra.mxu1 %v5013_v16 }
  0x12   :  { %4747 = vmatprep.subr.bf16.mxu1 %v5412_v1 }
  0x15   :  { %4748 = vmatpush3.bf16.msra.mxu1 %v5014_v17 }
  0x16   :  { %4749 = vmatprep.subr.bf16.mxu1 %v5412_v1 }
  0x17   :  { %4764 = vmatmul.mubr.msk.bf16.vlgmr.msra.gmra.mrb[4].mxu0 %vm253_vm5, %v247_v11 }
  0x18   :  { %4788 = vmatpush3.bf16.msra.mxu0 %v435_v12  ;;  %4789 = vmatprep.mubr.msk.bf16.mxu0 %vm5413_vm0, %v5412_v1 }
  0x19   :  { %4750 = vmatpush3.bf16.msra.mxu1 %v5015_v18 }
  0x1a   :  { %4751 = vmatprep.subr.bf16.mxu1 %v5412_v1 }
  0x1f   :  { %4790 = vmatmul.mubr.msk.bf16.vlgmr.msra.gmra.mrb[8].mxu0 %vm429_vm6, %v423_v13 }
  0x20   :  { %21 = vsyncpa [#allocation3], 0  ;;  %4752 = vmatpush3.bf16.msra.mxu1 %v5016_v19  ;;  %v5017_v20 = vld [vmem:[%s6717_s4 + $0x30] sm:$0xff]   ;;  %v5018_v21 = vld [vmem:[%s6717_s4 + $0x38] sm:$0xff]   ;;  %v63_v22 = vlaneseq  ;;  %vm847_vm7 = vcmask 261120   ;;  %s5416_s20 = smov 96  }
  0x21   :  { %4753 = vmatprep.subr.bf16.mxu1 %v5412_v1  ;;  %v5586_v25 = vld [vmem:[%s6721_s8] sm:$0xff]  ;;  %v5020_v62 = vld [vmem:[%s6719_s6 + $0x8] sm:$0xff]   ;;  %v5021_v63 = vld [vmem:[%s6719_s6 + $0x10] sm:$0xff]   ;;  %s5417_s7 = smov 32   ;;  %s5418_s21 = smov 64  }
  0x22   :  { %v5578_v23 = vshrl.u32 %v63_v22, 7  ;;  %v5019_v59 = vld [vmem:[%s6719_s6] sm:$0xff]   ;;  %v5022_v0 = vld [vmem:[%s6719_s6 + $0x18] sm:$0xff]   ;;  %v5024_v4 = vld [vmem:[%s6719_s6 + $0x28] sm:$0xff]   ;;  %s5420_s2 = smov [#allocation2]  }
  0x23   :  { %v5023_v2 = vld [vmem:[%s6719_s6 + $0x20] sm:$0xff]   ;;  %v5025_v6 = vld [vmem:[%s6719_s6 + $0x30] sm:$0xff]   ;;  %v5026_v8 = vld [vmem:[%s6719_s6 + $0x38] sm:$0xff]   ;;  %s4150_s25 = sshll.u32 %s5420_s2, 4  ;;  %s4151_s25 = int_to_ptr.vmem [resolvable:$true] %s4150_s25 }
  0x24   :  { %4754 = vmatpush3.bf16.msra.mxu1 %v5017_v20  ;;  %v5581_v24 = vsub.s32 0, %v5578_v23  ;;  %v5591_v34 = vsub.s32 2, %v5578_v23  ;;  %v5596_v40 = vsub.s32 4, %v5578_v23  ;;  %v5645_v15 = vsub.s32 1, %v5578_v23  ;;  %s5388_s26 = scalar_lea.vmem %s4151_s25, 32  ;;  %p5393_p1 = scmp.lt.s32.totalorder %s4151_s25, %s4151_s25 }
  0x25   :  { %4755 = vmatprep.subr.bf16.mxu1 %v5412_v1  ;;  %v5648_v16 = vsub.s32 3, %v5578_v23  ;;  %vm482_vm10 = vcmp.ge.s32.totalorder %v5578_v23, 1  ;;  %vm494_vm1 = vcmp.lt.s32.totalorder %v5578_v23, 2  ;;  %p5389_p0 = scmp.ne.s32.totalorder %s4151_s25, %s5388_s26  ;;  %p5394_p2 = scmp.lt.s32.totalorder %s5388_s26, %s5388_s26 }
  0x26   :  { %v66_v26 = vrot.slane %v5586_v25, %v5581_v24  ;;  %v252_v38 = vrot.slane %v5586_v25, %v5591_v34  ;;  %v428_v45 = vrot.slane %v5586_v25, %v5596_v40  ;;  %v158_v17 = vrot.slane %v5586_v25, %v5645_v15 }
  0x27   :  { %v333_v18 = vrot.slane %v5586_v25, %v5648_v16  ;;  %v5032_v25 = vld [vmem:[%s6725_s12 + $0x1c] ss:$12 sps:$4 sm:$0xff]   ;;  %p5395_p3 = por %p5394_p2, %p5393_p1 }
  0x28   :  { %4756 = vmatpush3.bf16.msra.mxu1 %v5018_v21 }
  0x29   :  { %4767 = vmatprep.subr.bf16.mxu1 %v5412_v1  ;;  %v4993_v19 = vadd.f32 %v333_v18, %v158_v17  ;;  %v589_v17 = vld [vmem:[%s6723_s10] sm:$0x7]  ;;  %p5396_p4 = pnand %p5395_p3, %p5389_p0 }
  0x2a   :  { %v594_v18 = vrot.slane %v589_v17, %v5581_v24 }
  0xe2   :  { %v123_v27 = vpop.f32.mrb[0].mxu0 }
  0xe3   :  { %v124_v28 = vadd.f32 %v123_v27, %v66_v26  ;;  %v4739_v29 = vpop.f32.mrb[1].mxu0 }
  0xe4   :  { %v126_v30 = vpop.f32.mrb[2].mxu0  ;;  %v5027_v29 = vld [vmem:[%s6725_s12] ss:$12 sps:$4 sm:$0xff]  }
  0xe5   :  { %v129_v31 = vmul.f32 %v124_v28, %v124_v28  ;;  %v4740_v32 = vpop.f32.mrb[3].mxu0  ;;  %v5029_v30 = vld [vmem:[%s6725_s12 + $0x4] ss:$12 sps:$4 sm:$0xff]  }
  0xe6   :  { %734 = vmatprep.subr.bf16.mxu0 %v5029_v30  ;;  %v5035_v32 = vld [vmem:[%s6725_s12 + $0x34] ss:$12 sps:$4 sm:$0xff]  }
  0xe7   :  { %v130_v33 = vmul.f32 %v129_v31, %v124_v28  ;;  %735 = vmatpush1.bf16.msra.mxu0 %v5027_v29  ;;  %v5030_v31 = vld [vmem:[%s6725_s12 + $0x18] ss:$12 sps:$4 sm:$0xff]  }
  0xe8   :  { %736 = vmatprep.subr.bf16.mxu0 %v5032_v25 }
  0xe9   :  { %v131_v35 = vmul.f32 0.044715, %v130_v33  ;;  %v5033_v33 = vld [vmem:[%s6725_s12 + $0x30] ss:$12 sps:$4 sm:$0xff]  }
  0xea   :  { %v298_v36 = vpop.f32.mrb[4].mxu0 }
  0xeb   :  { %v132_v37 = vadd.f32 %v131_v35, %v124_v28  ;;  %v4765_v39 = vpop.f32.mrb[5].mxu0  ;;  %v299_v44 = vadd.f32 %v298_v36, %v252_v38  ;;  %737 = vmatpush1.bf16.msra.mxu0 %v5030_v31 }
  0xec   :  { %v301_v41 = vpop.f32.mrb[6].mxu0  ;;  %738 = vmatprep.subr.bf16.mxu0 %v5035_v32  ;;  %v5038_v39 = vld [vmem:[%s6725_s12 + $0x4c] ss:$12 sps:$4 sm:$0xff]  }
  0xed   :  { %v133_v42 = vmul.f32 0.7978846, %v132_v37  ;;  %v4766_v43 = vpop.f32.mrb[7].mxu0  ;;  %v304_v47 = vmul.f32 %v299_v44, %v299_v44  ;;  %v5036_v41 = vld [vmem:[%s6725_s12 + $0x48] ss:$12 sps:$4 sm:$0xff]  }
  0xee   :  { %v5039_v43 = vld [vmem:[%s6725_s12 + $0x60] ss:$12 sps:$4 sm:$0xff]  }
  0xef   :  { %5267 = vtanh.f32 %v133_v42  ;;  %v305_v52 = vmul.f32 %v304_v47, %v299_v44  ;;  %739 = vmatpush1.bf16.msra.mxu0 %v5033_v33  ;;  %v5041_v42 = vld [vmem:[%s6725_s12 + $0x64] ss:$12 sps:$4 sm:$0xff]  }
  0xf0   :  { %740 = vmatprep.subr.bf16.mxu0 %v5038_v39  ;;  %v5045_v47 = vld [vmem:[%s6725_s12 + $0x90] ss:$12 sps:$4 sm:$0xff]  }
  0xf1   :  { %v306_v55 = vmul.f32 0.044715, %v305_v52 }
  0xf2   :  { %v471_v46 = vpop.f32.mrb[8].mxu0 }
  0xf3   :  { %v5600_v48 = vadd.f32 %v471_v46, %v428_v45  ;;  %v4791_v49 = vpop.f32.mrb[9].mxu0  ;;  %v307_v58 = vadd.f32 %v306_v55, %v299_v44  ;;  %741 = vmatpush1.bf16.msra.mxu0 %v5036_v41  ;;  %v5042_v45 = vld [vmem:[%s6725_s12 + $0x78] ss:$12 sps:$4 sm:$0xff]   ;;  %v5047_v46 = vld [vmem:[%s6725_s12 + $0x94] ss:$12 sps:$4 sm:$0xff]  }
  0xf4   :  { %v474_v50 = vpop.f32.mrb[10].mxu0  ;;  %742 = vmatprep.subr.bf16.mxu0 %v5041_v42  ;;  %v5048_v49 = vld [vmem:[%s6725_s12 + $0xa8] ss:$12 sps:$4 sm:$0xff]  }
  0xf5   :  { %521 = vadd.xlane.f32.xlu0 %v5600_v48  ;;  %v4792_v51 = vpop.f32.mrb[11].mxu0  ;;  %v308_v61 = vmul.f32 0.7978846, %v307_v58  ;;  %v5050_v50 = vld [vmem:[%s6725_s12 + $0xac] ss:$12 sps:$4 sm:$0xff]  }
  0xf6   :  { %v5415_v51 = vmov 0  }
  0xf7   :  { %5269 = vtanh.f32 %v308_v61  ;;  %743 = vmatpush1.bf16.msra.mxu0 %v5039_v43  ;;  %766 = vmatprep.mubr.bf16.mxu0 %v5415_v51 }
  0xf9   :  { %v5268_v53 = vpop.eup %5267 }
  0xfa   :  { %v135_v54 = vadd.f32 1.0, %v5268_v53 }
  0xfc   :  { %v136_v56 = vmul.f32 0.5, %v135_v54 }
  0xfe   :  { %v137_v57 = vmul.f32 %v136_v56, %v124_v28 }
 0x100   :  { %v138_v60 = vpack.c.bf16 %v137_v57, %v137_v57 }
 0x101   :  { %v5270_v3 = vpop.eup %5269 }
 0x102   :  { %4758 = vmatmul.mubr.bf16.vlgmr.msra.gmra.mrb[0].mxu1 %v138_v60  ;;  %v310_v5 = vadd.f32 1.0, %v5270_v3 }
 0x103   :  { %4768 = vmatpush3.bf16.msra.mxu1 %v5019_v59  ;;  %4783 = vmatprep.mubr.msk.bf16.mxu1 %vm5413_vm0, %v5412_v1  ;;  %v5711_v59 = vld [vmem:[%s6722_s9] sm:$0xff] }
 0x104   :  { %4769 = vmatprep.subr.bf16.mxu1 %v5412_v1  ;;  %v311_v7 = vmul.f32 0.5, %v310_v5  ;;  %v547_v61 = vrot.slane %v5711_v59, %v5581_v24 }
 0x106   :  { %v312_v9 = vmul.f32 %v311_v7, %v299_v44  ;;  %v5044_v44 = vld [vmem:[%s6725_s12 + $0x7c] ss:$12 sps:$4 sm:$0xff]  }
 0x107   :  { %4770 = vmatpush3.bf16.msra.mxu1 %v5020_v62  ;;  %744 = vmatprep.subr.bf16.mxu0 %v5044_v44 }
 0x108   :  { %4771 = vmatprep.subr.bf16.mxu1 %v5412_v1  ;;  %v313_v10 = vpack.c.bf16 %v312_v9, %v312_v9  ;;  %745 = vmatpush1.bf16.msra.mxu0 %v5042_v45  ;;  %v5053_v9 = vld [vmem:[%s6725_s12 + $0x38] ss:$12 sps:$4 sm:$0xff]  }
 0x109   :  { %746 = vmatprep.subr.bf16.mxu0 %v5047_v46 }
 0x10b   :  { %4772 = vmatpush3.bf16.msra.mxu1 %v5021_v63 }
 0x10c   :  { %4773 = vmatprep.subr.bf16.mxu1 %v5412_v1  ;;  %747 = vmatpush1.bf16.msra.mxu0 %v5045_v47 }
 0x10d   :  { %748 = vmatprep.subr.bf16.mxu0 %v5050_v50 }
 0x10f   :  { %4774 = vmatpush3.bf16.msra.mxu1 %v5022_v0 }
 0x110   :  { %4775 = vmatprep.subr.bf16.mxu1 %v5412_v1  ;;  %749 = vmatpush1.bf16.msra.mxu0 %v5048_v49 }
 0x111   :  { %4793 = vmatprep.subr.bf16.mxu0 %v5412_v1 }
 0x113   :  { %4776 = vmatpush3.bf16.msra.mxu1 %v5023_v2  ;;  %v553_v2 = vrot.slane %v5711_v59, %v5645_v15 }
 0x114   :  { %4777 = vmatprep.subr.bf16.mxu1 %v5412_v1 }
 0x117   :  { %4778 = vmatpush3.bf16.msra.mxu1 %v5024_v4 }
 0x118   :  { %4779 = vmatprep.subr.bf16.mxu1 %v5412_v1 }
 0x11b   :  { %4780 = vmatpush3.bf16.msra.mxu1 %v5025_v6  ;;  %v5051_v6 = vld [vmem:[%s6725_s12 + $0x8] ss:$12 sps:$4 sm:$0xff]  }
 0x11c   :  { %4781 = vmatprep.subr.bf16.mxu1 %v5412_v1 }
 0x11f   :  { %4782 = vmatpush3.bf16.msra.mxu1 %v5026_v8  ;;  %v5052_v8 = vld [vmem:[%s6725_s12 + $0x20] ss:$12 sps:$4 sm:$0xff]  }
 0x120   :  { %4813 = vmatprep.subr.bf16.mxu1 %v5412_v1 }
 0x122   :  { %4784 = vmatmul.mubr.bf16.vlgmr.msra.gmra.mrb[0].mxu1 %v313_v10  ;;  %v5054_v10 = vld [vmem:[%s6725_s12 + $0x50] ss:$12 sps:$4 sm:$0xff]  }
 0x123   :  { %4815 = vmatprep.mubr.msk.bf16.mxu1 %vm5413_vm0, %v5412_v1 }
 0x182   :  { %v522_v11 = vpop.xlane.xlu0 %521 }
 0x183   :  { %v526_v12 = vmul.f32 0.0078125, %v522_v11  ;;  %v5055_v11 = vld [vmem:[%s6725_s12 + $0x68] ss:$12 sps:$4 sm:$0xff]  }
 0x185   :  { %v5640_v13 = vsub.f32 %v5600_v48, %v526_v12  ;;  %v5056_v12 = vld [vmem:[%s6725_s12 + $0x80] ss:$12 sps:$4 sm:$0xff]  }
 0x187   :  { %v530_v14 = vmul.f32 %v5640_v13, %v5640_v13 }
 0x189   :  { %532 = vadd.xlane.f32.xlu1 %v530_v14  ;;  %v5058_v14 = vld [vmem:[%s6725_s12 + $0xb0] ss:$12 sps:$4 sm:$0xff]  }
 0x1f5   :  { %v416_v20 = vpop.f32.mrb[0].mxu1 }
 0x1f6   :  { %v5654_v21 = vadd.f32 %v4993_v19, %v416_v20  ;;  %v4785_v26 = vpop.f32.mrb[1].mxu1  ;;  %v598_v20 = vrot.slane %v589_v17, %v5645_v15 }
 0x1f7   :  { %v419_v27 = vpop.f32.mrb[2].mxu1 }
 0x1f8   :  { %523 = vadd.xlane.f32.xlu0 %v5654_v21  ;;  %v4786_v28 = vpop.f32.mrb[3].mxu1 }
 0x216   :  { %v533_v52 = vpop.xlane.xlu1 %532 }
 0x217   :  { %v536_v53 = vmul.f32 0.0078125, %v533_v52 }
 0x219   :  { %v538_v54 = vadd.f32 1e-12, %v536_v53 }
 0x21b   :  { %5271 = vrsqrt.f32 %v538_v54 }
 0x225   :  { %v5272_v58 = vpop.eup %5271 }
 0x226   :  { %v542_v60 = vmul.f32 %v5272_v58, %v5640_v13  ;;  %v5057_v13 = vld [vmem:[%s6725_s12 + $0x98] ss:$12 sps:$4 sm:$0xff]   ;;  %v481_v58 = vand.u32 127, %v63_v22 }
 0x228   :  { %v548_v0 = vmul.f32 %v547_v61, %v542_v60  ;;  %vm502_vm8 = vcmp.ge.s32.totalorder %v481_v58, 1  ;;  %vm504_vm9 = vcmp.ge.s32.totalorder %v481_v58, 12  ;;  %vm506_vm11 = vcmp.ge.s32.totalorder %v481_v58, 8 }
 0x229   :  { %v503_v60 = vsel %vm502_vm8, 1, %v5415_v51  ;;  %vm509_vm12 = vcmp.lt.s32.totalorder %v481_v58, 16  ;;  %vm508_vm13 = vcmp.lt.s32.totalorder %v481_v58, 2 }
 0x22a   :  { %v554_v4 = vadd.f32 %v553_v2, %v548_v0  ;;  %vm510_vm14 = vmand %vm506_vm11, %vm509_vm12 }
 0x22b   :  { %vm511_vm4 = vmor %vm508_vm13, %vm510_vm14 }
 0x285   :  { %v524_v35 = vpop.xlane.xlu0 %523 }
 0x286   :  { %v527_v36 = vmul.f32 0.0078125, %v524_v35 }
 0x288   :  { %v529_v37 = vsub.f32 %v5654_v21, %v527_v36 }
 0x28a   :  { %v531_v38 = vmul.f32 %v529_v37, %v529_v37 }
 0x28c   :  { %534 = vadd.xlane.f32.xlu1 %v531_v38  ;;  %v602_v38 = vrot.slane %v589_v17, %v5591_v34 }
 0x319   :  { %v535_v55 = vpop.xlane.xlu1 %534 }
 0x31a   :  { %v537_v56 = vmul.f32 0.0078125, %v535_v55 }
 0x31c   :  { %v539_v57 = vadd.f32 1e-12, %v537_v56 }
 0x31e   :  { %5273 = vrsqrt.f32 %v539_v57 }
 0x328   :  { %v5274_v62 = vpop.eup %5273 }
 0x329   :  { %v543_v63 = vmul.f32 %v5274_v62, %v529_v37  ;;  %v479_v62 = vadd.s32 8, %v5578_v23 }
 0x32b   :  { %v549_v3 = vmul.f32 %v547_v61, %v543_v63  ;;  %v505_v61 = vsel %vm504_vm9, 1, %v5415_v51  ;;  %v484_v63 = vsel %vm482_vm10, 1, %v5415_v51  ;;  %vm487_vm15 = vcmp.ge.s32.totalorder %v479_v62, 12 }
 0x32c   :  { %v507_v0 = vsel %vm506_vm11, %v505_v61, %v503_v60  ;;  %v489_v22 = vsel %vm487_vm15, 1, %v5415_v51  ;;  %vm1036_vm10 = vcmask 130048  }
 0x32d   :  { %v555_v5 = vadd.f32 %v553_v2, %v549_v3  ;;  %vm512_vm3 = vcmp.eq.s32.totalorder %v484_v63, %v507_v0  ;;  %vm513_vm6 = vcmp.eq.s32.totalorder %v489_v22, %v507_v0  ;;  %v5419_v2 = vmov -1e+30  }
 0x32e   :  { %vm514_vm5 = vmand %vm512_vm3, %vm494_vm1 }
 0x32f   :  { %v556_v7 = vpack.c.bf16 %v555_v5, %v554_v4  ;;  %vm516_vm8 = vmand %vm514_vm5, %vm511_vm4 }
 0x330   :  { %vm517_vm9 = vmand %vm513_vm6, %vm511_vm4  ;;  %v5798_v3 = vsel %vm516_vm8, 0.0, %v5419_v2 }
 0x331   :  { %767 = vmatmul.mubr.bf16.vlgmr.msra.gmra.mrb[12].mxu0 %v556_v7  ;;  %v5800_v5 = vsel %vm517_vm9, 0.0, %v5419_v2 }
 0x332   :  { %4794 = vmatpush3.bf16.msra.mxu0 %v5051_v6  ;;  %4809 = vmatprep.mubr.msk.bf16.mxu0 %vm5413_vm0, %v5412_v1 }
 0x333   :  { %4795 = vmatprep.subr.bf16.mxu0 %v5412_v1 }
 0x336   :  { %4796 = vmatpush3.bf16.msra.mxu0 %v5052_v8 }
 0x337   :  { %4797 = vmatprep.subr.bf16.mxu0 %v5412_v1 }
 0x33a   :  { %4798 = vmatpush3.bf16.msra.mxu0 %v5053_v9 }
 0x33b   :  { %4799 = vmatprep.subr.bf16.mxu0 %v5412_v1 }
 0x33e   :  { %4800 = vmatpush3.bf16.msra.mxu0 %v5054_v10 }
 0x33f   :  { %4801 = vmatprep.subr.bf16.mxu0 %v5412_v1 }
 0x342   :  { %4802 = vmatpush3.bf16.msra.mxu0 %v5055_v11 }
 0x343   :  { %4803 = vmatprep.subr.bf16.mxu0 %v5412_v1 }
 0x346   :  { %4804 = vmatpush3.bf16.msra.mxu0 %v5056_v12 }
 0x347   :  { %4805 = vmatprep.subr.bf16.mxu0 %v5412_v1 }
 0x34a   :  { %4806 = vmatpush3.bf16.msra.mxu0 %v5057_v13 }
 0x34b   :  { %4807 = vmatprep.subr.bf16.mxu0 %v5412_v1 }
 0x34e   :  { %4808 = vmatpush3.bf16.msra.mxu0 %v5058_v14 }
 0x34f   :  { %4837 = vmatprep.subr.bf16.mxu0 %v5412_v1 }
 0x351   :  { %4810 = vmatmul.mubr.bf16.vlgmr.msra.gmra.mrb[16].mxu0 %v556_v7 }
 0x352   :  { %4839 = vmatprep.mubr.msk.bf16.mxu0 %vm5413_vm0, %v5412_v1 }
 0x404   :  { %v768_v19 = vpop.f32.mrb[12].mxu0 }
 0x405   :  { %v769_v26 = vadd.f32 %v768_v19, %v594_v18  ;;  %v770_v27 = vpop.f32.mrb[13].mxu0 }
 0x406   :  { %v772_v28 = vpop.f32.mrb[14].mxu0  ;;  %v771_v25 = vadd.f32 %v770_v27, %v598_v20 }
 0x407   :  { %v773_v29 = vadd.f32 %v772_v28, %v594_v18  ;;  %v774_v30 = vpop.f32.mrb[15].mxu0  ;;  %v818_v32 = vmul.f32 0.17677669, %v769_v26 }
 0x408   :  { %v775_v31 = vadd.f32 %v774_v30, %v598_v20 }
 0x409   :  { %v819_v33 = vmul.f32 0.17677669, %v773_v29 }
 0x40a   :  { %v821_v35 = vpack.c.bf16 %v775_v31, %v771_v25 }
 0x40b   :  { %v820_v36 = vpack.c.bf16 %v819_v33, %v818_v32 }
 0x40c   :  { %831 = vrot.lane.b32.xlu0 %v821_v35, %s5416_s20  ;;  %v852_v37 = vsel %vm847_vm7, %v821_v35, 0 }
 0x40d   :  { %4814 = vmatpush3.bf16.xpose.msra.mxu1 %v852_v37  ;;  %824 = vrot.lane.b32.xlu1 %v820_v36, %s5416_s20 }
 0x40e   :  { %4819 = vmatprep.subr.bf16.mxu1 %v5412_v1 }
 0x410   :  { %835 = vrot.lane.b32.xlu0 %v821_v35, %s5417_s7 }
 0x411   :  { %833 = vrot.lane.b32.xlu1 %v821_v35, %s5418_s21 }
 0x414   :  { %4816 = vmatmul.mubr.msk.bf16.vlgmr.msra.gmra.mrb[4].mxu1 %vm847_vm7, %v820_v36 }
 0x415   :  { %826 = vrot.lane.b32.xlu1 %v820_v36, %s5418_s21  ;;  %4821 = vmatprep.mubr.msk.bf16.mxu1 %vm5413_vm0, %v5412_v1 }
 0x419   :  { %828 = vrot.lane.b32.xlu1 %v820_v36, %s5417_s7 }
 0x424   :  { %v811_v39 = vpop.f32.mrb[16].mxu0 }
 0x425   :  { %v4811_v41 = vpop.f32.mrb[17].mxu0  ;;  %v812_v43 = vadd.f32 %v811_v39, %v602_v38 }
 0x426   :  { %v814_v42 = vpop.f32.mrb[18].mxu0 }
 0x427   :  { %v815_v44 = vadd.f32 %v814_v42, %v602_v38  ;;  %v4812_v45 = vpop.f32.mrb[19].mxu0 }
 0x429   :  { %v5771_v46 = vpack.c.bf16 %v815_v44, %v812_v43 }
 0x42b   :  { %4838 = vmatpush3.bf16.msra.mxu0 %v5771_v46 }
 0x42c   :  { %4849 = vmatprep.subr.bf16.mxu0 %v5412_v1 }
 0x47e   :  { %v832_v47 = vpop.permute.xlu0 %831 }
 0x47f   :  { %v899_v49 = vsel %vm847_vm7, %v832_v47, 0  ;;  %v825_v50 = vpop.permute.xlu1 %824 }
 0x480   :  { %4820 = vmatpush3.bf16.xpose.msra.mxu1 %v899_v49 }
 0x481   :  { %4825 = vmatprep.subr.bf16.mxu1 %v5412_v1 }
 0x482   :  { %v836_v54 = vpop.permute.xlu0 %835 }
 0x483   :  { %v834_v52 = vpop.permute.xlu1 %833  ;;  %v993_v56 = vsel %vm847_vm7, %v836_v54, 0 }
 0x484   :  { %v946_v53 = vsel %vm847_vm7, %v834_v52, 0 }
 0x487   :  { %4822 = vmatmul.mubr.msk.bf16.vlgmr.msra.gmra.mrb[8].mxu1 %vm847_vm7, %v825_v50  ;;  %v827_v55 = vpop.permute.xlu1 %826 }
 0x488   :  { %4826 = vmatpush3.bf16.xpose.msra.mxu1 %v946_v53  ;;  %4827 = vmatprep.mubr.msk.bf16.mxu1 %vm5413_vm0, %v5412_v1 }
 0x489   :  { %4831 = vmatprep.subr.bf16.mxu1 %v5412_v1 }
 0x48b   :  { %v829_v57 = vpop.permute.xlu1 %828 }
 0x48f   :  { %4828 = vmatmul.mubr.msk.bf16.vlgmr.msra.gmra.mrb[12].mxu1 %vm847_vm7, %v827_v55 }
 0x490   :  { %4832 = vmatpush3.bf16.xpose.msra.mxu1 %v993_v56  ;;  %4833 = vmatprep.mubr.msk.bf16.mxu1 %vm5413_vm0, %v5412_v1 }
 0x491   :  { %4843 = vmatprep.subr.bf16.mxu1 %v5412_v1 }
 0x497   :  { %4834 = vmatmul.mubr.msk.bf16.vlgmr.msra.gmra.mrb[16].mxu1 %vm847_vm7, %v829_v57 }
 0x498   :  { %4845 = vmatprep.mubr.msk.bf16.mxu1 %vm5413_vm0, %v5412_v1 }
 0x4e7   :  { %v888_v4 = vpop.f32.mrb[4].mxu1 }
 0x4e8   :  { %v889_v6 = vadd.f32 %v888_v4, %v5798_v3  ;;  %v4817_v7 = vpop.f32.mrb[5].mxu1 }
 0x4e9   :  { %v891_v8 = vpop.f32.mrb[6].mxu1 }
 0x4ea   :  { %v892_v9 = vadd.f32 %v891_v8, %v5800_v5  ;;  %v4818_v10 = vpop.f32.mrb[7].mxu1  ;;  %v1037_v11 = vsel %vm1036_vm10, %v889_v6, -inf }
 0x4eb   :  { %1038 = vmax.xlane.f32.xlu0 %v1037_v11 }
 0x4ec   :  { %v1040_v12 = vsel %vm1036_vm10, %v892_v9, -inf }
 0x4ed   :  { %1041 = vmax.xlane.f32.xlu1 %v1040_v12 }
 0x55a   :  { %v935_v13 = vpop.f32.mrb[8].mxu1 }
 0x55b   :  { %v936_v14 = vadd.f32 %v935_v13, %v5798_v3  ;;  %v4823_v17 = vpop.f32.mrb[9].mxu1 }
 0x55c   :  { %v938_v18 = vpop.f32.mrb[10].mxu1 }
 0x55d   :  { %v939_v19 = vadd.f32 %v938_v18, %v5800_v5  ;;  %v4824_v20 = vpop.f32.mrb[11].mxu1  ;;  %v1043_v26 = vsel %vm1036_vm10, %v936_v14, -inf }
 0x55e   :  { %1044 = vmax.xlane.f32.xlu0 %v1043_v26 }
 0x55f   :  { %v1046_v27 = vsel %vm1036_vm10, %v939_v19, -inf }
 0x562   :  { %1047 = vmax.xlane.f32.xlu0 %v1046_v27  ;;  %v982_v28 = vpop.f32.mrb[12].mxu1 }
 0x563   :  { %v983_v29 = vadd.f32 %v982_v28, %v5798_v3  ;;  %v4829_v30 = vpop.f32.mrb[13].mxu1 }
 0x564   :  { %v985_v25 = vpop.f32.mrb[14].mxu1 }
 0x565   :  { %v986_v31 = vadd.f32 %v985_v25, %v5800_v5  ;;  %v4830_v32 = vpop.f32.mrb[15].mxu1  ;;  %v1049_v33 = vsel %vm1036_vm10, %v983_v29, -inf }
 0x566   :  { %1050 = vmax.xlane.f32.xlu0 %v1049_v33 }
 0x567   :  { %v1052_v35 = vsel %vm1036_vm10, %v986_v31, -inf }
 0x568   :  { %1053 = vmax.xlane.f32.xlu1 %v1052_v35 }
 0x56a   :  { %v1029_v36 = vpop.f32.mrb[16].mxu1 }
 0x56b   :  { %v1030_v37 = vadd.f32 %v1029_v36, %v5798_v3  ;;  %v4835_v38 = vpop.f32.mrb[17].mxu1 }
 0x56c   :  { %v1032_v39 = vpop.f32.mrb[18].mxu1 }
 0x56d   :  { %v5816_v41 = vadd.f32 %v1032_v39, %v5800_v5  ;;  %v4836_v42 = vpop.f32.mrb[19].mxu1  ;;  %v1055_v43 = vsel %vm1036_vm10, %v1030_v37, -inf }
 0x56e   :  { %1056 = vmax.xlane.f32.xlu0 %v1055_v43 }
 0x56f   :  { %v1058_v44 = vsel %vm1036_vm10, %v5816_v41, -inf }
 0x570   :  { %1059 = vmax.xlane.f32.xlu1 %v1058_v44 }
 0x578   :  { %v1039_v45 = vpop.xlane.xlu0 %1038 }
 0x579   :  { %v1061_v47 = vsub.f32 %v889_v6, %v1039_v45 }
 0x57a   :  { %v1042_v49 = vpop.xlane.xlu1 %1041 }
 0x57b   :  { %v1069_v50 = vmul.f32 1.442695, %v1061_v47  ;;  %v1062_v52 = vsub.f32 %v892_v9, %v1042_v49 }
 0x57d   :  { %5275 = vpow2.f32 %v1069_v50  ;;  %v1071_v53 = vmul.f32 1.442695, %v1062_v52 }
 0x57f   :  { %5277 = vpow2.f32 %v1071_v53 }
 0x587   :  { %v5276_v54 = vpop.eup %5275 }
 0x588   :  { %v1085_v55 = vsel %vm1036_vm10, %v5276_v54, 0.0 }
 0x589   :  { %v5278_v56 = vpop.eup %5277  ;;  %1086 = vadd.xlane.f32.xlu0 %v1085_v55 }
 0x58a   :  { %v1088_v57 = vsel %vm1036_vm10, %v5278_v56, 0.0 }
 0x58b   :  { %1089 = vadd.xlane.f32.xlu1 %v1088_v57 }
 0x5eb   :  { %v1045_v58 = vpop.xlane.xlu0 %1044 }
 0x5ec   :  { %v1063_v60 = vsub.f32 %v936_v14, %v1045_v58 }
 0x5ee   :  { %v1073_v61 = vmul.f32 1.442695, %v1063_v60 }
 0x5ef   :  { %v1048_v62 = vpop.xlane.xlu0 %1047 }
 0x5f0   :  { %5279 = vpow2.f32 %v1073_v61  ;;  %v1064_v63 = vsub.f32 %v939_v19, %v1048_v62  ;;  %v5059_v61 = vld [vmem:[%s6726_s13] sm:$0xff]  }
 0x5f2   :  { %v1075_v0 = vmul.f32 1.442695, %v1064_v63  ;;  %v5060_v63 = vld [vmem:[%s6726_s13 + $0x8] sm:$0xff]  }
 0x5f3   :  { %v1051_v22 = vpop.xlane.xlu0 %1050 }
 0x5f4   :  { %5281 = vpow2.f32 %v1075_v0  ;;  %v1065_v2 = vsub.f32 %v983_v29, %v1051_v22 }
 0x5f5   :  { %v1054_v4 = vpop.xlane.xlu1 %1053 }
 0x5f6   :  { %v1077_v6 = vmul.f32 1.442695, %v1065_v2  ;;  %v1066_v7 = vsub.f32 %v986_v31, %v1054_v4 }
 0x5f8   :  { %5283 = vpow2.f32 %v1077_v6  ;;  %v1079_v8 = vmul.f32 1.442695, %v1066_v7 }
 0x5fa   :  { %v5280_v9 = vpop.eup %5279  ;;  %5285 = vpow2.f32 %v1079_v8  ;;  %v5061_v8 = vld [vmem:[%s6726_s13 + $0x10] sm:$0xff]  }
 0x5fb   :  { %v1057_v10 = vpop.xlane.xlu0 %1056  ;;  %v1091_v11 = vsel %vm1036_vm10, %v5280_v9, 0.0 }
 0x5fc   :  { %v1067_v12 = vsub.f32 %v1030_v37, %v1057_v10  ;;  %1092 = vadd.xlane.f32.xlu0 %v1091_v11  ;;  %v5063_v10 = vld [vmem:[%s6726_s13 + $0x18] sm:$0xff]  }
 0x5fd   :  { %v1060_v29 = vpop.xlane.xlu1 %1059 }
 0x5fe   :  { %v5282_v13 = vpop.eup %5281  ;;  %v1081_v14 = vmul.f32 1.442695, %v1067_v12  ;;  %v1068_v36 = vsub.f32 %v5816_v41, %v1060_v29  ;;  %v5065_v29 = vld [vmem:[%s6726_s13 + $0x30] sm:$0xff]  }
 0x5ff   :  { %v1094_v17 = vsel %vm1036_vm10, %v5282_v13, 0.0 }
 0x600   :  { %5287 = vpow2.f32 %v1081_v14  ;;  %1095 = vadd.xlane.f32.xlu1 %v1094_v17  ;;  %v1083_v38 = vmul.f32 1.442695, %v1068_v36  ;;  %v5062_v14 = vld [vmem:[%s6726_s13 + $0x20] sm:$0xff]   ;;  %v5066_v36 = vld [vmem:[%s6726_s13 + $0x38] sm:$0xff]  }
 0x602   :  { %v5284_v18 = vpop.eup %5283 }
 0x603   :  { %v1097_v19 = vsel %vm1036_vm10, %v5284_v18, 0.0 }
 0x604   :  { %v5286_v20 = vpop.eup %5285  ;;  %1098 = vadd.xlane.f32.xlu0 %v1097_v19  ;;  %v5064_v19 = vld [vmem:[%s6726_s13 + $0x28] sm:$0xff]  }
 0x605   :  { %v1100_v26 = vsel %vm1036_vm10, %v5286_v20, 0.0 }
 0x606   :  { %1101 = vadd.xlane.f32.xlu1 %v1100_v26 }
 0x60a   :  { %v5827_v27 = vpop.eup %5287 }
 0x60b   :  { %v1103_v28 = vsel %vm1036_vm10, %v5827_v27, 0.0 }
 0x60c   :  { %1104 = vadd.xlane.f32.xlu0 %v1103_v28 }
 0x616   :  { %v1087_v30 = vpop.xlane.xlu0 %1086 }
 0x617   :  { %5289 = vrcp.f32 %v1087_v30  ;;  %841 = vrot.lane.b32.xlu1 %v5771_v46, %s5418_s21 }
 0x618   :  { %v1090_v25 = vpop.xlane.xlu1 %1089 }
 0x619   :  { %5291 = vrcp.f32 %v1090_v25 }
 0x61a   :  { %5293 = vpow2.f32 %v1083_v38 }
 0x621   :  { %v5290_v31 = vpop.eup %5289 }
 0x622   :  { %838 = vrot.lane.b32.xlu0 %v5771_v46, %s5416_s20  ;;  %v1117_v33 = vmul.f32 %v5290_v31, %v5276_v54 }
 0x623   :  { %v5292_v32 = vpop.eup %5291 }
 0x624   :  { %v1118_v35 = vmul.f32 %v5292_v32, %v5278_v56  ;;  %v5294_v39 = vpop.eup %5293 }
 0x625   :  { %v1106_v42 = vsel %vm1036_vm10, %v5294_v39, 0.0 }
 0x626   :  { %v1125_v37 = vpack.c.bf16 %v1118_v35, %v1117_v33 }
 0x628   :  { %4840 = vmatmul.mubr.msk.bf16.vlgmr.msra.gmra.mrb[20].mxu0 %vm1036_vm10, %v1125_v37 }
 0x629   :  { %4851 = vmatprep.mubr.msk.bf16.mxu0 %vm5413_vm0, %v5412_v1 }
 0x63b   :  { %1107 = vadd.xlane.f32.xlu1 %v1106_v42 }
 0x64c   :  { %844 = vrot.lane.b32.xlu1 %v5771_v46, %s5417_s7 }
 0x689   :  { %v1093_v43 = vpop.xlane.xlu0 %1092 }
 0x68d   :  { %v1096_v44 = vpop.xlane.xlu1 %1095 }
 0x68e   :  { %5295 = vrcp.f32 %v1096_v44 }
 0x68f   :  { %5297 = vrcp.f32 %v1093_v43 }
 0x691   :  { %v1099_v41 = vpop.xlane.xlu0 %1098 }
 0x692   :  { %5299 = vrcp.f32 %v1099_v41 }
 0x693   :  { %v1102_v45 = vpop.xlane.xlu1 %1101 }
 0x694   :  { %5301 = vrcp.f32 %v1102_v45 }
 0x697   :  { %v842_v47 = vpop.permute.xlu1 %841 }
 0x698   :  { %v5296_v49 = vpop.eup %5295  ;;  %4850 = vmatpush3.bf16.msra.mxu0 %v842_v47 }
 0x699   :  { %v1105_v50 = vpop.xlane.xlu0 %1104  ;;  %4861 = vmatprep.subr.bf16.mxu0 %v5412_v1  ;;  %v5298_v52 = vpop.eup %5297  ;;  %v1120_v53 = vmul.f32 %v5296_v49, %v5282_v13  ;;  %v1372_v49 = vrot.slane %v5711_v59, %v5596_v40 }
 0x69a   :  { %v1119_v55 = vmul.f32 %v5298_v52, %v5280_v9  ;;  %5303 = vrcp.f32 %v1105_v50 }
 0x69c   :  { %v5300_v54 = vpop.eup %5299  ;;  %v1126_v60 = vpack.c.bf16 %v1120_v53, %v1119_v55 }
 0x69d   :  { %v839_v56 = vpop.permute.xlu0 %838  ;;  %v1121_v57 = vmul.f32 %v5300_v54, %v5284_v18 }
 0x69e   :  { %v5302_v46 = vpop.eup %5301  ;;  %4844 = vmatpush3.bf16.msra.mxu1 %v839_v56 }
 0x69f   :  { %v1122_v58 = vmul.f32 %v5302_v46, %v5286_v20  ;;  %4855 = vmatprep.subr.bf16.mxu1 %v5412_v1 }
 0x6a1   :  { %4846 = vmatmul.mubr.msk.bf16.vlgmr.msra.gmra.mrb[20].mxu1 %vm1036_vm10, %v1126_v60  ;;  %v1127_v62 = vpack.c.bf16 %v1122_v58, %v1121_v57 }
 0x6a2   :  { %4857 = vmatprep.mubr.msk.bf16.mxu1 %vm5413_vm0, %v5412_v1 }
 0x6a3   :  { %4852 = vmatmul.mubr.msk.bf16.vlgmr.msra.gmra.mrb[24].mxu0 %vm1036_vm10, %v1127_v62 }
 0x6a4   :  { %4862 = vmatpush3.bf16.msra.mxu0 %v5059_v61  ;;  %4865 = vmatprep.mubr.msk.bf16.mxu0 %vm5413_vm0, %v5412_v1  ;;  %v5304_v2 = vpop.eup %5303 }
 0x6a5   :  { %4863 = vmatprep.subr.bf16.mxu0 %v5412_v1  ;;  %v1123_v6 = vmul.f32 %v5304_v2, %v5827_v27 }
 0x6a8   :  { %4864 = vmatpush3.bf16.msra.mxu0 %v5060_v63 }
 0x6a9   :  { %4877 = vmatprep.subr.bf16.mxu0 %v5412_v1 }
 0x6c8   :  { %v1108_v0 = vpop.xlane.xlu1 %1107 }
 0x6c9   :  { %5305 = vrcp.f32 %v1108_v0 }
 0x6cc   :  { %v845_v22 = vpop.permute.xlu1 %844 }
 0x6cd   :  { %4856 = vmatpush3.bf16.msra.mxu1 %v845_v22 }
 0x6ce   :  { %4869 = vmatprep.subr.bf16.mxu1 %v5412_v1 }
 0x6d3   :  { %v5306_v4 = vpop.eup %5305 }
 0x6d4   :  { %v1124_v7 = vmul.f32 %v5306_v4, %v5294_v39 }
 0x6d6   :  { %v1128_v9 = vpack.c.bf16 %v1124_v7, %v1123_v6 }
 0x6d8   :  { %4858 = vmatmul.mubr.msk.bf16.vlgmr.msra.gmra.mrb[24].mxu1 %vm1036_vm10, %v1128_v9 }
 0x6d9   :  { %4870 = vmatpush3.bf16.msra.mxu1 %v5061_v8  ;;  %4873 = vmatprep.mubr.msk.bf16.mxu1 %vm5413_vm0, %v5412_v1 }
 0x6da   :  { %4871 = vmatprep.subr.bf16.mxu1 %v5412_v1 }
 0x6dd   :  { %4872 = vmatpush3.bf16.msra.mxu1 %v5063_v10 }
 0x6de   :  { %4885 = vmatprep.subr.bf16.mxu1 %v5412_v1 }
 0x6fb   :  { %v1166_v11 = vpop.f32.mrb[20].mxu0 }
 0x6fc   :  { %v4841_v12 = vpop.f32.mrb[21].mxu0 }
 0x6fd   :  { %v1169_v13 = vpop.f32.mrb[22].mxu0  ;;  %v5069_v12 = vld [vmem:[%s6727_s14 + $0x4] ss:$16 sps:$4 sm:$0xff]  }
 0x6fe   :  { %v1305_v17 = vpack.c.bf16 %v1169_v13, %v1166_v11  ;;  %v4842_v18 = vpop.f32.mrb[23].mxu0  ;;  %v5067_v11 = vld [vmem:[%s6727_s14] ss:$16 sps:$4 sm:$0xff]   ;;  %v5075_v13 = vld [vmem:[%s6727_s14 + $0x24] ss:$16 sps:$4 sm:$0xff]  }
 0x6ff   :  { %v5076_v18 = vld [vmem:[%s6727_s14 + $0x28] ss:$16 sps:$4 sm:$0xff]  }
 0x700   :  { %4866 = vmatmul.mubr.msk.bf16.vlgmr.msra.gmra.mrb[28].mxu0 %vm847_vm7, %v1305_v17  ;;  %v5073_v17 = vld [vmem:[%s6727_s14 + $0x20] ss:$16 sps:$4 sm:$0xff]  }
 0x701   :  { %4878 = vmatpush3.bf16.msra.mxu0 %v5062_v14  ;;  %4881 = vmatprep.mubr.msk.bf16.mxu0 %vm5413_vm0, %v5412_v1  ;;  %v5078_v14 = vld [vmem:[%s6727_s14 + $0x2c] ss:$16 sps:$4 sm:$0xff]  }
 0x702   :  { %4879 = vmatprep.subr.bf16.mxu0 %v5412_v1 }
 0x705   :  { %4880 = vmatpush3.bf16.msra.mxu0 %v5064_v19 }
 0x706   :  { %1812 = vmatprep.subr.bf16.mxu0 %v5069_v12  ;;  %v1594_v12 = vrot.slane %v5711_v59, %v5648_v16 }
 0x774   :  { %v1210_v20 = vpop.f32.mrb[20].mxu1 }
 0x775   :  { %v4847_v26 = vpop.f32.mrb[21].mxu1 }
 0x776   :  { %v1213_v27 = vpop.f32.mrb[22].mxu1  ;;  %v1254_v28 = vpop.f32.mrb[24].mxu0 }
 0x777   :  { %v1306_v30 = vpack.c.bf16 %v1213_v27, %v1210_v20  ;;  %v4848_v25 = vpop.f32.mrb[23].mxu1  ;;  %v4853_v31 = vpop.f32.mrb[25].mxu0 }
 0x778   :  { %v1257_v32 = vpop.f32.mrb[26].mxu0  ;;  %v5081_v31 = vld [vmem:[%s6727_s14 + $0x44] ss:$16 sps:$4 sm:$0xff]  }
 0x779   :  { %v1307_v33 = vpack.c.bf16 %v1257_v32, %v1254_v28  ;;  %v4854_v35 = vpop.f32.mrb[27].mxu0  ;;  %4874 = vmatmul.mubr.msk.bf16.vlgmr.msra.gmra.mrb[28].mxu1 %vm847_vm7, %v1306_v30  ;;  %v5084_v32 = vld [vmem:[%s6727_s14 + $0x4c] ss:$16 sps:$4 sm:$0xff]  }
 0x77a   :  { %4886 = vmatpush3.bf16.msra.mxu1 %v5065_v29  ;;  %4889 = vmatprep.mubr.msk.bf16.mxu1 %vm5413_vm0, %v5412_v1  ;;  %v5082_v35 = vld [vmem:[%s6727_s14 + $0x48] ss:$16 sps:$4 sm:$0xff]  }
 0x77b   :  { %4882 = vmatmul.mubr.msk.bf16.vlgmr.msra.gmra.mrb[32].mxu0 %vm847_vm7, %v1307_v33  ;;  %4887 = vmatprep.subr.bf16.mxu1 %v5412_v1  ;;  %v5079_v33 = vld [vmem:[%s6727_s14 + $0x40] ss:$16 sps:$4 sm:$0xff]  }
 0x77c   :  { %1844 = vmatprep.mubr.bf16.mxu0 %v5415_v51  ;;  %1813 = vmatpush1.bf16.msra.mxu0 %v5067_v11 }
 0x77d   :  { %1814 = vmatprep.subr.bf16.mxu0 %v5075_v13 }
 0x77e   :  { %4888 = vmatpush3.bf16.msra.mxu1 %v5066_v36  ;;  %v5087_v36 = vld [vmem:[%s6727_s14 + $0x64] ss:$16 sps:$4 sm:$0xff]  }
 0x780   :  { %1815 = vmatpush1.bf16.msra.mxu0 %v5073_v17  ;;  %v5115_v17 = vld [vmem:[%s6728_s15 + $0x40] sm:$0xff]  }
 0x781   :  { %1816 = vmatprep.subr.bf16.mxu0 %v5081_v31  ;;  %v5126_v31 = vld [vmem:[%s6728_s15 + $0x90] sm:$0xff]  }
 0x784   :  { %1817 = vmatpush1.bf16.msra.mxu0 %v5079_v33  ;;  %v5128_v33 = vld [vmem:[%s6728_s15 + $0xd8] sm:$0xff]  }
 0x785   :  { %1818 = vmatprep.subr.bf16.mxu0 %v5087_v36  ;;  %v5130_v36 = vld [vmem:[%s6728_s15 + $0x98] sm:$0xff]  }
 0x7ab   :  { %v1298_v37 = vpop.f32.mrb[24].mxu1 }
 0x7ac   :  { %v4859_v38 = vpop.f32.mrb[25].mxu1 }
 0x7ad   :  { %v1301_v39 = vpop.f32.mrb[26].mxu1  ;;  %v5085_v38 = vld [vmem:[%s6727_s14 + $0x60] ss:$16 sps:$4 sm:$0xff]  }
 0x7ae   :  { %v1308_v42 = vpack.c.bf16 %v1301_v39, %v1298_v37  ;;  %v4860_v43 = vpop.f32.mrb[27].mxu1  ;;  %v5090_v37 = vld [vmem:[%s6727_s14 + $0x6c] ss:$16 sps:$4 sm:$0xff]   ;;  %v5088_v39 = vld [vmem:[%s6727_s14 + $0x68] ss:$16 sps:$4 sm:$0xff]   ;;  %1819 = vmatpush1.bf16.msra.mxu0 %v5085_v38  ;;  %v5132_v38 = vld [vmem:[%s6728_s15 + $0xe0] sm:$0xff]  }
 0x7af   :  { %v5096_v43 = vld [vmem:[%s6727_s14 + $0x8c] ss:$16 sps:$4 sm:$0xff]  }
 0x7b0   :  { %4890 = vmatmul.mubr.msk.bf16.vlgmr.msra.gmra.mrb[32].mxu1 %vm847_vm7, %v1308_v42  ;;  %v5093_v42 = vld [vmem:[%s6727_s14 + $0x84] ss:$16 sps:$4 sm:$0xff]  }
 0x7b1   :  { %1887 = vmatprep.mubr.bf16.mxu1 %v5415_v51  ;;  %1820 = vmatprep.subr.bf16.mxu0 %v5093_v42  ;;  %v5134_v42 = vld [vmem:[%s6728_s15 + $0xa0] sm:$0xff]  }
 0x7d3   :  { %v1362_v44 = vpop.f32.mrb[28].mxu0 }
 0x7d4   :  { %v4867_v41 = vpop.f32.mrb[29].mxu0  ;;  %v1373_v50 = vadd.f32 %v1372_v49, %v1362_v44  ;;  %v5091_v44 = vld [vmem:[%s6727_s14 + $0x80] ss:$16 sps:$4 sm:$0xff]  }
 0x7d5   :  { %v1365_v45 = vpop.f32.mrb[30].mxu0  ;;  %v5094_v41 = vld [vmem:[%s6727_s14 + $0x88] ss:$16 sps:$4 sm:$0xff]   ;;  %1821 = vmatpush1.bf16.msra.mxu0 %v5091_v44 }
 0x7d6   :  { %v4868_v47 = vpop.f32.mrb[31].mxu0  ;;  %v1374_v53 = vadd.f32 %v1372_v49, %v1365_v45  ;;  %v5099_v45 = vld [vmem:[%s6727_s14 + $0xa4] ss:$16 sps:$4 sm:$0xff]   ;;  %v5097_v49 = vld [vmem:[%s6727_s14 + $0xa0] ss:$16 sps:$4 sm:$0xff]   ;;  %v5136_v44 = vld [vmem:[%s6728_s15 + $0xe8] sm:$0xff]  }
 0x7d7   :  { %v5102_v47 = vld [vmem:[%s6727_s14 + $0xac] ss:$16 sps:$4 sm:$0xff]   ;;  %1822 = vmatprep.subr.bf16.mxu0 %v5099_v45 }
 0x7d8   :  { %v5138_v45 = vld [vmem:[%s6728_s15 + $0xa8] sm:$0xff]  }
 0x7d9   :  { %1823 = vmatpush1.bf16.msra.mxu0 %v5097_v49  ;;  %v5140_v49 = vld [vmem:[%s6728_s15 + $0xf0] sm:$0xff]  }
 0x84c   :  { %v1428_v52 = vpop.f32.mrb[28].mxu1 }
 0x84d   :  { %v1435_v54 = vadd.f32 %v1428_v52, %v1373_v50  ;;  %v4875_v55 = vpop.f32.mrb[29].mxu1  ;;  %v5100_v50 = vld [vmem:[%s6727_s14 + $0xa8] ss:$16 sps:$4 sm:$0xff]   ;;  %v5105_v52 = vld [vmem:[%s6727_s14 + $0xc4] ss:$16 sps:$4 sm:$0xff]  }
 0x84e   :  { %v1431_v56 = vpop.f32.mrb[30].mxu1  ;;  %v1490_v46 = vpop.f32.mrb[32].mxu0  ;;  %v5106_v55 = vld [vmem:[%s6727_s14 + $0xc8] ss:$16 sps:$4 sm:$0xff]   ;;  %1824 = vmatprep.subr.bf16.mxu0 %v5105_v52  ;;  %v5142_v52 = vld [vmem:[%s6728_s15 + $0xb0] sm:$0xff]  }
 0x84f   :  { %v1436_v57 = vadd.f32 %v1431_v56, %v1374_v53  ;;  %v1497_v58 = vadd.f32 %v1490_v46, %v1435_v54  ;;  %v4876_v60 = vpop.f32.mrb[31].mxu1  ;;  %v4883_v61 = vpop.f32.mrb[33].mxu0  ;;  %v5108_v53 = vld [vmem:[%s6727_s14 + $0xcc] ss:$16 sps:$4 sm:$0xff]   ;;  %v5103_v54 = vld [vmem:[%s6727_s14 + $0xc0] ss:$16 sps:$4 sm:$0xff]  }
 0x850   :  { %v1493_v62 = vpop.f32.mrb[34].mxu0  ;;  %v5111_v56 = vld [vmem:[%s6727_s14 + $0xe4] ss:$16 sps:$4 sm:$0xff]   ;;  %v5114_v46 = vld [vmem:[%s6727_s14 + $0xec] ss:$16 sps:$4 sm:$0xff]   ;;  %1825 = vmatpush1.bf16.msra.mxu0 %v5103_v54 }
 0x851   :  { %v1498_v63 = vadd.f32 %v1493_v62, %v1436_v57  ;;  %v4884_v0 = vpop.f32.mrb[35].mxu0  ;;  %v5109_v57 = vld [vmem:[%s6727_s14 + $0xe0] ss:$16 sps:$4 sm:$0xff]   ;;  %1826 = vmatprep.subr.bf16.mxu0 %v5111_v56  ;;  %v5144_v54 = vld [vmem:[%s6728_s15 + $0xf8] sm:$0xff]  }
 0x852   :  { %v5146_v56 = vld [vmem:[%s6728_s15 + $0xb8] sm:$0xff]  }
 0x854   :  { %1827 = vmatpush1.bf16.msra.mxu0 %v5109_v57 }
 0x855   :  { %4606 = vmatprep.subr.bf16.mxu0 %v5115_v17 }
 0x883   :  { %v1552_v22 = vpop.f32.mrb[32].mxu1 }
 0x884   :  { %v1559_v2 = vadd.f32 %v1552_v22, %v1497_v58  ;;  %v4891_v4 = vpop.f32.mrb[33].mxu1  ;;  %v5112_v58 = vld [vmem:[%s6727_s14 + $0xe8] ss:$16 sps:$4 sm:$0xff]  }
 0x885   :  { %v1555_v6 = vpop.f32.mrb[34].mxu1 }
 0x886   :  { %v5898_v7 = vadd.f32 %v1559_v2, %v5600_v48  ;;  %v1560_v8 = vadd.f32 %v1555_v6, %v1498_v63  ;;  %v4892_v9 = vpop.f32.mrb[35].mxu1  ;;  %v5070_v48 = vld [vmem:[%s6727_s14 + $0x8] ss:$16 sps:$4 sm:$0xff]   ;;  %v1588_v6 = vrot.slane %v5711_v59, %v5591_v34  ;;  %v5118_v59 = vld [vmem:[%s6728_s15 + $0x80] sm:$0xff]  }
 0x888   :  { %v5901_v10 = vadd.f32 %v5654_v21, %v1560_v8  ;;  %1563 = vadd.xlane.f32.xlu1 %v5898_v7  ;;  %v5072_v21 = vld [vmem:[%s6727_s14 + $0xc] ss:$16 sps:$4 sm:$0xff]  }
 0x889   :  { %1855 = vmatprep.subr.bf16.mxu1 %v5072_v21 }
 0x88a   :  { %1565 = vadd.xlane.f32.xlu0 %v5901_v10  ;;  %1856 = vmatpush1.bf16.msra.mxu1 %v5070_v48 }
 0x88b   :  { %1857 = vmatprep.subr.bf16.mxu1 %v5078_v14 }
 0x88e   :  { %1858 = vmatpush1.bf16.msra.mxu1 %v5076_v18  ;;  %v5116_v18 = vld [vmem:[%s6728_s15 + $0xc0] sm:$0xff]  }
 0x88f   :  { %1859 = vmatprep.subr.bf16.mxu1 %v5084_v32  ;;  %v5127_v32 = vld [vmem:[%s6728_s15 + $0x58] sm:$0xff]  }
 0x892   :  { %1860 = vmatpush1.bf16.msra.mxu1 %v5082_v35  ;;  %v5129_v35 = vld [vmem:[%s6728_s15 + $0x18] sm:$0xff]  }
 0x893   :  { %1861 = vmatprep.subr.bf16.mxu1 %v5090_v37  ;;  %v5131_v37 = vld [vmem:[%s6728_s15 + $0x60] sm:$0xff]  }
 0x896   :  { %1862 = vmatpush1.bf16.msra.mxu1 %v5088_v39  ;;  %v5133_v39 = vld [vmem:[%s6728_s15 + $0x20] sm:$0xff]  }
 0x897   :  { %1863 = vmatprep.subr.bf16.mxu1 %v5096_v43  ;;  %v5135_v43 = vld [vmem:[%s6728_s15 + $0x68] sm:$0xff]  }
 0x89a   :  { %1864 = vmatpush1.bf16.msra.mxu1 %v5094_v41  ;;  %v5137_v41 = vld [vmem:[%s6728_s15 + $0x28] sm:$0xff]  }
 0x89b   :  { %1865 = vmatprep.subr.bf16.mxu1 %v5102_v47  ;;  %v5139_v47 = vld [vmem:[%s6728_s15 + $0x70] sm:$0xff]  }
 0x89e   :  { %1866 = vmatpush1.bf16.msra.mxu1 %v5100_v50  ;;  %v5141_v50 = vld [vmem:[%s6728_s15 + $0x30] sm:$0xff]  }
 0x89f   :  { %1867 = vmatprep.subr.bf16.mxu1 %v5108_v53  ;;  %v5143_v53 = vld [vmem:[%s6728_s15 + $0x78] sm:$0xff]  }
 0x8a2   :  { %1868 = vmatpush1.bf16.msra.mxu1 %v5106_v55  ;;  %v5145_v55 = vld [vmem:[%s6728_s15 + $0x38] sm:$0xff]  }
 0x8a3   :  { %1869 = vmatprep.subr.bf16.mxu1 %v5114_v46  ;;  %v1630_v46 = vld [vmem:[%s6724_s11] sm:$0xf] }
 0x8a4   :  { %v1635_v57 = vrot.slane %v1630_v46, %v5581_v24 }
 0x8a6   :  { %1870 = vmatpush1.bf16.msra.mxu1 %v5112_v58  ;;  %v1643_v58 = vrot.slane %v1630_v46, %v5591_v34 }
 0x8a7   :  { %4628 = vmatprep.subr.bf16.mxu1 %v5116_v18 }
 0x915   :  { %v1564_v19 = vpop.xlane.xlu1 %1563 }
 0x916   :  { %v1567_v20 = vmul.f32 0.0078125, %v1564_v19  ;;  %v5117_v19 = vld [vmem:[%s6728_s15] sm:$0xff]  }
 0x917   :  { %v1566_v26 = vpop.xlane.xlu0 %1565 }
 0x918   :  { %v5930_v27 = vsub.f32 %v5898_v7, %v1567_v20  ;;  %v1568_v28 = vmul.f32 0.0078125, %v1566_v26  ;;  %v5119_v20 = vld [vmem:[%s6728_s15 + $0x48] sm:$0xff]  }
 0x919   :  { %v5120_v26 = vld [vmem:[%s6728_s15 + $0xc8] sm:$0xff]  }
 0x91a   :  { %v5933_v29 = vsub.f32 %v5901_v10, %v1568_v28  ;;  %v1571_v30 = vmul.f32 %v5930_v27, %v5930_v27  ;;  %v5122_v28 = vld [vmem:[%s6728_s15 + $0x88] sm:$0xff]  }
 0x91c   :  { %1573 = vadd.xlane.f32.xlu0 %v1571_v30  ;;  %v1572_v25 = vmul.f32 %v5933_v29, %v5933_v29  ;;  %v5124_v30 = vld [vmem:[%s6728_s15 + $0xd0] sm:$0xff]  }
 0x920   :  { %1575 = vadd.xlane.f32.xlu0 %v1572_v25  ;;  %v5125_v25 = vld [vmem:[%s6728_s15 + $0x10] sm:$0xff]  }
 0x9a9   :  { %v1574_v60 = vpop.xlane.xlu0 %1573 }
 0x9aa   :  { %v1577_v61 = vmul.f32 0.0078125, %v1574_v60  ;;  %v1639_v60 = vrot.slane %v1630_v46, %v5645_v15 }
 0x9ac   :  { %v1579_v62 = vadd.f32 1e-12, %v1577_v61  ;;  %v1647_v61 = vrot.slane %v1630_v46, %v5648_v16 }
 0x9ad   :  { %v1576_v63 = vpop.xlane.xlu0 %1575 }
 0x9ae   :  { %5307 = vrsqrt.f32 %v1579_v62  ;;  %v1578_v0 = vmul.f32 0.0078125, %v1576_v63 }
 0x9b0   :  { %v1580_v22 = vadd.f32 1e-12, %v1578_v0 }
 0x9b2   :  { %5309 = vrsqrt.f32 %v1580_v22 }
 0x9b8   :  { %v5308_v2 = vpop.eup %5307 }
 0x9b9   :  { %v1583_v4 = vmul.f32 %v5308_v2, %v5930_v27  ;;  %v5121_v27 = vld [vmem:[%s6728_s15 + $0x8] sm:$0xff]  }
 0x9bb   :  { %v1589_v11 = vmul.f32 %v1588_v6, %v1583_v4 }
 0x9bc   :  { %v5310_v8 = vpop.eup %5309 }
 0x9bd   :  { %v1584_v9 = vmul.f32 %v5310_v8, %v5933_v29  ;;  %v1595_v21 = vadd.f32 %v1594_v12, %v1589_v11  ;;  %v5123_v29 = vld [vmem:[%s6728_s15 + $0x50] sm:$0xff]  }
 0x9bf   :  { %v1590_v48 = vmul.f32 %v1588_v6, %v1584_v9 }
 0x9c1   :  { %v1596_v13 = vadd.f32 %v1594_v12, %v1590_v48 }
 0x9c3   :  { %v1597_v14 = vpack.c.bf16 %v1596_v13, %v1595_v21 }
 0x9c5   :  { %1845 = vmatmul.mubr.bf16.vlgmr.msra.gmra.mrb[36].mxu0 %v1597_v14  ;;  %1888 = vmatmul.mubr.bf16.vlgmr.msra.gmra.mrb[36].mxu1 %v1597_v14 }
 0x9c6   :  { %4607 = vmatpush3.bf16.msra.mxu0 %v5117_v19  ;;  %4629 = vmatpush3.bf16.msra.mxu1 %v5118_v59 }
 0x9c7   :  { %4608 = vmatprep.subr.bf16.mxu0 %v5119_v20  ;;  %4630 = vmatprep.subr.bf16.mxu1 %v5120_v26 }
 0x9ca   :  { %4609 = vmatpush3.bf16.msra.mxu0 %v5121_v27  ;;  %4631 = vmatpush3.bf16.msra.mxu1 %v5122_v28 }
 0x9cb   :  { %4610 = vmatprep.subr.bf16.mxu0 %v5123_v29  ;;  %4632 = vmatprep.subr.bf16.mxu1 %v5124_v30 }
 0x9ce   :  { %4611 = vmatpush3.bf16.msra.mxu0 %v5125_v25  ;;  %4633 = vmatpush3.bf16.msra.mxu1 %v5126_v31 }
 0x9cf   :  { %4612 = vmatprep.subr.bf16.mxu0 %v5127_v32  ;;  %4634 = vmatprep.subr.bf16.mxu1 %v5128_v33 }
 0x9d2   :  { %4613 = vmatpush3.bf16.msra.mxu0 %v5129_v35  ;;  %4635 = vmatpush3.bf16.msra.mxu1 %v5130_v36 }
 0x9d3   :  { %4614 = vmatprep.subr.bf16.mxu0 %v5131_v37  ;;  %4636 = vmatprep.subr.bf16.mxu1 %v5132_v38 }
 0x9d6   :  { %4615 = vmatpush3.bf16.msra.mxu0 %v5133_v39  ;;  %4637 = vmatpush3.bf16.msra.mxu1 %v5134_v42 }
 0x9d7   :  { %4616 = vmatprep.subr.bf16.mxu0 %v5135_v43  ;;  %4638 = vmatprep.subr.bf16.mxu1 %v5136_v44 }
 0x9da   :  { %4617 = vmatpush3.bf16.msra.mxu0 %v5137_v41  ;;  %4639 = vmatpush3.bf16.msra.mxu1 %v5138_v45 }
 0x9db   :  { %4618 = vmatprep.subr.bf16.mxu0 %v5139_v47  ;;  %4640 = vmatprep.subr.bf16.mxu1 %v5140_v49 }
 0x9de   :  { %4619 = vmatpush3.bf16.msra.mxu0 %v5141_v50  ;;  %4641 = vmatpush3.bf16.msra.mxu1 %v5142_v52 }
 0x9df   :  { %4620 = vmatprep.subr.bf16.mxu0 %v5143_v53  ;;  %4642 = vmatprep.subr.bf16.mxu1 %v5144_v54 }
 0x9e2   :  { %4621 = vmatpush3.bf16.msra.mxu0 %v5145_v55  ;;  %4643 = vmatpush3.bf16.msra.mxu1 %v5146_v56 }
 0x9e3   :  { %4893 = vmatprep.subr.bf16.mxu1 %v5412_v1 }
 0xa98   :  { %v1846_v62 = vpop.f32.mrb[36].mxu0  ;;  %v1889_v63 = vpop.f32.mrb[36].mxu1 }
 0xa99   :  { %v6121_v0 = vadd.f32 %v1846_v62, %v1635_v57  ;;  %v6123_v22 = vadd.f32 %v1889_v63, %v1643_v58  ;;  %v1848_v2 = vpop.f32.mrb[37].mxu0  ;;  %v1891_v4 = vpop.f32.mrb[37].mxu1 }
 0xa9a   :  { %v6125_v6 = vadd.f32 %v1848_v2, %v1639_v60  ;;  %v6127_v8 = vadd.f32 %v1891_v4, %v1647_v61  ;;  %v1850_v9 = vpop.f32.mrb[38].mxu0  ;;  %v1893_v11 = vpop.f32.mrb[38].mxu1 }
 0xa9b   :  { %v1898_v12 = vmul.f32 %v6121_v0, %v6121_v0  ;;  %v1900_v48 = vmul.f32 %v6123_v22, %v6123_v22  ;;  %v6133_v21 = vadd.f32 %v1850_v9, %v1635_v57  ;;  %v6135_v13 = vadd.f32 %v1893_v11, %v1643_v58  ;;  %v1852_v14 = vpop.f32.mrb[39].mxu0  ;;  %v1895_v17 = vpop.f32.mrb[39].mxu1 }
 0xa9c   :  { %v1899_v18 = vmul.f32 %v6125_v6, %v6125_v6  ;;  %v1901_v19 = vmul.f32 %v6127_v8, %v6127_v8  ;;  %v6141_v59 = vadd.f32 %v1852_v14, %v1639_v60  ;;  %v6143_v20 = vadd.f32 %v1895_v17, %v1647_v61 }
 0xa9d   :  { %v1906_v26 = vmul.f32 %v1898_v12, %v6121_v0  ;;  %v1908_v27 = vmul.f32 %v1900_v48, %v6123_v22  ;;  %v1902_v28 = vmul.f32 %v6133_v21, %v6133_v21  ;;  %v1904_v29 = vmul.f32 %v6135_v13, %v6135_v13 }
 0xa9e   :  { %v1907_v30 = vmul.f32 %v1899_v18, %v6125_v6  ;;  %v1909_v25 = vmul.f32 %v1901_v19, %v6127_v8  ;;  %v1903_v31 = vmul.f32 %v6141_v59, %v6141_v59  ;;  %v1905_v32 = vmul.f32 %v6143_v20, %v6143_v20 }
 0xa9f   :  { %v1914_v33 = vmul.f32 0.044715, %v1906_v26  ;;  %v1916_v35 = vmul.f32 0.044715, %v1908_v27  ;;  %v1910_v36 = vmul.f32 %v1902_v28, %v6133_v21  ;;  %v1912_v37 = vmul.f32 %v1904_v29, %v6135_v13 }
 0xaa0   :  { %v1915_v38 = vmul.f32 0.044715, %v1907_v30  ;;  %v1917_v39 = vmul.f32 0.044715, %v1909_v25  ;;  %v1911_v42 = vmul.f32 %v1903_v31, %v6141_v59  ;;  %v1913_v43 = vmul.f32 %v1905_v32, %v6143_v20 }
 0xaa1   :  { %v1922_v44 = vadd.f32 %v1914_v33, %v6121_v0  ;;  %v1924_v41 = vadd.f32 %v1916_v35, %v6123_v22  ;;  %v1918_v45 = vmul.f32 0.044715, %v1910_v36  ;;  %v1920_v47 = vmul.f32 0.044715, %v1912_v37 }
 0xaa2   :  { %v1923_v49 = vadd.f32 %v1915_v38, %v6125_v6  ;;  %v1925_v50 = vadd.f32 %v1917_v39, %v6127_v8  ;;  %v1919_v52 = vmul.f32 0.044715, %v1911_v42  ;;  %v1921_v53 = vmul.f32 0.044715, %v1913_v43 }
 0xaa3   :  { %v1930_v54 = vmul.f32 0.7978846, %v1922_v44  ;;  %v1932_v55 = vmul.f32 0.7978846, %v1924_v41  ;;  %v1926_v56 = vadd.f32 %v1918_v45, %v6133_v21  ;;  %v1928_v46 = vadd.f32 %v1920_v47, %v6135_v13 }
 0xaa4   :  { %v1931_v57 = vmul.f32 0.7978846, %v1923_v49  ;;  %v1933_v58 = vmul.f32 0.7978846, %v1925_v50  ;;  %v1927_v60 = vadd.f32 %v1919_v52, %v6141_v59  ;;  %v1929_v61 = vadd.f32 %v1921_v53, %v6143_v20 }
 0xaa5   :  { %5311 = vtanh.f32 %v1930_v54  ;;  %v1934_v62 = vmul.f32 0.7978846, %v1926_v56  ;;  %v1936_v63 = vmul.f32 0.7978846, %v1928_v46 }
 0xaa6   :  { %5313 = vtanh.f32 %v1932_v55  ;;  %v1935_v2 = vmul.f32 0.7978846, %v1927_v60  ;;  %v1937_v4 = vmul.f32 0.7978846, %v1929_v61 }
 0xaa7   :  { %5315 = vtanh.f32 %v1931_v57 }
 0xaa8   :  { %5317 = vtanh.f32 %v1933_v58 }
 0xaa9   :  { %5319 = vtanh.f32 %v1934_v62 }
 0xaaa   :  { %5321 = vtanh.f32 %v1936_v63 }
 0xaab   :  { %5323 = vtanh.f32 %v1935_v2  ;;  %v5385_v2 = vld [vmem:[%s6722_s9] sm:$0xff] }
 0xaac   :  { %5325 = vtanh.f32 %v1937_v4 }
 0xaaf   :  { %v5312_v9 = vpop.eup %5311 }
 0xab0   :  { %v5314_v11 = vpop.eup %5313  ;;  %v1946_v12 = vadd.f32 1.0, %v5312_v9 }
 0xab1   :  { %v5316_v48 = vpop.eup %5315  ;;  %v1948_v14 = vadd.f32 1.0, %v5314_v11 }
 0xab2   :  { %v5318_v17 = vpop.eup %5317  ;;  %v1947_v18 = vadd.f32 1.0, %v5316_v48  ;;  %v1954_v28 = vmul.f32 0.5, %v1946_v12 }
 0xab3   :  { %v5320_v19 = vpop.eup %5319  ;;  %v1949_v26 = vadd.f32 1.0, %v5318_v17  ;;  %v1956_v25 = vmul.f32 0.5, %v1948_v14  ;;  %v5147_v17 = vld [vmem:[%s6725_s12 + $0xc0] ss:$12 sps:$4 sm:$0xff]  }
 0xab4   :  { %v5322_v27 = vpop.eup %5321  ;;  %v1950_v29 = vadd.f32 1.0, %v5320_v19  ;;  %v1955_v36 = vmul.f32 0.5, %v1947_v18  ;;  %v1962_v42 = vmul.f32 %v1954_v28, %v6121_v0  ;;  %v5149_v18 = vld [vmem:[%s6725_s12 + $0xc4] ss:$12 sps:$4 sm:$0xff]   ;;  %v5154_v19 = vld [vmem:[%s6725_s12 + $0xe0] ss:$12 sps:$4 sm:$0xff]  }
 0xab5   :  { %v5324_v30 = vpop.eup %5323  ;;  %v1952_v31 = vadd.f32 1.0, %v5322_v27  ;;  %v1957_v39 = vmul.f32 0.5, %v1949_v26  ;;  %v1964_v41 = vmul.f32 %v1956_v25, %v6123_v22  ;;  %2536 = vmatprep.subr.bf16.mxu0 %v5149_v18  ;;  %v5151_v26 = vld [vmem:[%s6725_s12 + $0xd8] ss:$12 sps:$4 sm:$0xff]  }
 0xab6   :  { %v5326_v32 = vpop.eup %5325  ;;  %v1958_v33 = vmul.f32 0.5, %v1950_v29  ;;  %v1951_v35 = vadd.f32 1.0, %v5324_v30  ;;  %v1963_v49 = vmul.f32 %v1955_v36, %v6125_v6  ;;  %v5155_v36 = vld [vmem:[%s6725_s12 + $0xf0] ss:$12 sps:$4 sm:$0xff]  }
 0xab7   :  { %v1960_v37 = vmul.f32 0.5, %v1952_v31  ;;  %v1953_v38 = vadd.f32 1.0, %v5326_v32  ;;  %v1965_v53 = vmul.f32 %v1957_v39, %v6127_v8  ;;  %v5159_v39 = vld [vmem:[%s6725_s12 + $0x108] ss:$12 sps:$4 sm:$0xff]  }
 0xab8   :  { %v1966_v43 = vmul.f32 %v1958_v33, %v6133_v21  ;;  %v1959_v44 = vmul.f32 0.5, %v1951_v35  ;;  %v5157_v35 = vld [vmem:[%s6725_s12 + $0xf4] ss:$12 sps:$4 sm:$0xff]  }
 0xab9   :  { %v1968_v45 = vmul.f32 %v1960_v37, %v6135_v13  ;;  %v1961_v47 = vmul.f32 0.5, %v1953_v38  ;;  %v6181_v13 = vsub.s32 5, %v5578_v23  ;;  %v5158_v37 = vld [vmem:[%s6725_s12 + $0xf8] ss:$12 sps:$4 sm:$0xff]  }
 0xaba   :  { %v1967_v50 = vmul.f32 %v1959_v44, %v6141_v59  ;;  %v1970_v52 = vpack.c.bf16 %v1966_v43, %v1962_v42  ;;  %v5161_v38 = vld [vmem:[%s6725_s12 + $0x10c] ss:$12 sps:$4 sm:$0xff]   ;;  %v5162_v42 = vld [vmem:[%s6725_s12 + $0x110] ss:$12 sps:$4 sm:$0xff]  }
 0xabb   :  { %v1969_v54 = vmul.f32 %v1961_v47, %v6143_v20  ;;  %v1972_v55 = vpack.c.bf16 %v1968_v45, %v1964_v41  ;;  %v2317_v4 = vrot.slane %v5385_v2, %v6181_v13  ;;  %v5165_v43 = vld [vmem:[%s6725_s12 + $0x124] ss:$12 sps:$4 sm:$0xff]   ;;  %v5163_v44 = vld [vmem:[%s6725_s12 + $0x120] ss:$12 sps:$4 sm:$0xff]   ;;  %v5166_v41 = vld [vmem:[%s6725_s12 + $0x128] ss:$12 sps:$4 sm:$0xff]  }
 0xabc   :  { %v1971_v56 = vpack.c.bf16 %v1967_v50, %v1963_v49  ;;  %v5169_v45 = vld [vmem:[%s6725_s12 + $0x13c] ss:$12 sps:$4 sm:$0xff]   ;;  %v5167_v47 = vld [vmem:[%s6725_s12 + $0x138] ss:$12 sps:$4 sm:$0xff]   ;;  %v5170_v49 = vld [vmem:[%s6725_s12 + $0x140] ss:$12 sps:$4 sm:$0xff]  }
 0xabd   :  { %v1973_v0 = vpack.c.bf16 %v1969_v54, %v1965_v53  ;;  %v5173_v50 = vld [vmem:[%s6725_s12 + $0x154] ss:$12 sps:$4 sm:$0xff]   ;;  %v5174_v53 = vld [vmem:[%s6725_s12 + $0x158] ss:$12 sps:$4 sm:$0xff]  }
 0xabe   :  { %2262 = vmatprep.mubr.bf16.mxu0 %v1971_v56  ;;  %v5177_v54 = vld [vmem:[%s6725_s12 + $0x16c] ss:$12 sps:$4 sm:$0xff]   ;;  %v5178_v56 = vld [vmem:[%s6725_s12 + $0x170] ss:$12 sps:$4 sm:$0xff]  }
 0xabf   :  { %2303 = vmatprep.mubr.bf16.mxu1 %v1973_v0  ;;  %2263 = vmatmul.mubr.bf16.vlgmr.msra.gmra.mrb[40].mxu0 %v1970_v52  ;;  %v5171_v52 = vld [vmem:[%s6725_s12 + $0x150] ss:$12 sps:$4 sm:$0xff]  }
 0xac0   :  { %2304 = vmatmul.mubr.bf16.vlgmr.msra.gmra.mrb[40].mxu1 %v1972_v55  ;;  %2568 = vmatprep.mubr.bf16.mxu0 %v5415_v51  ;;  %v5175_v55 = vld [vmem:[%s6725_s12 + $0x168] ss:$12 sps:$4 sm:$0xff]  }
 0xac1   :  { %4909 = vmatprep.mubr.msk.bf16.mxu1 %vm5413_vm0, %v5412_v1  ;;  %2537 = vmatpush1.bf16.msra.mxu0 %v5147_v17 }
 0xb92   :  { %v4622_v22 = vpop.f32.mrb[40].mxu0 }
 0xb93   :  { %v4644_v6 = vpop.f32.mrb[40].mxu1  ;;  %v4623_v21 = vpop.f32.mrb[41].mxu0 }
 0xb94   :  { %v4624_v8 = vadd.f32 %v4623_v21, %v4622_v22  ;;  %v4645_v59 = vpop.f32.mrb[41].mxu1  ;;  %v4625_v20 = vpop.f32.mrb[42].mxu0 }
 0xb95   :  { %v4646_v46 = vadd.f32 %v4645_v59, %v4644_v6  ;;  %v4647_v57 = vpop.f32.mrb[42].mxu1  ;;  %v4626_v58 = vpop.f32.mrb[43].mxu0 }
 0xb96   :  { %v4627_v60 = vadd.f32 %v4626_v58, %v4625_v20  ;;  %v4648_v61 = vpop.f32.mrb[43].mxu1  ;;  %v6281_v20 = vld [vmem:[%s6722_s9 + $0x8] sm:$0xff] }
 0xb97   :  { %v2306_v62 = vadd.f32 %v4646_v46, %v4624_v8  ;;  %v4649_v63 = vadd.f32 %v4648_v61, %v4647_v57  ;;  %v2347_v46 = vrot.slane %v6281_v20, %v5581_v24 }
 0xb99   :  { %v2312_v9 = vadd.f32 %v2306_v62, %v5898_v7  ;;  %v2309_v11 = vadd.f32 %v4649_v63, %v4627_v60  ;;  %v5150_v7 = vld [vmem:[%s6725_s12 + $0xc8] ss:$12 sps:$4 sm:$0xff]   ;;  %v2353_v63 = vrot.slane %v6281_v20, %v5645_v15 }
 0xb9a   :  { %4894 = vmatpush3.bf16.msra.mxu1 %v5150_v7 }
 0xb9b   :  { %v2313_v12 = vadd.f32 %v2309_v11, %v5901_v10  ;;  %v6189_v48 = vadd.f32 %v2317_v4, %v2312_v9  ;;  %v5153_v10 = vld [vmem:[%s6725_s12 + $0xdc] ss:$12 sps:$4 sm:$0xff]   ;;  %4895 = vmatprep.subr.bf16.mxu1 %v5412_v1 }
 0xb9c   :  { %2538 = vmatprep.subr.bf16.mxu0 %v5153_v10 }
 0xb9d   :  { %2322 = vadd.xlane.f32.xlu1 %v6189_v48  ;;  %v6192_v14 = vadd.f32 %v2317_v4, %v2313_v12  ;;  %2539 = vmatpush1.bf16.msra.mxu0 %v5151_v26  ;;  %v4321_v12 = vld [vmem:[%s6723_s10 + $0x3] sm:$0x7] }
 0xb9e   :  { %4896 = vmatpush3.bf16.msra.mxu1 %v5154_v19  ;;  %2540 = vmatprep.subr.bf16.mxu0 %v5157_v35  ;;  %v2396_v17 = vrot.slane %v4321_v12, %v5581_v24  ;;  %v2404_v18 = vrot.slane %v4321_v12, %v5591_v34  ;;  %v2400_v19 = vrot.slane %v4321_v12, %v5645_v15 }
 0xb9f   :  { %2324 = vadd.xlane.f32.xlu0 %v6192_v14  ;;  %4897 = vmatprep.subr.bf16.mxu1 %v5412_v1 }
 0xba1   :  { %2541 = vmatpush1.bf16.msra.mxu0 %v5155_v36 }
 0xba2   :  { %4898 = vmatpush3.bf16.msra.mxu1 %v5158_v37  ;;  %2542 = vmatprep.subr.bf16.mxu0 %v5161_v38 }
 0xba3   :  { %4899 = vmatprep.subr.bf16.mxu1 %v5412_v1 }
 0xba5   :  { %2543 = vmatpush1.bf16.msra.mxu0 %v5159_v39 }
 0xba6   :  { %4900 = vmatpush3.bf16.msra.mxu1 %v5162_v42  ;;  %2544 = vmatprep.subr.bf16.mxu0 %v5165_v43 }
 0xba7   :  { %4901 = vmatprep.subr.bf16.mxu1 %v5412_v1 }
 0xba9   :  { %2545 = vmatpush1.bf16.msra.mxu0 %v5163_v44 }
 0xbaa   :  { %4902 = vmatpush3.bf16.msra.mxu1 %v5166_v41  ;;  %2546 = vmatprep.subr.bf16.mxu0 %v5169_v45 }
 0xbab   :  { %4903 = vmatprep.subr.bf16.mxu1 %v5412_v1 }
 0xbad   :  { %2547 = vmatpush1.bf16.msra.mxu0 %v5167_v47 }
 0xbae   :  { %4904 = vmatpush3.bf16.msra.mxu1 %v5170_v49  ;;  %2548 = vmatprep.subr.bf16.mxu0 %v5173_v50 }
 0xbaf   :  { %4905 = vmatprep.subr.bf16.mxu1 %v5412_v1 }
 0xbb1   :  { %2549 = vmatpush1.bf16.msra.mxu0 %v5171_v52 }
 0xbb2   :  { %4906 = vmatpush3.bf16.msra.mxu1 %v5174_v53  ;;  %2550 = vmatprep.subr.bf16.mxu0 %v5177_v54 }
 0xbb3   :  { %4907 = vmatprep.subr.bf16.mxu1 %v5412_v1 }
 0xbb5   :  { %2551 = vmatpush1.bf16.msra.mxu0 %v5175_v55 }
 0xbb6   :  { %4908 = vmatpush3.bf16.msra.mxu1 %v5178_v56  ;;  %4913 = vmatprep.subr.bf16.mxu0 %v5412_v1 }
 0xbb7   :  { %4919 = vmatprep.subr.bf16.mxu1 %v5412_v1 }
 0xc2a   :  { %v2323_v27 = vpop.xlane.xlu1 %2322 }
 0xc2b   :  { %v2326_v28 = vmul.f32 0.0078125, %v2323_v27 }
 0xc2c   :  { %v2325_v29 = vpop.xlane.xlu0 %2324 }
 0xc2d   :  { %v2328_v30 = vsub.f32 %v6189_v48, %v2326_v28  ;;  %v2327_v25 = vmul.f32 0.0078125, %v2325_v29 }
 0xc2f   :  { %v2329_v31 = vsub.f32 %v6192_v14, %v2327_v25  ;;  %v2330_v32 = vmul.f32 %v2328_v30, %v2328_v30 }
 0xc31   :  { %2332 = vadd.xlane.f32.xlu1 %v2330_v32  ;;  %v2331_v33 = vmul.f32 %v2329_v31, %v2329_v31 }
 0xc33   :  { %2334 = vadd.xlane.f32.xlu0 %v2331_v33 }
 0xcbe   :  { %v2333_v0 = vpop.xlane.xlu1 %2332 }
 0xcbf   :  { %v2336_v22 = vmul.f32 0.0078125, %v2333_v0 }
 0xcc0   :  { %v2335_v6 = vpop.xlane.xlu0 %2334 }
 0xcc1   :  { %v2338_v21 = vadd.f32 1e-12, %v2336_v22  ;;  %v2337_v8 = vmul.f32 0.0078125, %v2335_v6 }
 0xcc3   :  { %5327 = vrsqrt.f32 %v2338_v21  ;;  %v2339_v59 = vadd.f32 1e-12, %v2337_v8 }
 0xcc5   :  { %5329 = vrsqrt.f32 %v2339_v59 }
 0xccd   :  { %v5328_v57 = vpop.eup %5327 }
 0xcce   :  { %v2342_v58 = vmul.f32 %v5328_v57, %v2328_v30 }
 0xccf   :  { %v5330_v60 = vpop.eup %5329 }
 0xcd0   :  { %v2343_v61 = vmul.f32 %v5330_v60, %v2329_v31  ;;  %v2348_v62 = vmul.f32 %v2347_v46, %v2342_v58 }
 0xcd2   :  { %v2349_v2 = vmul.f32 %v2347_v46, %v2343_v61  ;;  %v2354_v4 = vadd.f32 %v2353_v63, %v2348_v62 }
 0xcd4   :  { %v2355_v9 = vadd.f32 %v2353_v63, %v2349_v2 }
 0xcd6   :  { %v2356_v11 = vpack.c.bf16 %v2355_v9, %v2354_v4 }
 0xcd8   :  { %2569 = vmatmul.mubr.bf16.vlgmr.msra.gmra.mrb[44].mxu0 %v2356_v11  ;;  %4910 = vmatmul.mubr.bf16.vlgmr.msra.gmra.mrb[44].mxu1 %v2356_v11 }
 0xcd9   :  { %4915 = vmatprep.mubr.msk.bf16.mxu0 %vm5413_vm0, %v5412_v1  ;;  %4921 = vmatprep.mubr.msk.bf16.mxu1 %vm5413_vm0, %v5412_v1 }
 0xdab   :  { %v2570_v7 = vpop.f32.mrb[44].mxu0  ;;  %v2613_v10 = vpop.f32.mrb[44].mxu1 }
 0xdac   :  { %v2571_v26 = vadd.f32 %v2570_v7, %v2396_v17  ;;  %v2572_v27 = vpop.f32.mrb[45].mxu0  ;;  %v4911_v28 = vpop.f32.mrb[45].mxu1  ;;  %v2614_v25 = vadd.f32 %v2613_v10, %v2404_v18 }
 0xdad   :  { %v2574_v29 = vpop.f32.mrb[46].mxu0  ;;  %v2616_v30 = vpop.f32.mrb[46].mxu1  ;;  %v2573_v36 = vadd.f32 %v2572_v27, %v2400_v19 }
 0xdae   :  { %v2575_v31 = vadd.f32 %v2574_v29, %v2396_v17  ;;  %v2617_v32 = vadd.f32 %v2616_v30, %v2404_v18  ;;  %v2576_v33 = vpop.f32.mrb[47].mxu0  ;;  %v4912_v35 = vpop.f32.mrb[47].mxu1  ;;  %v2620_v38 = vmul.f32 0.17677669, %v2571_v26 }
 0xdaf   :  { %v2577_v37 = vadd.f32 %v2576_v33, %v2400_v19 }
 0xdb0   :  { %v2621_v39 = vmul.f32 0.17677669, %v2575_v31  ;;  %v6297_v42 = vpack.c.bf16 %v2617_v32, %v2614_v25 }
 0xdb1   :  { %v2623_v43 = vpack.c.bf16 %v2577_v37, %v2573_v36 }
 0xdb2   :  { %v2622_v44 = vpack.c.bf16 %v2621_v39, %v2620_v38 }
 0xdb3   :  { %2635 = vrot.lane.b32.xlu0 %v2623_v43, %s5418_s21  ;;  %2633 = vrot.lane.b32.xlu1 %v2623_v43, %s5416_s20  ;;  %v2653_v41 = vsel %vm847_vm7, %v2623_v43, 0 }
 0xdb4   :  { %4914 = vmatpush3.bf16.xpose.msra.mxu0 %v2653_v41 }
 0xdb5   :  { %4925 = vmatprep.subr.bf16.mxu0 %v5412_v1 }
 0xdb7   :  { %2630 = vrot.lane.b32.xlu0 %v2622_v44, %s5417_s7  ;;  %2626 = vrot.lane.b32.xlu1 %v2622_v44, %s5416_s20 }
 0xdbb   :  { %2637 = vrot.lane.b32.xlu1 %v2623_v43, %s5417_s7  ;;  %4916 = vmatmul.mubr.msk.bf16.vlgmr.msra.gmra.mrb[48].mxu0 %vm847_vm7, %v2622_v44 }
 0xdbc   :  { %4927 = vmatprep.mubr.msk.bf16.mxu0 %vm5413_vm0, %v5412_v1 }
 0xdbf   :  { %2628 = vrot.lane.b32.xlu1 %v2622_v44, %s5418_s21 }
 0xe25   :  { %v2636_v45 = vpop.permute.xlu0 %2635  ;;  %v2634_v47 = vpop.permute.xlu1 %2633 }
 0xe26   :  { %v2747_v49 = vsel %vm847_vm7, %v2636_v45, 0  ;;  %v2700_v50 = vsel %vm847_vm7, %v2634_v47, 0 }
 0xe27   :  { %4920 = vmatpush3.bf16.xpose.msra.mxu1 %v2700_v50  ;;  %4926 = vmatpush3.bf16.xpose.msra.mxu0 %v2747_v49 }
 0xe28   :  { %4931 = vmatprep.subr.bf16.mxu1 %v5412_v1  ;;  %4937 = vmatprep.subr.bf16.mxu0 %v5412_v1 }
 0xe29   :  { %v2627_v52 = vpop.permute.xlu1 %2626  ;;  %v2631_v56 = vpop.permute.xlu0 %2630 }
 0xe2d   :  { %v2638_v53 = vpop.permute.xlu1 %2637 }
 0xe2e   :  { %v2794_v54 = vsel %vm847_vm7, %v2638_v53, 0  ;;  %4922 = vmatmul.mubr.msk.bf16.vlgmr.msra.gmra.mrb[48].mxu1 %vm847_vm7, %v2627_v52 }
 0xe2f   :  { %4932 = vmatpush3.bf16.xpose.msra.mxu1 %v2794_v54  ;;  %4933 = vmatprep.mubr.msk.bf16.mxu1 %vm5413_vm0, %v5412_v1 }
 0xe30   :  { %4943 = vmatprep.subr.bf16.mxu1 %v5412_v1 }
 0xe31   :  { %v2629_v55 = vpop.permute.xlu1 %2628 }
 0xe32   :  { %4928 = vmatmul.mubr.msk.bf16.vlgmr.msra.gmra.mrb[52].mxu0 %vm847_vm7, %v2629_v55 }
 0xe33   :  { %4938 = vmatpush3.bf16.msra.mxu0 %v6297_v42  ;;  %4939 = vmatprep.mubr.msk.bf16.mxu0 %vm5413_vm0, %v5412_v1 }
 0xe34   :  { %4949 = vmatprep.subr.bf16.mxu0 %v5412_v1 }
 0xe36   :  { %4934 = vmatmul.mubr.msk.bf16.vlgmr.msra.gmra.mrb[52].mxu1 %vm847_vm7, %v2631_v56 }
 0xe37   :  { %4945 = vmatprep.mubr.msk.bf16.mxu1 %vm5413_vm0, %v5412_v1 }
 0xe8e   :  { %v2689_v0 = vpop.f32.mrb[48].mxu0 }
 0xe8f   :  { %v2690_v22 = vadd.f32 %v2689_v0, %v5798_v3  ;;  %v4917_v6 = vpop.f32.mrb[49].mxu0 }
 0xe90   :  { %v2692_v21 = vpop.f32.mrb[50].mxu0 }
 0xe91   :  { %v2693_v8 = vadd.f32 %v2692_v21, %v5800_v5  ;;  %v4918_v59 = vpop.f32.mrb[51].mxu0  ;;  %v2837_v46 = vsel %vm1036_vm10, %v2690_v22, -inf }
 0xe92   :  { %2838 = vmax.xlane.f32.xlu1 %v2837_v46 }
 0xe93   :  { %v2840_v57 = vsel %vm1036_vm10, %v2693_v8, -inf }
 0xe94   :  { %2841 = vmax.xlane.f32.xlu0 %v2840_v57 }
 0xf01   :  { %v2736_v58 = vpop.f32.mrb[48].mxu1 }
 0xf02   :  { %v2737_v60 = vadd.f32 %v2736_v58, %v5798_v3  ;;  %v4923_v61 = vpop.f32.mrb[49].mxu1 }
 0xf03   :  { %v2739_v62 = vpop.f32.mrb[50].mxu1 }
 0xf04   :  { %v2740_v63 = vadd.f32 %v2739_v62, %v5800_v5  ;;  %v4924_v2 = vpop.f32.mrb[51].mxu1  ;;  %v2843_v4 = vsel %vm1036_vm10, %v2737_v60, -inf }
 0xf05   :  { %2844 = vmax.xlane.f32.xlu0 %v2843_v4  ;;  %v2783_v9 = vpop.f32.mrb[52].mxu0 }
 0xf06   :  { %v2784_v11 = vadd.f32 %v2783_v9, %v5798_v3  ;;  %v4929_v12 = vpop.f32.mrb[53].mxu0  ;;  %v2846_v10 = vsel %vm1036_vm10, %v2740_v63, -inf }
 0xf07   :  { %v2786_v17 = vpop.f32.mrb[54].mxu0 }
 0xf08   :  { %v2787_v18 = vadd.f32 %v2786_v17, %v5800_v5  ;;  %v4930_v7 = vpop.f32.mrb[55].mxu0  ;;  %v2849_v19 = vsel %vm1036_vm10, %v2784_v11, -inf }
 0xf09   :  { %v2830_v26 = vpop.f32.mrb[52].mxu1  ;;  %2847 = vmax.xlane.f32.xlu0 %v2846_v10  ;;  %2850 = vmax.xlane.f32.xlu1 %v2849_v19 }
 0xf0a   :  { %v2831_v27 = vadd.f32 %v2830_v26, %v5798_v3  ;;  %v4935_v28 = vpop.f32.mrb[53].mxu1  ;;  %v2852_v32 = vsel %vm1036_vm10, %v2787_v18, -inf }
 0xf0b   :  { %v2833_v29 = vpop.f32.mrb[54].mxu1 }
 0xf0c   :  { %v2834_v30 = vadd.f32 %v2833_v29, %v5800_v5  ;;  %v4936_v25 = vpop.f32.mrb[55].mxu1  ;;  %v2855_v31 = vsel %vm1036_vm10, %v2831_v27, -inf }
 0xf0d   :  { %2856 = vmax.xlane.f32.xlu1 %v2855_v31  ;;  %2853 = vmax.xlane.f32.xlu0 %v2852_v32 }
 0xf0e   :  { %v2858_v33 = vsel %vm1036_vm10, %v2834_v30, -inf }
 0xf11   :  { %2859 = vmax.xlane.f32.xlu0 %v2858_v33 }
 0xf1e   :  { %2640 = vrot.lane.b32.xlu1 %v6297_v42, %s5416_s20 }
 0xf1f   :  { %v2839_v37 = vpop.xlane.xlu1 %2838 }
 0xf20   :  { %v2861_v38 = vsub.f32 %v2690_v22, %v2839_v37 }
 0xf21   :  { %v2842_v35 = vpop.xlane.xlu0 %2841 }
 0xf22   :  { %v2862_v36 = vsub.f32 %v2693_v8, %v2842_v35  ;;  %v2869_v39 = vmul.f32 1.442695, %v2861_v38 }
 0xf24   :  { %v2871_v3 = vmul.f32 1.442695, %v2862_v36 }
 0xf26   :  { %5331 = vpow2.f32 %v2871_v3 }
 0xf27   :  { %5333 = vpow2.f32 %v2869_v39 }
 0xf30   :  { %v5332_v5 = vpop.eup %5331 }
 0xf31   :  { %v2888_v43 = vsel %vm1036_vm10, %v5332_v5, 0.0  ;;  %v5334_v44 = vpop.eup %5333 }
 0xf32   :  { %2889 = vadd.xlane.f32.xlu0 %v2888_v43  ;;  %v2885_v41 = vsel %vm1036_vm10, %v5334_v44, 0.0 }
 0xf42   :  { %2886 = vadd.xlane.f32.xlu1 %v2885_v41 }
 0xf92   :  { %v2845_v45 = vpop.xlane.xlu0 %2844 }
 0xf93   :  { %v2863_v47 = vsub.f32 %v2737_v60, %v2845_v45 }
 0xf95   :  { %v2873_v49 = vmul.f32 1.442695, %v2863_v47 }
 0xf96   :  { %v2848_v50 = vpop.xlane.xlu0 %2847  ;;  %v2851_v52 = vpop.xlane.xlu1 %2850 }
 0xf97   :  { %5335 = vpow2.f32 %v2873_v49  ;;  %v2864_v53 = vsub.f32 %v2740_v63, %v2848_v50  ;;  %v2865_v54 = vsub.f32 %v2784_v11, %v2851_v52  ;;  %v5179_v52 = vld [vmem:[%s6726_s13 + $0x40] sm:$0xff]  }
 0xf99   :  { %v2875_v55 = vmul.f32 1.442695, %v2864_v53  ;;  %v2877_v56 = vmul.f32 1.442695, %v2865_v54 }
 0xf9a   :  { %v2857_v0 = vpop.xlane.xlu1 %2856  ;;  %v2854_v22 = vpop.xlane.xlu0 %2853 }
 0xf9b   :  { %5337 = vpow2.f32 %v2875_v55  ;;  %v2867_v6 = vsub.f32 %v2831_v27, %v2857_v0  ;;  %v2866_v21 = vsub.f32 %v2787_v18, %v2854_v22  ;;  %v5181_v0 = vld [vmem:[%s6726_s13 + $0x50] sm:$0xff]  }
 0xf9c   :  { %5339 = vpow2.f32 %v2877_v56 }
 0xf9d   :  { %v2881_v8 = vmul.f32 1.442695, %v2867_v6  ;;  %v2879_v59 = vmul.f32 1.442695, %v2866_v21  ;;  %v5180_v6 = vld [vmem:[%s6726_s13 + $0x48] sm:$0xff]   ;;  %v5182_v21 = vld [vmem:[%s6726_s13 + $0x58] sm:$0xff]  }
 0xf9e   :  { %v2641_v46 = vpop.permute.xlu1 %2640  ;;  %v2860_v57 = vpop.xlane.xlu0 %2859 }
 0xf9f   :  { %5341 = vpow2.f32 %v2881_v8  ;;  %v2868_v58 = vsub.f32 %v2834_v30, %v2860_v57  ;;  %4944 = vmatpush3.bf16.msra.mxu1 %v2641_v46  ;;  %v5183_v57 = vld [vmem:[%s6726_s13 + $0x60] sm:$0xff]  }
 0xfa0   :  { %5343 = vpow2.f32 %v2879_v59  ;;  %4955 = vmatprep.subr.bf16.mxu1 %v5412_v1 }
 0xfa1   :  { %v5336_v60 = vpop.eup %5335  ;;  %v2883_v61 = vmul.f32 1.442695, %v2868_v58 }
 0xfa2   :  { %v2891_v62 = vsel %vm1036_vm10, %v5336_v60, 0.0 }
 0xfa3   :  { %5345 = vpow2.f32 %v2883_v61  ;;  %2892 = vadd.xlane.f32.xlu1 %v2891_v62  ;;  %v5184_v61 = vld [vmem:[%s6726_s13 + $0x68] sm:$0xff]  }
 0xfa5   :  { %v5338_v63 = vpop.eup %5337 }
 0xfa6   :  { %v5340_v2 = vpop.eup %5339  ;;  %v2894_v4 = vsel %vm1036_vm10, %v5338_v63, 0.0 }
 0xfa7   :  { %v2897_v9 = vsel %vm1036_vm10, %v5340_v2, 0.0  ;;  %2895 = vadd.xlane.f32.xlu0 %v2894_v4  ;;  %v5185_v4 = vld [vmem:[%s6726_s13 + $0x70] sm:$0xff]  }
 0xfa8   :  { %2898 = vadd.xlane.f32.xlu1 %v2897_v9 }
 0xfa9   :  { %v5342_v11 = vpop.eup %5341 }
 0xfaa   :  { %v5344_v12 = vpop.eup %5343  ;;  %v2903_v17 = vsel %vm1036_vm10, %v5342_v11, 0.0 }
 0xfab   :  { %v2900_v18 = vsel %vm1036_vm10, %v5344_v12, 0.0 }
 0xfac   :  { %2904 = vadd.xlane.f32.xlu1 %v2903_v17  ;;  %2901 = vadd.xlane.f32.xlu0 %v2900_v18  ;;  %v5186_v17 = vld [vmem:[%s6726_s13 + $0x78] sm:$0xff]  }
 0xfad   :  { %v5346_v7 = vpop.eup %5345 }
 0xfae   :  { %v2906_v10 = vsel %vm1036_vm10, %v5346_v7, 0.0 }
 0xfb0   :  { %2907 = vadd.xlane.f32.xlu0 %v2906_v10 }
 0xfbd   :  { %2646 = vrot.lane.b32.xlu1 %v6297_v42, %s5417_s7 }
 0xfbf   :  { %v2890_v19 = vpop.xlane.xlu0 %2889 }
 0xfc0   :  { %5347 = vrcp.f32 %v2890_v19 }
 0xfc6   :  { %2643 = vrot.lane.b32.xlu0 %v6297_v42, %s5418_s21 }
 0xfca   :  { %v5348_v27 = vpop.eup %5347 }
 0xfcb   :  { %v2918_v29 = vmul.f32 %v5348_v27, %v5332_v5 }
 0xfcf   :  { %v2887_v26 = vpop.xlane.xlu1 %2886 }
 0xfd0   :  { %5349 = vrcp.f32 %v2887_v26 }
 0xfda   :  { %v5350_v28 = vpop.eup %5349 }
 0xfdb   :  { %v2917_v30 = vmul.f32 %v5350_v28, %v5334_v44 }
 0xfdd   :  { %v2925_v25 = vpack.c.bf16 %v2918_v29, %v2917_v30 }
 0xfdf   :  { %4940 = vmatmul.mubr.msk.bf16.vlgmr.msra.gmra.mrb[56].mxu0 %vm1036_vm10, %v2925_v25 }
 0xfe0   :  { %4951 = vmatprep.mubr.msk.bf16.mxu0 %vm5413_vm0, %v5412_v1 }
0x1030   :  { %v2893_v31 = vpop.xlane.xlu1 %2892 }
0x1031   :  { %5351 = vrcp.f32 %v2893_v31 }
0x1034   :  { %v2896_v32 = vpop.xlane.xlu0 %2895 }
0x1035   :  { %v2899_v33 = vpop.xlane.xlu1 %2898  ;;  %5353 = vrcp.f32 %v2896_v32 }
0x1036   :  { %5355 = vrcp.f32 %v2899_v33  ;;  %v3173_v33 = vrot.slane %v6281_v20, %v5596_v40 }
0x1039   :  { %v2905_v42 = vpop.xlane.xlu1 %2904  ;;  %v2902_v35 = vpop.xlane.xlu0 %2901 }
0x103a   :  { %5357 = vrcp.f32 %v2902_v35 }
0x103b   :  { %5359 = vrcp.f32 %v2905_v42  ;;  %v5352_v36 = vpop.eup %5351 }
0x103c   :  { %v2919_v38 = vmul.f32 %v5352_v36, %v5336_v60 }
0x103d   :  { %v2908_v3 = vpop.xlane.xlu0 %2907  ;;  %v2647_v41 = vpop.permute.xlu1 %2646 }
0x103e   :  { %5361 = vrcp.f32 %v2908_v3 }
0x103f   :  { %v5354_v37 = vpop.eup %5353 }
0x1040   :  { %v2920_v5 = vmul.f32 %v5354_v37, %v5338_v63  ;;  %v5356_v44 = vpop.eup %5355 }
0x1041   :  { %v2644_v39 = vpop.permute.xlu0 %2643  ;;  %v2921_v49 = vmul.f32 %v5356_v44, %v5340_v2 }
0x1042   :  { %4950 = vmatpush3.bf16.msra.mxu0 %v2644_v39  ;;  %v2926_v43 = vpack.c.bf16 %v2920_v5, %v2919_v38 }
0x1043   :  { %4961 = vmatprep.subr.bf16.mxu0 %v5412_v1 }
0x1044   :  { %4946 = vmatmul.mubr.msk.bf16.vlgmr.msra.gmra.mrb[56].mxu1 %vm1036_vm10, %v2926_v43  ;;  %v5358_v45 = vpop.eup %5357 }
0x1045   :  { %4956 = vmatpush3.bf16.msra.mxu1 %v2647_v41  ;;  %4957 = vmatprep.mubr.msk.bf16.mxu1 %vm5413_vm0, %v5412_v1  ;;  %v5360_v47 = vpop.eup %5359  ;;  %v2922_v50 = vmul.f32 %v5358_v45, %v5344_v12 }
0x1046   :  { %4969 = vmatprep.subr.bf16.mxu1 %v5412_v1  ;;  %v2923_v55 = vmul.f32 %v5360_v47, %v5342_v11 }
0x1047   :  { %v2927_v54 = vpack.c.bf16 %v2922_v50, %v2921_v49 }
0x1048   :  { %v5362_v53 = vpop.eup %5361 }
0x1049   :  { %v2924_v56 = vmul.f32 %v5362_v53, %v5346_v7  ;;  %4952 = vmatmul.mubr.msk.bf16.vlgmr.msra.gmra.mrb[60].mxu0 %vm1036_vm10, %v2927_v54 }
0x104a   :  { %4962 = vmatpush3.bf16.msra.mxu0 %v5179_v52  ;;  %4965 = vmatprep.mubr.msk.bf16.mxu0 %vm5413_vm0, %v5412_v1 }
0x104b   :  { %v2928_v22 = vpack.c.bf16 %v2924_v56, %v2923_v55  ;;  %4963 = vmatprep.subr.bf16.mxu0 %v5412_v1 }
0x104d   :  { %4958 = vmatmul.mubr.msk.bf16.vlgmr.msra.gmra.mrb[60].mxu1 %vm1036_vm10, %v2928_v22  ;;  %v5189_v22 = vld [vmem:[%s6727_s14 + $0x104] ss:$16 sps:$4 sm:$0xff]  }
0x104e   :  { %4970 = vmatpush3.bf16.msra.mxu1 %v5181_v0  ;;  %4973 = vmatprep.mubr.msk.bf16.mxu1 %vm5413_vm0, %v5412_v1  ;;  %v5187_v0 = vld [vmem:[%s6727_s14 + $0x100] ss:$16 sps:$4 sm:$0xff]  }
0x104f   :  { %4964 = vmatpush3.bf16.msra.mxu0 %v5180_v6  ;;  %4971 = vmatprep.subr.bf16.mxu1 %v5412_v1  ;;  %v5192_v6 = vld [vmem:[%s6727_s14 + $0x10c] ss:$16 sps:$4 sm:$0xff]  }
0x1050   :  { %4977 = vmatprep.subr.bf16.mxu0 %v5412_v1 }
0x1052   :  { %4972 = vmatpush3.bf16.msra.mxu1 %v5182_v21  ;;  %v5198_v21 = vld [vmem:[%s6727_s14 + $0x12c] ss:$16 sps:$4 sm:$0xff]  }
0x1053   :  { %4985 = vmatprep.subr.bf16.mxu1 %v5412_v1 }
0x10b2   :  { %v2966_v8 = vpop.f32.mrb[56].mxu0 }
0x10b3   :  { %v4941_v59 = vpop.f32.mrb[57].mxu0 }
0x10b4   :  { %v2969_v46 = vpop.f32.mrb[58].mxu0  ;;  %v5196_v59 = vld [vmem:[%s6727_s14 + $0x128] ss:$16 sps:$4 sm:$0xff]  }
0x10b5   :  { %v3105_v58 = vpack.c.bf16 %v2969_v46, %v2966_v8  ;;  %v4942_v60 = vpop.f32.mrb[59].mxu0  ;;  %v5193_v8 = vld [vmem:[%s6727_s14 + $0x120] ss:$16 sps:$4 sm:$0xff]  }
0x10b7   :  { %4966 = vmatmul.mubr.msk.bf16.vlgmr.msra.gmra.mrb[64].mxu0 %vm847_vm7, %v3105_v58 }
0x10b8   :  { %4978 = vmatpush3.bf16.msra.mxu0 %v5183_v57  ;;  %4981 = vmatprep.mubr.msk.bf16.mxu0 %vm5413_vm0, %v5412_v1 }
0x10b9   :  { %4979 = vmatprep.subr.bf16.mxu0 %v5412_v1 }
0x10bc   :  { %4980 = vmatpush3.bf16.msra.mxu0 %v5184_v61 }
0x10bd   :  { %3615 = vmatprep.subr.bf16.mxu0 %v5189_v22  ;;  %v5235_v22 = vld [vmem:[%s6728_s15 + $0x140] sm:$0xff]  }
0x1117   :  { %v3010_v62 = vpop.f32.mrb[56].mxu1 }
0x1118   :  { %v4947_v63 = vpop.f32.mrb[57].mxu1 }
0x1119   :  { %v3013_v2 = vpop.f32.mrb[58].mxu1 }
0x111a   :  { %v3106_v9 = vpack.c.bf16 %v3013_v2, %v3010_v62  ;;  %v4948_v11 = vpop.f32.mrb[59].mxu1 }
0x111b   :  { %v5199_v11 = vld [vmem:[%s6727_s14 + $0x140] ss:$16 sps:$4 sm:$0xff]  }
0x111c   :  { %4974 = vmatmul.mubr.msk.bf16.vlgmr.msra.gmra.mrb[64].mxu1 %vm847_vm7, %v3106_v9  ;;  %v3054_v12 = vpop.f32.mrb[60].mxu0  ;;  %v5204_v9 = vld [vmem:[%s6727_s14 + $0x14c] ss:$16 sps:$4 sm:$0xff]  }
0x111d   :  { %4986 = vmatpush3.bf16.msra.mxu1 %v5185_v4  ;;  %4989 = vmatprep.mubr.msk.bf16.mxu1 %vm5413_vm0, %v5412_v1  ;;  %v4953_v18 = vpop.f32.mrb[61].mxu0  ;;  %v5201_v4 = vld [vmem:[%s6727_s14 + $0x144] ss:$16 sps:$4 sm:$0xff]  }
0x111e   :  { %4987 = vmatprep.subr.bf16.mxu1 %v5412_v1  ;;  %v3057_v7 = vpop.f32.mrb[62].mxu0  ;;  %v5210_v18 = vld [vmem:[%s6727_s14 + $0x16c] ss:$16 sps:$4 sm:$0xff]  }
0x111f   :  { %v3107_v10 = vpack.c.bf16 %v3057_v7, %v3054_v12  ;;  %v4954_v19 = vpop.f32.mrb[63].mxu0  ;;  %v5202_v12 = vld [vmem:[%s6727_s14 + $0x148] ss:$16 sps:$4 sm:$0xff]   ;;  %v5205_v7 = vld [vmem:[%s6727_s14 + $0x160] ss:$16 sps:$4 sm:$0xff]  }
0x1120   :  { %v3098_v26 = vpop.f32.mrb[60].mxu1  ;;  %v5213_v19 = vld [vmem:[%s6727_s14 + $0x184] ss:$16 sps:$4 sm:$0xff]  }
0x1121   :  { %v4959_v27 = vpop.f32.mrb[61].mxu1  ;;  %4988 = vmatpush3.bf16.msra.mxu1 %v5186_v17  ;;  %4982 = vmatmul.mubr.msk.bf16.vlgmr.msra.gmra.mrb[68].mxu0 %vm847_vm7, %v3107_v10  ;;  %v5207_v17 = vld [vmem:[%s6727_s14 + $0x164] ss:$16 sps:$4 sm:$0xff]   ;;  %v5208_v10 = vld [vmem:[%s6727_s14 + $0x168] ss:$16 sps:$4 sm:$0xff]  }
0x1122   :  { %v3101_v28 = vpop.f32.mrb[62].mxu1  ;;  %3647 = vmatprep.mubr.bf16.mxu0 %v5415_v51  ;;  %3658 = vmatprep.subr.bf16.mxu1 %v5192_v6  ;;  %v5211_v27 = vld [vmem:[%s6727_s14 + $0x180] ss:$16 sps:$4 sm:$0xff]  }
0x1123   :  { %v3108_v29 = vpack.c.bf16 %v3101_v28, %v3098_v26  ;;  %v4960_v30 = vpop.f32.mrb[63].mxu1  ;;  %3616 = vmatpush1.bf16.msra.mxu0 %v5187_v0  ;;  %v5216_v26 = vld [vmem:[%s6727_s14 + $0x18c] ss:$16 sps:$4 sm:$0xff]   ;;  %v5214_v28 = vld [vmem:[%s6727_s14 + $0x188] ss:$16 sps:$4 sm:$0xff]   ;;  %v5237_v6 = vld [vmem:[%s6728_s15 + $0x100] sm:$0xff]  }
0x1124   :  { %v5222_v30 = vld [vmem:[%s6727_s14 + $0x1ac] ss:$16 sps:$4 sm:$0xff]  }
0x1125   :  { %4990 = vmatmul.mubr.msk.bf16.vlgmr.msra.gmra.mrb[68].mxu1 %vm847_vm7, %v3108_v29  ;;  %v5219_v29 = vld [vmem:[%s6727_s14 + $0x1a4] ss:$16 sps:$4 sm:$0xff]  }
0x1126   :  { %3690 = vmatprep.mubr.bf16.mxu1 %v5415_v51 }
0x118a   :  { %v3163_v25 = vpop.f32.mrb[64].mxu0 }
0x118b   :  { %v4967_v31 = vpop.f32.mrb[65].mxu0  ;;  %v3174_v42 = vadd.f32 %v3173_v33, %v3163_v25  ;;  %v5217_v25 = vld [vmem:[%s6727_s14 + $0x1a0] ss:$16 sps:$4 sm:$0xff]  }
0x118c   :  { %v3166_v1 = vpop.f32.mrb[66].mxu0  ;;  %v5220_v31 = vld [vmem:[%s6727_s14 + $0x1a8] ss:$16 sps:$4 sm:$0xff]  }
0x118d   :  { %v4968_v32 = vpop.f32.mrb[67].mxu0  ;;  %v3175_v36 = vadd.f32 %v3173_v33, %v3166_v1  ;;  %v5225_v1 = vld [vmem:[%s6727_s14 + $0x1c4] ss:$16 sps:$4 sm:$0xff]   ;;  %v5223_v33 = vld [vmem:[%s6727_s14 + $0x1c0] ss:$16 sps:$4 sm:$0xff]  }
0x118e   :  { %v5228_v32 = vld [vmem:[%s6727_s14 + $0x1cc] ss:$16 sps:$4 sm:$0xff]  }
0x11ef   :  { %v3229_v35 = vpop.f32.mrb[64].mxu1 }
0x11f0   :  { %v3236_v3 = vadd.f32 %v3229_v35, %v3174_v42  ;;  %v4975_v37 = vpop.f32.mrb[65].mxu1  ;;  %v5226_v42 = vld [vmem:[%s6727_s14 + $0x1c8] ss:$16 sps:$4 sm:$0xff]   ;;  %v5231_v35 = vld [vmem:[%s6727_s14 + $0x1e4] ss:$16 sps:$4 sm:$0xff]  }
0x11f1   :  { %v3232_v38 = vpop.f32.mrb[66].mxu1  ;;  %v5232_v37 = vld [vmem:[%s6727_s14 + $0x1e8] ss:$16 sps:$4 sm:$0xff]  }
0x11f2   :  { %v3237_v5 = vadd.f32 %v3232_v38, %v3175_v36  ;;  %v4976_v39 = vpop.f32.mrb[67].mxu1  ;;  %v5234_v36 = vld [vmem:[%s6727_s14 + $0x1ec] ss:$16 sps:$4 sm:$0xff]  }
0x11f4   :  { %v3291_v43 = vpop.f32.mrb[68].mxu0 }
0x11f5   :  { %v3298_v44 = vadd.f32 %v3291_v43, %v3236_v3  ;;  %v4983_v41 = vpop.f32.mrb[69].mxu0  ;;  %v5229_v3 = vld [vmem:[%s6727_s14 + $0x1e0] ss:$16 sps:$4 sm:$0xff]  }
0x11f6   :  { %v3294_v45 = vpop.f32.mrb[70].mxu0 }
0x11f7   :  { %v3299_v51 = vadd.f32 %v3294_v45, %v3237_v5  ;;  %v4984_v47 = vpop.f32.mrb[71].mxu0  ;;  %v3389_v45 = vrot.slane %v6281_v20, %v5591_v34 }
0x11f8   :  { %v3353_v49 = vpop.f32.mrb[68].mxu1 }
0x11f9   :  { %v3360_v50 = vadd.f32 %v3353_v49, %v3298_v44  ;;  %v4991_v52 = vpop.f32.mrb[69].mxu1 }
0x11fa   :  { %v3356_v53 = vpop.f32.mrb[70].mxu1 }
0x11fb   :  { %v6415_v40 = vadd.f32 %v3360_v50, %v6189_v48  ;;  %v3361_v54 = vadd.f32 %v3356_v53, %v3299_v51  ;;  %v4992_v55 = vpop.f32.mrb[71].mxu1  ;;  %v5190_v48 = vld [vmem:[%s6727_s14 + $0x108] ss:$16 sps:$4 sm:$0xff]   ;;  %v3395_v53 = vrot.slane %v6281_v20, %v5648_v16  ;;  %v5238_v20 = vld [vmem:[%s6728_s15 + $0x180] sm:$0xff]  }
0x11fc   :  { %3659 = vmatpush1.bf16.msra.mxu1 %v5190_v48  ;;  %v5236_v48 = vld [vmem:[%s6728_s15 + $0x1c0] sm:$0xff]  }
0x11fd   :  { %3364 = vadd.xlane.f32.xlu1 %v6415_v40  ;;  %v3363_v56 = vadd.f32 %v3361_v54, %v6192_v14  ;;  %v5195_v14 = vld [vmem:[%s6727_s14 + $0x124] ss:$16 sps:$4 sm:$0xff]   ;;  %3660 = vmatprep.subr.bf16.mxu1 %v5198_v21  ;;  %v5240_v21 = vld [vmem:[%s6728_s15 + $0x1c8] sm:$0xff]  }
0x11fe   :  { %3617 = vmatprep.subr.bf16.mxu0 %v5195_v14  ;;  %v5239_v14 = vld [vmem:[%s6728_s15 + $0x148] sm:$0xff]  }
0x11ff   :  { %3366 = vadd.xlane.f32.xlu0 %v3363_v56  ;;  %3618 = vmatpush1.bf16.msra.mxu0 %v5193_v8  ;;  %v5241_v8 = vld [vmem:[%s6728_s15 + $0x108] sm:$0xff]  }
0x1200   :  { %3661 = vmatpush1.bf16.msra.mxu1 %v5196_v59  ;;  %3619 = vmatprep.subr.bf16.mxu0 %v5201_v4  ;;  %v5242_v59 = vld [vmem:[%s6728_s15 + $0x188] sm:$0xff]   ;;  %v5251_v4 = vld [vmem:[%s6728_s15 + $0x160] sm:$0xff]  }
0x1201   :  { %3662 = vmatprep.subr.bf16.mxu1 %v5204_v9  ;;  %v5252_v9 = vld [vmem:[%s6728_s15 + $0x1e0] sm:$0xff]  }
0x1203   :  { %3620 = vmatpush1.bf16.msra.mxu0 %v5199_v11  ;;  %v5253_v11 = vld [vmem:[%s6728_s15 + $0x120] sm:$0xff]  }
0x1204   :  { %3663 = vmatpush1.bf16.msra.mxu1 %v5202_v12  ;;  %3621 = vmatprep.subr.bf16.mxu0 %v5207_v17  ;;  %v5254_v12 = vld [vmem:[%s6728_s15 + $0x1a0] sm:$0xff]   ;;  %v5255_v17 = vld [vmem:[%s6728_s15 + $0x168] sm:$0xff]  }
0x1205   :  { %3664 = vmatprep.subr.bf16.mxu1 %v5210_v18  ;;  %v5256_v18 = vld [vmem:[%s6728_s15 + $0x1e8] sm:$0xff]  }
0x1207   :  { %3622 = vmatpush1.bf16.msra.mxu0 %v5205_v7  ;;  %v5257_v7 = vld [vmem:[%s6728_s15 + $0x128] sm:$0xff]  }
0x1208   :  { %3665 = vmatpush1.bf16.msra.mxu1 %v5208_v10  ;;  %3623 = vmatprep.subr.bf16.mxu0 %v5213_v19  ;;  %v5258_v10 = vld [vmem:[%s6728_s15 + $0x1a8] sm:$0xff]   ;;  %v5259_v19 = vld [vmem:[%s6728_s15 + $0x170] sm:$0xff]  }
0x1209   :  { %3666 = vmatprep.subr.bf16.mxu1 %v5216_v26  ;;  %v5260_v26 = vld [vmem:[%s6728_s15 + $0x1f0] sm:$0xff]  }
0x120b   :  { %3624 = vmatpush1.bf16.msra.mxu0 %v5211_v27  ;;  %v5261_v27 = vld [vmem:[%s6728_s15 + $0x130] sm:$0xff]  }
0x120c   :  { %3667 = vmatpush1.bf16.msra.mxu1 %v5214_v28  ;;  %3625 = vmatprep.subr.bf16.mxu0 %v5219_v29  ;;  %v5262_v28 = vld [vmem:[%s6728_s15 + $0x1b0] sm:$0xff]   ;;  %v5263_v29 = vld [vmem:[%s6728_s15 + $0x178] sm:$0xff]  }
0x120d   :  { %3668 = vmatprep.subr.bf16.mxu1 %v5222_v30  ;;  %v5264_v30 = vld [vmem:[%s6728_s15 + $0x1f8] sm:$0xff]  }
0x120f   :  { %3626 = vmatpush1.bf16.msra.mxu0 %v5217_v25  ;;  %v5265_v25 = vld [vmem:[%s6728_s15 + $0x138] sm:$0xff]  }
0x1210   :  { %3669 = vmatpush1.bf16.msra.mxu1 %v5220_v31  ;;  %3627 = vmatprep.subr.bf16.mxu0 %v5225_v1  ;;  %v5266_v31 = vld [vmem:[%s6728_s15 + $0x1b8] sm:$0xff]   ;;  %v4414_v1 = vld [vmem:[%s6724_s11 + $0x4] sm:$0xf] }
0x1211   :  { %3670 = vmatprep.subr.bf16.mxu1 %v5228_v32  ;;  %v3438_v32 = vrot.slane %v4414_v1, %v5581_v24 }
0x1213   :  { %3628 = vmatpush1.bf16.msra.mxu0 %v5223_v33  ;;  %v3446_v33 = vrot.slane %v4414_v1, %v5591_v34 }
0x1214   :  { %3671 = vmatpush1.bf16.msra.mxu1 %v5226_v42  ;;  %3629 = vmatprep.subr.bf16.mxu0 %v5231_v35  ;;  %v3442_v42 = vrot.slane %v4414_v1, %v5645_v15  ;;  %v3450_v35 = vrot.slane %v4414_v1, %v5648_v16 }
0x1215   :  { %3672 = vmatprep.subr.bf16.mxu1 %v5234_v36 }
0x1217   :  { %3630 = vmatpush1.bf16.msra.mxu0 %v5229_v3 }
0x1218   :  { %3673 = vmatpush1.bf16.msra.mxu1 %v5232_v37  ;;  %4687 = vmatprep.subr.bf16.mxu0 %v5235_v22 }
0x1219   :  { %4709 = vmatprep.subr.bf16.mxu1 %v5236_v48 }
0x128a   :  { %v3365_v46 = vpop.xlane.xlu1 %3364 }
0x128b   :  { %v3368_v57 = vmul.f32 0.0078125, %v3365_v46  ;;  %v5243_v46 = vld [vmem:[%s6728_s15 + $0x150] sm:$0xff]  }
0x128c   :  { %v3367_v58 = vpop.xlane.xlu0 %3366 }
0x128d   :  { %v6444_v60 = vsub.f32 %v6415_v40, %v3368_v57  ;;  %v3369_v61 = vmul.f32 0.0078125, %v3367_v58  ;;  %v5244_v57 = vld [vmem:[%s6728_s15 + $0x1d0] sm:$0xff]  }
0x128e   :  { %v5245_v58 = vld [vmem:[%s6728_s15 + $0x110] sm:$0xff]  }
0x128f   :  { %v6446_v62 = vsub.f32 %v3363_v56, %v3369_v61  ;;  %v3372_v63 = vmul.f32 %v6444_v60, %v6444_v60  ;;  %v5247_v61 = vld [vmem:[%s6728_s15 + $0x158] sm:$0xff]  }
0x1291   :  { %3374 = vadd.xlane.f32.xlu0 %v3372_v63  ;;  %v3373_v2 = vmul.f32 %v6446_v62, %v6446_v62  ;;  %v5249_v63 = vld [vmem:[%s6728_s15 + $0x118] sm:$0xff]  }
0x1293   :  { %3376 = vadd.xlane.f32.xlu1 %v3373_v2  ;;  %v5250_v2 = vld [vmem:[%s6728_s15 + $0x198] sm:$0xff]  }
0x131e   :  { %v3375_v38 = vpop.xlane.xlu0 %3374 }
0x131f   :  { %v3378_v5 = vmul.f32 0.0078125, %v3375_v38 }
0x1320   :  { %v3377_v39 = vpop.xlane.xlu1 %3376 }
0x1321   :  { %v3380_v43 = vadd.f32 1e-12, %v3378_v5  ;;  %v3379_v44 = vmul.f32 0.0078125, %v3377_v39 }
0x1323   :  { %5363 = vrsqrt.f32 %v3380_v43  ;;  %v3381_v41 = vadd.f32 1e-12, %v3379_v44 }
0x1325   :  { %5365 = vrsqrt.f32 %v3381_v41 }
0x132d   :  { %v5364_v51 = vpop.eup %5363 }
0x132e   :  { %v3384_v47 = vmul.f32 %v5364_v51, %v6444_v60  ;;  %v5246_v60 = vld [vmem:[%s6728_s15 + $0x190] sm:$0xff]  }
0x132f   :  { %v5366_v49 = vpop.eup %5365 }
0x1330   :  { %v3385_v50 = vmul.f32 %v5366_v49, %v6446_v62  ;;  %v3390_v52 = vmul.f32 %v3389_v45, %v3384_v47  ;;  %v5248_v62 = vld [vmem:[%s6728_s15 + $0x1d8] sm:$0xff]  }
0x1332   :  { %v3391_v54 = vmul.f32 %v3389_v45, %v3385_v50  ;;  %v3396_v55 = vadd.f32 %v3395_v53, %v3390_v52 }
0x1334   :  { %v3397_v56 = vadd.f32 %v3395_v53, %v3391_v54 }
0x1336   :  { %v3398_v0 = vpack.c.bf16 %v3397_v56, %v3396_v55 }
0x1338   :  { %3648 = vmatmul.mubr.bf16.vlgmr.msra.gmra.mrb[72].mxu0 %v3398_v0  ;;  %3691 = vmatmul.mubr.bf16.vlgmr.msra.gmra.mrb[72].mxu1 %v3398_v0 }
0x1339   :  { %4688 = vmatpush3.bf16.msra.mxu0 %v5237_v6  ;;  %4710 = vmatpush3.bf16.msra.mxu1 %v5238_v20 }
0x133a   :  { %4689 = vmatprep.subr.bf16.mxu0 %v5239_v14  ;;  %4711 = vmatprep.subr.bf16.mxu1 %v5240_v21 }
0x133d   :  { %4690 = vmatpush3.bf16.msra.mxu0 %v5241_v8  ;;  %4712 = vmatpush3.bf16.msra.mxu1 %v5242_v59 }
0x133e   :  { %4691 = vmatprep.subr.bf16.mxu0 %v5243_v46  ;;  %4713 = vmatprep.subr.bf16.mxu1 %v5244_v57 }
0x1341   :  { %4692 = vmatpush3.bf16.msra.mxu0 %v5245_v58  ;;  %4714 = vmatpush3.bf16.msra.mxu1 %v5246_v60 }
0x1342   :  { %4693 = vmatprep.subr.bf16.mxu0 %v5247_v61  ;;  %4715 = vmatprep.subr.bf16.mxu1 %v5248_v62 }
0x1345   :  { %4694 = vmatpush3.bf16.msra.mxu0 %v5249_v63  ;;  %4716 = vmatpush3.bf16.msra.mxu1 %v5250_v2 }
0x1346   :  { %4695 = vmatprep.subr.bf16.mxu0 %v5251_v4  ;;  %4717 = vmatprep.subr.bf16.mxu1 %v5252_v9 }
0x1349   :  { %4696 = vmatpush3.bf16.msra.mxu0 %v5253_v11  ;;  %4718 = vmatpush3.bf16.msra.mxu1 %v5254_v12 }
0x134a   :  { %4697 = vmatprep.subr.bf16.mxu0 %v5255_v17  ;;  %4719 = vmatprep.subr.bf16.mxu1 %v5256_v18 }
0x134d   :  { %4698 = vmatpush3.bf16.msra.mxu0 %v5257_v7  ;;  %4720 = vmatpush3.bf16.msra.mxu1 %v5258_v10 }
0x134e   :  { %4699 = vmatprep.subr.bf16.mxu0 %v5259_v19  ;;  %4721 = vmatprep.subr.bf16.mxu1 %v5260_v26 }
0x1351   :  { %4700 = vmatpush3.bf16.msra.mxu0 %v5261_v27  ;;  %4722 = vmatpush3.bf16.msra.mxu1 %v5262_v28 }
0x1352   :  { %4701 = vmatprep.subr.bf16.mxu0 %v5263_v29  ;;  %4723 = vmatprep.subr.bf16.mxu1 %v5264_v30 }
0x1355   :  { %4702 = vmatpush3.bf16.msra.mxu0 %v5265_v25  ;;  %4724 = vmatpush3.bf16.msra.mxu1 %v5266_v31 }
0x140b   :  { %v3649_v36 = vpop.f32.mrb[72].mxu0  ;;  %v3692_v3 = vpop.f32.mrb[72].mxu1 }
0x140c   :  { %v6633_v37 = vadd.f32 %v3649_v36, %v3438_v32  ;;  %v6635_v38 = vadd.f32 %v3692_v3, %v3446_v33  ;;  %v3651_v5 = vpop.f32.mrb[73].mxu0  ;;  %v3694_v39 = vpop.f32.mrb[73].mxu1 }
0x140d   :  { %v6637_v43 = vadd.f32 %v3651_v5, %v3442_v42  ;;  %v6639_v44 = vadd.f32 %v3694_v39, %v3450_v35  ;;  %v3653_v41 = vpop.f32.mrb[74].mxu0  ;;  %v3696_v24 = vpop.f32.mrb[74].mxu1 }
0x140e   :  { %v3701_v34 = vmul.f32 %v6633_v37, %v6633_v37  ;;  %v3703_v15 = vmul.f32 %v6635_v38, %v6635_v38  ;;  %v6645_v16 = vadd.f32 %v3653_v41, %v3438_v32  ;;  %v6647_v45 = vadd.f32 %v3696_v24, %v3446_v33  ;;  %v3655_v51 = vpop.f32.mrb[75].mxu0  ;;  %v3698_v47 = vpop.f32.mrb[75].mxu1 }
0x140f   :  { %v3702_v49 = vmul.f32 %v6637_v43, %v6637_v43  ;;  %v3704_v50 = vmul.f32 %v6639_v44, %v6639_v44  ;;  %v6653_v52 = vadd.f32 %v3655_v51, %v3442_v42  ;;  %v6655_v53 = vadd.f32 %v3698_v47, %v3450_v35 }
0x1410   :  { %v3709_v54 = vmul.f32 %v3701_v34, %v6633_v37  ;;  %v3711_v55 = vmul.f32 %v3703_v15, %v6635_v38  ;;  %v3705_v56 = vmul.f32 %v6645_v16, %v6645_v16  ;;  %v3707_v0 = vmul.f32 %v6647_v45, %v6647_v45 }
0x1411   :  { %v3710_v22 = vmul.f32 %v3702_v49, %v6637_v43  ;;  %v3712_v48 = vmul.f32 %v3704_v50, %v6639_v44  ;;  %v3706_v6 = vmul.f32 %v6653_v52, %v6653_v52  ;;  %v3708_v20 = vmul.f32 %v6655_v53, %v6655_v53 }
0x1412   :  { %v3717_v14 = vmul.f32 0.044715, %v3709_v54  ;;  %v3719_v21 = vmul.f32 0.044715, %v3711_v55  ;;  %v3713_v8 = vmul.f32 %v3705_v56, %v6645_v16  ;;  %v3715_v59 = vmul.f32 %v3707_v0, %v6647_v45 }
0x1413   :  { %v3718_v46 = vmul.f32 0.044715, %v3710_v22  ;;  %v3720_v57 = vmul.f32 0.044715, %v3712_v48  ;;  %v3714_v58 = vmul.f32 %v3706_v6, %v6653_v52  ;;  %v3716_v60 = vmul.f32 %v3708_v20, %v6655_v53 }
0x1414   :  { %v3725_v61 = vadd.f32 %v3717_v14, %v6633_v37  ;;  %v3727_v62 = vadd.f32 %v3719_v21, %v6635_v38  ;;  %v3721_v63 = vmul.f32 0.044715, %v3713_v8  ;;  %v3723_v2 = vmul.f32 0.044715, %v3715_v59 }
0x1415   :  { %v3726_v4 = vadd.f32 %v3718_v46, %v6637_v43  ;;  %v3728_v9 = vadd.f32 %v3720_v57, %v6639_v44  ;;  %v3722_v11 = vmul.f32 0.044715, %v3714_v58  ;;  %v3724_v12 = vmul.f32 0.044715, %v3716_v60 }
0x1416   :  { %v3733_v17 = vmul.f32 0.7978846, %v3725_v61  ;;  %v3735_v18 = vmul.f32 0.7978846, %v3727_v62  ;;  %v3729_v7 = vadd.f32 %v3721_v63, %v6645_v16  ;;  %v3731_v10 = vadd.f32 %v3723_v2, %v6647_v45 }
0x1417   :  { %v3734_v19 = vmul.f32 0.7978846, %v3726_v4  ;;  %v3736_v26 = vmul.f32 0.7978846, %v3728_v9  ;;  %v3730_v27 = vadd.f32 %v3722_v11, %v6653_v52  ;;  %v3732_v28 = vadd.f32 %v3724_v12, %v6655_v53 }
0x1418   :  { %5367 = vtanh.f32 %v3733_v17  ;;  %v3737_v29 = vmul.f32 0.7978846, %v3729_v7  ;;  %v3739_v30 = vmul.f32 0.7978846, %v3731_v10 }
0x1419   :  { %5369 = vtanh.f32 %v3735_v18  ;;  %v3738_v25 = vmul.f32 0.7978846, %v3730_v27  ;;  %v3740_v31 = vmul.f32 0.7978846, %v3732_v28 }
0x141a   :  { %5371 = vtanh.f32 %v3734_v19 }
0x141b   :  { %5373 = vtanh.f32 %v3736_v26 }
0x141c   :  { %5375 = vtanh.f32 %v3737_v29 }
0x141d   :  { %5377 = vtanh.f32 %v3739_v30 }
0x141e   :  { %5379 = vtanh.f32 %v3738_v25 }
0x141f   :  { %5381 = vtanh.f32 %v3740_v31  ;;  %v4140_v31 = vsub.s32 6, %v5578_v23 }
0x1422   :  { %v5368_v1 = vpop.eup %5367 }
0x1423   :  { %v5370_v32 = vpop.eup %5369  ;;  %v3749_v33 = vadd.f32 1.0, %v5368_v1 }
0x1424   :  { %v5372_v42 = vpop.eup %5371  ;;  %v3751_v35 = vadd.f32 1.0, %v5370_v32 }
0x1425   :  { %v5374_v36 = vpop.eup %5373  ;;  %v3750_v3 = vadd.f32 1.0, %v5372_v42  ;;  %v3757_v24 = vmul.f32 0.5, %v3749_v33 }
0x1426   :  { %v5376_v5 = vpop.eup %5375  ;;  %v3752_v39 = vadd.f32 1.0, %v5374_v36  ;;  %v3759_v51 = vmul.f32 0.5, %v3751_v35 }
0x1427   :  { %v5378_v41 = vpop.eup %5377  ;;  %v3753_v34 = vadd.f32 1.0, %v5376_v5  ;;  %v3758_v55 = vmul.f32 0.5, %v3750_v3  ;;  %v3765_v48 = vmul.f32 %v3757_v24, %v6633_v37 }
0x1428   :  { %v5380_v15 = vpop.eup %5379  ;;  %v3755_v47 = vadd.f32 1.0, %v5378_v41  ;;  %v3760_v22 = vmul.f32 0.5, %v3752_v39  ;;  %v3767_v14 = vmul.f32 %v3759_v51, %v6635_v38 }
0x1429   :  { %v5382_v49 = vpop.eup %5381  ;;  %v3761_v50 = vmul.f32 0.5, %v3753_v34  ;;  %v3754_v54 = vadd.f32 1.0, %v5380_v15  ;;  %v3766_v59 = vmul.f32 %v3758_v55, %v6637_v43 }
0x142a   :  { %v3763_v56 = vmul.f32 0.5, %v3755_v47  ;;  %v3756_v0 = vadd.f32 1.0, %v5382_v49  ;;  %v3768_v58 = vmul.f32 %v3760_v22, %v6639_v44 }
0x142b   :  { %v3769_v6 = vmul.f32 %v3761_v50, %v6645_v16  ;;  %v3762_v20 = vmul.f32 0.5, %v3754_v54 }
0x142c   :  { %v3771_v21 = vmul.f32 %v3763_v56, %v6647_v45  ;;  %v3764_v8 = vmul.f32 0.5, %v3756_v0 }
0x142d   :  { %v3770_v46 = vmul.f32 %v3762_v20, %v6653_v52  ;;  %v3773_v57 = vpack.c.bf16 %v3769_v6, %v3765_v48 }
0x142e   :  { %v3772_v60 = vmul.f32 %v3764_v8, %v6655_v53  ;;  %v3775_v61 = vpack.c.bf16 %v3771_v21, %v3767_v14  ;;  %v5386_v53 = vld [vmem:[%s6722_s9 + $0x8] sm:$0xff] }
0x142f   :  { %v3774_v62 = vpack.c.bf16 %v3770_v46, %v3766_v59  ;;  %v4118_v12 = vrot.slane %v5386_v53, %v6181_v13 }
0x1430   :  { %v3776_v37 = vpack.c.bf16 %v3772_v60, %v3768_v58 }
0x1431   :  { %4066 = vmatprep.mubr.bf16.mxu0 %v3774_v62 }
0x1432   :  { %4106 = vmatprep.mubr.bf16.mxu1 %v3776_v37  ;;  %4067 = vmatmul.mubr.bf16.vlgmr.msra.gmra.mrb[76].mxu0 %v3773_v57 }
0x1433   :  { %4107 = vmatmul.mubr.bf16.vlgmr.msra.gmra.mrb[76].mxu1 %v3775_v61 }
0x1505   :  { %v4703_v38 = vpop.f32.mrb[76].mxu0 }
0x1506   :  { %v4725_v16 = vpop.f32.mrb[76].mxu1  ;;  %v4704_v45 = vpop.f32.mrb[77].mxu0 }
0x1507   :  { %v4705_v63 = vadd.f32 %v4704_v45, %v4703_v38  ;;  %v4726_v2 = vpop.f32.mrb[77].mxu1  ;;  %v4706_v43 = vpop.f32.mrb[78].mxu0 }
0x1508   :  { %v4727_v4 = vadd.f32 %v4726_v2, %v4725_v16  ;;  %v4728_v52 = vpop.f32.mrb[78].mxu1  ;;  %v4707_v9 = vpop.f32.mrb[79].mxu0 }
0x1509   :  { %v4729_v11 = vpop.f32.mrb[79].mxu1 }
0x150a   :  { %v4109_v44 = vadd.f32 %v4727_v4, %v4705_v63 }
0x150c   :  { %v4114_v17 = vadd.f32 %v4109_v44, %v6415_v40  ;;  %v5387_v40 = vld [vmem:[%s6721_s8] sm:$0xff] }
0x150d   :  { %v4136_v1 = vrot.slane %v5387_v40, %v6181_v13  ;;  %v4141_v42 = vrot.slane %v5387_v40, %v4140_v31 }
0x150e   :  { %v4119_v18 = vadd.f32 %v4118_v12, %v4114_v17 }
0x1510   :  { %v4120_v7 = vsel %vm258_vm2, %v4119_v18, 0.0 }
0x1511   :  { %4121 = vadd.xlane.f32.xlu0 %v4120_v7 }
0x159e   :  { %v4122_v10 = vpop.xlane.xlu0 %4121 }
0x159f   :  { %v4123_v19 = vmul.f32 0.0078125, %v4122_v10 }
0x15a1   :  { %v4124_v26 = vsub.f32 %v4119_v18, %v4123_v19 }
0x15a3   :  { %v4125_v27 = vmul.f32 %v4124_v26, %v4124_v26 }
0x15a5   :  { %v4126_v28 = vsel %vm258_vm2, %v4125_v27, 0.0 }
0x15a6   :  { %4127 = vadd.xlane.f32.xlu1 %v4126_v28 }
0x1633   :  { %v4128_v29 = vpop.xlane.xlu1 %4127 }
0x1634   :  { %v4129_v30 = vmul.f32 0.0078125, %v4128_v29 }
0x1636   :  { %v4130_v25 = vadd.f32 1e-12, %v4129_v30 }
0x1638   :  { %5383 = vrsqrt.f32 %v4130_v25 }
0x1642   :  { %v5384_v32 = vpop.eup %5383 }
0x1643   :  { %v4132_v33 = vmul.f32 %v5384_v32, %v4124_v26 }
0x1645   :  { %v4137_v35 = vmul.f32 %v4136_v1, %v4132_v33 }
0x1647   :  { %v4142_v36 = vadd.f32 %v4141_v42, %v4137_v35 }
0x1649   :  { %4143 = vst [vmem:[#allocation2] sm:$0x3] %v4142_v36 }
0x164a   :  { %5399 = shalt.err (!%p5396_p4)
}
0x164b   :  { %s5400_s12 = scalar_lea.hbm %s6729_s16, 32 }
0x164c   :  { %p5401_p5 = scmp.ne.s32.totalorder %s6729_s16, %s5400_s12  ;;  %p5404_p6 = scmp.lt.u32.totalorder %s5400_s12, %s6729_s16 }
0x164e   :  { %p5406_p7 = pnand %p5404_p6, %p5401_p5 }
0x1650   :  { %5409 = shalt.err (!%p5406_p7)
}
0x1651   :  { %4153 = dma.vmem_to_hbm [thread:$0]  %s4151_s25, 32, %s6729_s16, [#allocation3]  }
0x1652   :  { %5410 = dma.done.wait [#allocation3], 32  }
0x1653   :  { %5411 = vsyncadd [#allocation3], 4294967264 }
0x1654   :  { %4157 = vsyncpa [#allocation3], 1 }

</bundles_post_ra>
